<compile_context>
chip_gen: v6e
topology: v6e:2x2x1
jax: 0.10.0
libtpu: 0.0.40
codegen_flags: <defaults>
</compile_context>

<pallas_src>
import functools

import jax
import jax.numpy as jnp
import numpy as np
from jax import lax
from jax.experimental import pallas as pl
from jax.experimental.pallas import tpu as pltpu


def _round_up(x, m):
    return (x + m - 1) // m * m


def _lstm_net_kernel(num_layers, Hp, Bp, T, time_unroll, *refs):
    """Fused multi-layer LSTM forward (padded sizes).

    refs layout:
      refs[0]                 : x_ref    (T*Bp, Dp)    bf16 input slab (time-major)
      refs[1 + 3*l + 0]       : wih_ref  (Din_p, 4Hp)  bf16 layer-l input weights (pre-T)
      refs[1 + 3*l + 1]       : whh_ref  (Hp,   4Hp)   bf16 layer-l recurrent weights (pre-T)
      refs[1 + 3*l + 2]       : b_ref    (1,    4Hp)   f32  layer-l combined bias
      refs[1 + 3*num_layers]  : out_ref  (Bp, Hp)      f32  top-layer final hidden
      refs[2 + 3*num_layers]  : gates_sc (T*Bp, 4Hp)   f32  VMEM scratch (x-projection)
      refs[3 + 3*num_layers]  : hseq_sc  (T*Bp, Hp)    bf16 VMEM scratch (if L > 1)
    """
    x_ref = refs[0]
    layer_refs = refs[1:1 + 3 * num_layers]
    out_ref = refs[1 + 3 * num_layers]
    gates_sc = refs[2 + 3 * num_layers]
    hseq_sc = refs[3 + 3 * num_layers] if num_layers > 1 else None

    h = jnp.zeros((Bp, Hp), jnp.float32)
    c = jnp.zeros((Bp, Hp), jnp.float32)

    for layer in range(num_layers):
        wih_ref = layer_refs[3 * layer + 0]
        whh_ref = layer_refs[3 * layer + 1]
        b_ref = layer_refs[3 * layer + 2]

        # ---- hoisted input projection: one big bf16 MXU matmul, f32 acc ----
        # NOTE: full read of hseq_sc happens before this layer's in-loop writes
        # (traced first), so the WAR on the shared scratch is safe.
        inp = x_ref[...] if layer == 0 else hseq_sc[...]          # (T*Bp, Din) bf16
        gates_sc[...] = (
            jnp.dot(inp, wih_ref[...], preferred_element_type=jnp.float32)
            + b_ref[...])                                          # (T*Bp, 4Hp) f32

        is_last = layer == num_layers - 1

        # ---- serial recurrence: only h @ W_hh + gate math on critical path ----
        def step(t, carry, whh_ref=whh_ref, is_last=is_last):
            h_prev, c_prev = carry
            row = pl.multiple_of(t * Bp, Bp)
            gates = gates_sc[pl.ds(row, Bp), :] + jnp.dot(
                h_prev.astype(jnp.bfloat16), whh_ref[...],
                preferred_element_type=jnp.float32)                # (Bp, 4Hp) f32
            i_g = jax.nn.sigmoid(gates[:, 0 * Hp:1 * Hp])
            f_g = jax.nn.sigmoid(gates[:, 1 * Hp:2 * Hp])
            g_g = jnp.tanh(gates[:, 2 * Hp:3 * Hp])
            o_g = jax.nn.sigmoid(gates[:, 3 * Hp:4 * Hp])
            c_new = f_g * c_prev + i_g * g_g
            h_new = o_g * jnp.tanh(c_new)
            if not is_last:
                hseq_sc[pl.ds(row, Bp), :] = h_new.astype(jnp.bfloat16)
            return (h_new, c_new)

        h = jnp.zeros((Bp, Hp), jnp.float32)
        c = jnp.zeros((Bp, Hp), jnp.float32)
        h, c = lax.fori_loop(0, T, step, (h, c), unroll=time_unroll)

    out_ref[...] = h


def lstm_forward(x_btd, params):
    """Matches PyTorch LSTM(..., batch_first=True, num_layers=L) -> out[:, -1, :].

    x_btd : (B, T, D) batch-first f32 input.
    params: tuple of per-layer (w_ih_t, w_hh_t, bias), shapes (D_in,4H), (H,4H), (1,4H).
    Returns (B, H) f32: top-layer hidden state at the last timestep.
    """
    num_layers = len(params)
    H = params[0][1].shape[0]
    B, T, D = x_btd.shape

    # Pad to TPU-friendly sizes: B -> sublane multiple, H/D -> lane multiples.
    Bp = _round_up(max(B, 8), 8)
    Hp = _round_up(max(H, 128), 128)
    Dp = _round_up(max(D, 128), 128)

    # Time-major, zero-pad B/D, flatten in the wrapper to a 2-D slab, cast bf16.
    x_tbd = jnp.transpose(x_btd, (1, 0, 2))                       # (T, B, D)
    x_pad = jnp.zeros((T, Bp, Dp), jnp.float32).at[:, :B, :D].set(x_tbd)
    x2d = x_pad.reshape(T * Bp, Dp).astype(jnp.bfloat16)          # (T*Bp, Dp)

    def pad_gates(a, pad_rows):
        # (rows, 4H) -> (pad_rows, 4*Hp), each gate block padded to Hp with 0.
        rows = a.shape[0]
        a4 = a.reshape(rows, 4, H)
        a4 = jnp.pad(a4, ((0, pad_rows - rows), (0, 0), (0, Hp - H)))
        return a4.reshape(pad_rows, 4 * Hp)

    flat_params = []
    d_in_pad = Dp
    for (w_ih_t, w_hh_t, bias) in params:
        wih = pad_gates(w_ih_t, d_in_pad).astype(jnp.bfloat16)    # (Din_p, 4Hp)
        whh = pad_gates(w_hh_t, Hp).astype(jnp.bfloat16)          # (Hp,    4Hp)
        b = pad_gates(bias, 1).astype(jnp.float32)                # (1,     4Hp)
        flat_params += [wih, whh, b]
        d_in_pad = Hp
    n_inputs = 1 + 3 * num_layers

    # ---- VMEM budget (single grid point -> everything resident once) ----
    total_bytes = x2d.size * 2
    for p in flat_params:
        total_bytes += p.size * p.dtype.itemsize
    total_bytes += Bp * Hp * 4                         # output
    total_bytes += T * Bp * 4 * Hp * 4                 # gates_sc (f32)
    if num_layers > 1:
        total_bytes += T * Bp * Hp * 2                 # hseq_sc (bf16)
    vmem_limit = int(min(96 * 2**20, max(2 * total_bytes + (4 << 20), 16 << 20)))

    # ---- advisory cost estimate ----
    flops = 0
    transcendentals = 0
    bytes_accessed = x2d.size * 2 + Bp * Hp * 4
    d_in = Dp
    for p_idx in range(num_layers):
        flops += 2 * T * Bp * d_in * 4 * Hp            # hoisted input projection
        flops += 2 * T * Bp * Hp * 4 * Hp              # recurrent matmuls
        transcendentals += T * Bp * 5 * Hp             # 3 sigmoid + 2 tanh / step
        for p in flat_params[3 * p_idx:3 * p_idx + 3]:
            bytes_accessed += p.size * p.dtype.itemsize
        d_in = Hp

    # Deep unrolling only pays off for small H (serially dependent steps).
    time_unroll = 8 if Hp <= 128 else (4 if Hp <= 512 else 2)
    time_unroll = int(min(T, time_unroll))

    kernel = functools.partial(_lstm_net_kernel, num_layers, Hp, Bp, T, time_unroll)

    scratch = [pltpu.VMEM((T * Bp, 4 * Hp), jnp.float32)]          # gate pre-activations
    if num_layers > 1:
        scratch.append(pltpu.VMEM((T * Bp, Hp), jnp.bfloat16))     # layer hidden sequence

    out_pad = pl.pallas_call(
        kernel,
        out_shape=jax.ShapeDtypeStruct((Bp, Hp), jnp.float32),
        in_specs=[pl.BlockSpec(memory_space=pltpu.MemorySpace.VMEM)] * n_inputs,
        out_specs=pl.BlockSpec(memory_space=pltpu.MemorySpace.VMEM),
        scratch_shapes=scratch,
        compiler_params=pltpu.CompilerParams(vmem_limit_bytes=vmem_limit),
        cost_estimate=pl.CostEstimate(
            flops=flops,
            transcendentals=transcendentals,
            bytes_accessed=bytes_accessed,
        ),
    )(x2d, *flat_params)

    return out_pad[:B, :H]


lstm_forward = jax.jit(lstm_forward)


def init_lstm_params(key, input_dim, hidden_dim, num_layers):
    """Deterministic init mimicking PyTorch's U(-1/sqrt(H), 1/sqrt(H))."""
    params = []
    bound = 1.0 / np.sqrt(hidden_dim)
    for layer in range(num_layers):
        d_in = input_dim if layer == 0 else hidden_dim
        key, k1, k2, k3, k4 = jax.random.split(key, 5)
        w_ih = jax.random.uniform(k1, (4 * hidden_dim, d_in), jnp.float32,
                                  -bound, bound)
        w_hh = jax.random.uniform(k2, (4 * hidden_dim, hidden_dim), jnp.float32,
                                  -bound, bound)
        b_ih = jax.random.uniform(k3, (4 * hidden_dim,), jnp.float32,
                                  -bound, bound)
        b_hh = jax.random.uniform(k4, (4 * hidden_dim,), jnp.float32,
                                  -bound, bound)
        # pre-transpose weights for (x @ W) form; combine the two biases.
        params.append((w_ih.T, w_hh.T, (b_ih + b_hh)[None, :]))
    return tuple(params)


def lstm_forward_ref(x_btd, params):
    """Pure-JAX f32 reference (lax.scan) for correctness checking."""
    h_seq = jnp.transpose(x_btd, (1, 0, 2))  # (T, B, D)
    B = x_btd.shape[0]
    for (w_ih_t, w_hh_t, bias) in params:
        H = w_hh_t.shape[0]

        def step(carry, x_t):
            h, c = carry
            gates = x_t @ w_ih_t + h @ w_hh_t + bias
            i = jax.nn.sigmoid(gates[:, 0 * H:1 * H])
            f = jax.nn.sigmoid(gates[:, 1 * H:2 * H])
            g = jnp.tanh(gates[:, 2 * H:3 * H])
            o = jax.nn.sigmoid(gates[:, 3 * H:4 * H])
            c = f * c + i * g
            h = o * jnp.tanh(c)
            return (h, c), h

        init = (jnp.zeros((B, H), jnp.float32), jnp.zeros((B, H), jnp.float32))
        _, h_seq = lax.scan(step, init, h_seq)
    return h_seq[-1]


if __name__ == "__main__":
    B, T, INPUT_DIM, HIDDEN_DIM, NUM_LAYERS = 2, 8, 16, 32, 2

    key = jax.random.PRNGKey(0)
    key_x, key_p = jax.random.split(key)
    x = jax.random.normal(key_x, (B, T, INPUT_DIM), jnp.float32)
    params = init_lstm_params(key_p, INPUT_DIM, HIDDEN_DIM, NUM_LAYERS)

    out = lstm_forward(x, params)
    out = jax.block_until_ready(out)

    ref = lstm_forward_ref(x, params)
    # bf16 matmul operands with f32 accumulation -> looser tolerance than f32.
    np.testing.assert_allclose(np.asarray(out), np.asarray(ref),
                               rtol=3e-2, atol=3e-2)
    assert out.shape == (B, HIDDEN_DIM)

    print("KERNEL_OK")
</pallas_src>

<mosaic_0001>
module attributes {stable_mosaic.version = 11 : i64} {
  func.func @_lstm_net_kernel(%arg0: memref<64x128xbf16, #tpu.memory_space<vmem>>, %arg1: memref<128x512xbf16, #tpu.memory_space<vmem>>, %arg2: memref<128x512xbf16, #tpu.memory_space<vmem>>, %arg3: memref<1x512xf32, #tpu.memory_space<vmem>>, %arg4: memref<128x512xbf16, #tpu.memory_space<vmem>>, %arg5: memref<128x512xbf16, #tpu.memory_space<vmem>>, %arg6: memref<1x512xf32, #tpu.memory_space<vmem>>, %arg7: memref<8x128xf32, #tpu.memory_space<vmem>>, %arg8: memref<64x512xf32, #tpu.memory_space<vmem>>, %arg9: memref<64x128xbf16, #tpu.memory_space<vmem>>) attributes {dimension_semantics = [], scalar_prefetch = 0 : i64, scratch_operands = 2 : i64, tpu.core_type = #tpu.core_type<tc>} {
    %c0 = arith.constant 0 : index
    %c0_0 = arith.constant 0 : index
    %0 = vector.load %arg0[%c0, %c0_0] : memref<64x128xbf16, #tpu.memory_space<vmem>>, vector<64x128xbf16>
    %c0_1 = arith.constant 0 : index
    %c0_2 = arith.constant 0 : index
    %1 = vector.load %arg1[%c0_1, %c0_2] : memref<128x512xbf16, #tpu.memory_space<vmem>>, vector<128x512xbf16>
    %cst = arith.constant dense<0.000000e+00> : vector<64x512xf32>
    %2 = tpu.matmul %0, %1, %cst {dimension_numbers = #tpu.dot_dimension_numbers<[1], [0], [0], [1], [0, 0, 1, 1], [], []>} : vector<64x128xbf16>, vector<128x512xbf16>, vector<64x512xf32> -> vector<64x512xf32>
    %c0_3 = arith.constant 0 : index
    %c0_4 = arith.constant 0 : index
    %3 = vector.load %arg3[%c0_3, %c0_4] : memref<1x512xf32, #tpu.memory_space<vmem>>, vector<1x512xf32>
    %4 = vector.broadcast %3 : vector<1x512xf32> to vector<64x512xf32>
    %5 = arith.addf %2, %4 : vector<64x512xf32>
    %c0_5 = arith.constant 0 : index
    %c0_6 = arith.constant 0 : index
    %6 = vector.load %arg8[%c0_5, %c0_6] : memref<64x512xf32, #tpu.memory_space<vmem>>, vector<64x512xf32>
    tpu.vector_store %arg8[%c0_5, %c0_6], %5 {strides = array<i32>} : memref<64x512xf32, #tpu.memory_space<vmem>>, vector<64x512xf32>,
    %cst_7 = arith.constant 0.000000e+00 : f32
    %7 = vector.broadcast %cst_7 : f32 to vector<8x128xf32>
    %cst_8 = arith.constant 0.000000e+00 : f32
    %8 = vector.broadcast %cst_8 : f32 to vector<8x128xf32>
    %c0_i32 = arith.constant 0 : i32
    %c8_i32 = arith.constant 8 : i32
    %9 = arith.muli %c0_i32, %c8_i32 : i32
    %10 = tpu.assume_multiple %9, 8 : i32
    %11 = arith.index_cast %10 : i32 to index
    %c0_9 = arith.constant 0 : index
    %12 = vector.load %arg8[%11, %c0_9] : memref<64x512xf32, #tpu.memory_space<vmem>>, vector<8x512xf32>
    %13 = arith.truncf %7 : vector<8x128xf32> to vector<8x128xbf16>
    %c0_10 = arith.constant 0 : index
    %c0_11 = arith.constant 0 : index
    %14 = vector.load %arg2[%c0_10, %c0_11] : memref<128x512xbf16, #tpu.memory_space<vmem>>, vector<128x512xbf16>
    %cst_12 = arith.constant dense<0.000000e+00> : vector<8x512xf32>
    %15 = tpu.matmul %13, %14, %cst_12 {dimension_numbers = #tpu.dot_dimension_numbers<[1], [0], [0], [1], [0, 0, 1, 1], [], []>} : vector<8x128xbf16>, vector<128x512xbf16>, vector<8x512xf32> -> vector<8x512xf32>
    %16 = arith.addf %12, %15 : vector<8x512xf32>
    %17 = vector.extract_strided_slice %16 {offsets = [0, 0], sizes = [8, 128], strides = [1, 1]} : vector<8x512xf32> to vector<8x128xf32>
    %18 = arith.negf %17 : vector<8x128xf32>
    %19 = math.exp %18 : vector<8x128xf32>
    %cst_13 = arith.constant 1.000000e+00 : f32
    %20 = vector.broadcast %cst_13 : f32 to vector<8x128xf32>
    %21 = arith.addf %20, %19 : vector<8x128xf32>
    %22 = arith.divf %20, %21 : vector<8x128xf32>
    %23 = vector.extract_strided_slice %16 {offsets = [0, 128], sizes = [8, 128], strides = [1, 1]} : vector<8x512xf32> to vector<8x128xf32>
    %24 = arith.negf %23 : vector<8x128xf32>
    %25 = math.exp %24 : vector<8x128xf32>
    %cst_14 = arith.constant 1.000000e+00 : f32
    %26 = vector.broadcast %cst_14 : f32 to vector<8x128xf32>
    %27 = arith.addf %26, %25 : vector<8x128xf32>
    %28 = arith.divf %26, %27 : vector<8x128xf32>
    %29 = vector.extract_strided_slice %16 {offsets = [0, 256], sizes = [8, 128], strides = [1, 1]} : vector<8x512xf32> to vector<8x128xf32>
    %30 = math.tanh %29 : vector<8x128xf32>
    %31 = vector.extract_strided_slice %16 {offsets = [0, 384], sizes = [8, 128], strides = [1, 1]} : vector<8x512xf32> to vector<8x128xf32>
    %32 = arith.negf %31 : vector<8x128xf32>
    %33 = math.exp %32 : vector<8x128xf32>
    %cst_15 = arith.constant 1.000000e+00 : f32
    %34 = vector.broadcast %cst_15 : f32 to vector<8x128xf32>
    %35 = arith.addf %34, %33 : vector<8x128xf32>
    %36 = arith.divf %34, %35 : vector<8x128xf32>
    %37 = arith.mulf %28, %8 : vector<8x128xf32>
    %38 = arith.mulf %22, %30 : vector<8x128xf32>
    %39 = arith.addf %37, %38 : vector<8x128xf32>
    %40 = math.tanh %39 : vector<8x128xf32>
    %41 = arith.mulf %36, %40 : vector<8x128xf32>
    %42 = arith.truncf %41 : vector<8x128xf32> to vector<8x128xbf16>
    %43 = arith.index_cast %10 : i32 to index
    %c0_16 = arith.constant 0 : index
    %44 = vector.load %arg9[%43, %c0_16] : memref<64x128xbf16, #tpu.memory_space<vmem>>, vector<8x128xbf16>
    tpu.vector_store %arg9[%43, %c0_16], %42 {strides = array<i32>} : memref<64x128xbf16, #tpu.memory_space<vmem>>, vector<8x128xbf16>,
    %c1_i32 = arith.constant 1 : i32
    %c8_i32_17 = arith.constant 8 : i32
    %45 = arith.muli %c1_i32, %c8_i32_17 : i32
    %46 = tpu.assume_multiple %45, 8 : i32
    %47 = arith.index_cast %46 : i32 to index
    %c0_18 = arith.constant 0 : index
    %48 = vector.load %arg8[%47, %c0_18] : memref<64x512xf32, #tpu.memory_space<vmem>>, vector<8x512xf32>
    %49 = arith.truncf %41 : vector<8x128xf32> to vector<8x128xbf16>
    %c0_19 = arith.constant 0 : index
    %c0_20 = arith.constant 0 : index
    %50 = vector.load %arg2[%c0_19, %c0_20] : memref<128x512xbf16, #tpu.memory_space<vmem>>, vector<128x512xbf16>
    %cst_21 = arith.constant dense<0.000000e+00> : vector<8x512xf32>
    %51 = tpu.matmul %49, %50, %cst_21 {dimension_numbers = #tpu.dot_dimension_numbers<[1], [0], [0], [1], [0, 0, 1, 1], [], []>} : vector<8x128xbf16>, vector<128x512xbf16>, vector<8x512xf32> -> vector<8x512xf32>
    %52 = arith.addf %48, %51 : vector<8x512xf32>
    %53 = vector.extract_strided_slice %52 {offsets = [0, 0], sizes = [8, 128], strides = [1, 1]} : vector<8x512xf32> to vector<8x128xf32>
    %54 = arith.negf %53 : vector<8x128xf32>
    %55 = math.exp %54 : vector<8x128xf32>
    %cst_22 = arith.constant 1.000000e+00 : f32
    %56 = vector.broadcast %cst_22 : f32 to vector<8x128xf32>
    %57 = arith.addf %56, %55 : vector<8x128xf32>
    %58 = arith.divf %56, %57 : vector<8x128xf32>
    %59 = vector.extract_strided_slice %52 {offsets = [0, 128], sizes = [8, 128], strides = [1, 1]} : vector<8x512xf32> to vector<8x128xf32>
    %60 = arith.negf %59 : vector<8x128xf32>
    %61 = math.exp %60 : vector<8x128xf32>
    %cst_23 = arith.constant 1.000000e+00 : f32
    %62 = vector.broadcast %cst_23 : f32 to vector<8x128xf32>
    %63 = arith.addf %62, %61 : vector<8x128xf32>
    %64 = arith.divf %62, %63 : vector<8x128xf32>
    %65 = vector.extract_strided_slice %52 {offsets = [0, 256], sizes = [8, 128], strides = [1, 1]} : vector<8x512xf32> to vector<8x128xf32>
    %66 = math.tanh %65 : vector<8x128xf32>
    %67 = vector.extract_strided_slice %52 {offsets = [0, 384], sizes = [8, 128], strides = [1, 1]} : vector<8x512xf32> to vector<8x128xf32>
    %68 = arith.negf %67 : vector<8x128xf32>
    %69 = math.exp %68 : vector<8x128xf32>
    %cst_24 = arith.constant 1.000000e+00 : f32
    %70 = vector.broadcast %cst_24 : f32 to vector<8x128xf32>
    %71 = arith.addf %70, %69 : vector<8x128xf32>
    %72 = arith.divf %70, %71 : vector<8x128xf32>
    %73 = arith.mulf %64, %39 : vector<8x128xf32>
    %74 = arith.mulf %58, %66 : vector<8x128xf32>
    %75 = arith.addf %73, %74 : vector<8x128xf32>
    %76 = math.tanh %75 : vector<8x128xf32>
    %77 = arith.mulf %72, %76 : vector<8x128xf32>
    %78 = arith.truncf %77 : vector<8x128xf32> to vector<8x128xbf16>
    %79 = arith.index_cast %46 : i32 to index
    %c0_25 = arith.constant 0 : index
    %80 = vector.load %arg9[%79, %c0_25] : memref<64x128xbf16, #tpu.memory_space<vmem>>, vector<8x128xbf16>
    tpu.vector_store %arg9[%79, %c0_25], %78 {strides = array<i32>} : memref<64x128xbf16, #tpu.memory_space<vmem>>, vector<8x128xbf16>,
    %c2_i32 = arith.constant 2 : i32
    %c8_i32_26 = arith.constant 8 : i32
    %81 = arith.muli %c2_i32, %c8_i32_26 : i32
    %82 = tpu.assume_multiple %81, 8 : i32
    %83 = arith.index_cast %82 : i32 to index
    %c0_27 = arith.constant 0 : index
    %84 = vector.load %arg8[%83, %c0_27] : memref<64x512xf32, #tpu.memory_space<vmem>>, vector<8x512xf32>
    %85 = arith.truncf %77 : vector<8x128xf32> to vector<8x128xbf16>
    %c0_28 = arith.constant 0 : index
    %c0_29 = arith.constant 0 : index
    %86 = vector.load %arg2[%c0_28, %c0_29] : memref<128x512xbf16, #tpu.memory_space<vmem>>, vector<128x512xbf16>
    %cst_30 = arith.constant dense<0.000000e+00> : vector<8x512xf32>
    %87 = tpu.matmul %85, %86, %cst_30 {dimension_numbers = #tpu.dot_dimension_numbers<[1], [0], [0], [1], [0, 0, 1, 1], [], []>} : vector<8x128xbf16>, vector<128x512xbf16>, vector<8x512xf32> -> vector<8x512xf32>
    %88 = arith.addf %84, %87 : vector<8x512xf32>
    %89 = vector.extract_strided_slice %88 {offsets = [0, 0], sizes = [8, 128], strides = [1, 1]} : vector<8x512xf32> to vector<8x128xf32>
    %90 = arith.negf %89 : vector<8x128xf32>
    %91 = math.exp %90 : vector<8x128xf32>
    %cst_31 = arith.constant 1.000000e+00 : f32
    %92 = vector.broadcast %cst_31 : f32 to vector<8x128xf32>
    %93 = arith.addf %92, %91 : vector<8x128xf32>
    %94 = arith.divf %92, %93 : vector<8x128xf32>
    %95 = vector.extract_strided_slice %88 {offsets = [0, 128], sizes = [8, 128], strides = [1, 1]} : vector<8x512xf32> to vector<8x128xf32>
    %96 = arith.negf %95 : vector<8x128xf32>
    %97 = math.exp %96 : vector<8x128xf32>
    %cst_32 = arith.constant 1.000000e+00 : f32
    %98 = vector.broadcast %cst_32 : f32 to vector<8x128xf32>
    %99 = arith.addf %98, %97 : vector<8x128xf32>
    %100 = arith.divf %98, %99 : vector<8x128xf32>
    %101 = vector.extract_strided_slice %88 {offsets = [0, 256], sizes = [8, 128], strides = [1, 1]} : vector<8x512xf32> to vector<8x128xf32>
    %102 = math.tanh %101 : vector<8x128xf32>
    %103 = vector.extract_strided_slice %88 {offsets = [0, 384], sizes = [8, 128], strides = [1, 1]} : vector<8x512xf32> to vector<8x128xf32>
    %104 = arith.negf %103 : vector<8x128xf32>
    %105 = math.exp %104 : vector<8x128xf32>
    %cst_33 = arith.constant 1.000000e+00 : f32
    %106 = vector.broadcast %cst_33 : f32 to vector<8x128xf32>
    %107 = arith.addf %106, %105 : vector<8x128xf32>
    %108 = arith.divf %106, %107 : vector<8x128xf32>
    %109 = arith.mulf %100, %75 : vector<8x128xf32>
    %110 = arith.mulf %94, %102 : vector<8x128xf32>
    %111 = arith.addf %109, %110 : vector<8x128xf32>
    %112 = math.tanh %111 : vector<8x128xf32>
    %113 = arith.mulf %108, %112 : vector<8x128xf32>
    %114 = arith.truncf %113 : vector<8x128xf32> to vector<8x128xbf16>
    %115 = arith.index_cast %82 : i32 to index
    %c0_34 = arith.constant 0 : index
    %116 = vector.load %arg9[%115, %c0_34] : memref<64x128xbf16, #tpu.memory_space<vmem>>, vector<8x128xbf16>
    tpu.vector_store %arg9[%115, %c0_34], %114 {strides = array<i32>} : memref<64x128xbf16, #tpu.memory_space<vmem>>, vector<8x128xbf16>,
    %c3_i32 = arith.constant 3 : i32
    %c8_i32_35 = arith.constant 8 : i32
    %117 = arith.muli %c3_i32, %c8_i32_35 : i32
    %118 = tpu.assume_multiple %117, 8 : i32
    %119 = arith.index_cast %118 : i32 to index
    %c0_36 = arith.constant 0 : index
    %120 = vector.load %arg8[%119, %c0_36] : memref<64x512xf32, #tpu.memory_space<vmem>>, vector<8x512xf32>
    %121 = arith.truncf %113 : vector<8x128xf32> to vector<8x128xbf16>
    %c0_37 = arith.constant 0 : index
    %c0_38 = arith.constant 0 : index
    %122 = vector.load %arg2[%c0_37, %c0_38] : memref<128x512xbf16, #tpu.memory_space<vmem>>, vector<128x512xbf16>
    %cst_39 = arith.constant dense<0.000000e+00> : vector<8x512xf32>
    %123 = tpu.matmul %121, %122, %cst_39 {dimension_numbers = #tpu.dot_dimension_numbers<[1], [0], [0], [1], [0, 0, 1, 1], [], []>} : vector<8x128xbf16>, vector<128x512xbf16>, vector<8x512xf32> -> vector<8x512xf32>
    %124 = arith.addf %120, %123 : vector<8x512xf32>
    %125 = vector.extract_strided_slice %124 {offsets = [0, 0], sizes = [8, 128], strides = [1, 1]} : vector<8x512xf32> to vector<8x128xf32>
    %126 = arith.negf %125 : vector<8x128xf32>
    %127 = math.exp %126 : vector<8x128xf32>
    %cst_40 = arith.constant 1.000000e+00 : f32
    %128 = vector.broadcast %cst_40 : f32 to vector<8x128xf32>
    %129 = arith.addf %128, %127 : vector<8x128xf32>
    %130 = arith.divf %128, %129 : vector<8x128xf32>
    %131 = vector.extract_strided_slice %124 {offsets = [0, 128], sizes = [8, 128], strides = [1, 1]} : vector<8x512xf32> to vector<8x128xf32>
    %132 = arith.negf %131 : vector<8x128xf32>
    %133 = math.exp %132 : vector<8x128xf32>
    %cst_41 = arith.constant 1.000000e+00 : f32
    %134 = vector.broadcast %cst_41 : f32 to vector<8x128xf32>
    %135 = arith.addf %134, %133 : vector<8x128xf32>
    %136 = arith.divf %134, %135 : vector<8x128xf32>
    %137 = vector.extract_strided_slice %124 {offsets = [0, 256], sizes = [8, 128], strides = [1, 1]} : vector<8x512xf32> to vector<8x128xf32>
    %138 = math.tanh %137 : vector<8x128xf32>
    %139 = vector.extract_strided_slice %124 {offsets = [0, 384], sizes = [8, 128], strides = [1, 1]} : vector<8x512xf32> to vector<8x128xf32>
    %140 = arith.negf %139 : vector<8x128xf32>
    %141 = math.exp %140 : vector<8x128xf32>
    %cst_42 = arith.constant 1.000000e+00 : f32
    %142 = vector.broadcast %cst_42 : f32 to vector<8x128xf32>
    %143 = arith.addf %142, %141 : vector<8x128xf32>
    %144 = arith.divf %142, %143 : vector<8x128xf32>
    %145 = arith.mulf %136, %111 : vector<8x128xf32>
    %146 = arith.mulf %130, %138 : vector<8x128xf32>
    %147 = arith.addf %145, %146 : vector<8x128xf32>
    %148 = math.tanh %147 : vector<8x128xf32>
    %149 = arith.mulf %144, %148 : vector<8x128xf32>
    %150 = arith.truncf %149 : vector<8x128xf32> to vector<8x128xbf16>
    %151 = arith.index_cast %118 : i32 to index
    %c0_43 = arith.constant 0 : index
    %152 = vector.load %arg9[%151, %c0_43] : memref<64x128xbf16, #tpu.memory_space<vmem>>, vector<8x128xbf16>
    tpu.vector_store %arg9[%151, %c0_43], %150 {strides = array<i32>} : memref<64x128xbf16, #tpu.memory_space<vmem>>, vector<8x128xbf16>,
    %c4_i32 = arith.constant 4 : i32
    %c8_i32_44 = arith.constant 8 : i32
    %153 = arith.muli %c4_i32, %c8_i32_44 : i32
    %154 = tpu.assume_multiple %153, 8 : i32
    %155 = arith.index_cast %154 : i32 to index
    %c0_45 = arith.constant 0 : index
    %156 = vector.load %arg8[%155, %c0_45] : memref<64x512xf32, #tpu.memory_space<vmem>>, vector<8x512xf32>
    %157 = arith.truncf %149 : vector<8x128xf32> to vector<8x128xbf16>
    %c0_46 = arith.constant 0 : index
    %c0_47 = arith.constant 0 : index
    %158 = vector.load %arg2[%c0_46, %c0_47] : memref<128x512xbf16, #tpu.memory_space<vmem>>, vector<128x512xbf16>
    %cst_48 = arith.constant dense<0.000000e+00> : vector<8x512xf32>
    %159 = tpu.matmul %157, %158, %cst_48 {dimension_numbers = #tpu.dot_dimension_numbers<[1], [0], [0], [1], [0, 0, 1, 1], [], []>} : vector<8x128xbf16>, vector<128x512xbf16>, vector<8x512xf32> -> vector<8x512xf32>
    %160 = arith.addf %156, %159 : vector<8x512xf32>
    %161 = vector.extract_strided_slice %160 {offsets = [0, 0], sizes = [8, 128], strides = [1, 1]} : vector<8x512xf32> to vector<8x128xf32>
    %162 = arith.negf %161 : vector<8x128xf32>
    %163 = math.exp %162 : vector<8x128xf32>
    %cst_49 = arith.constant 1.000000e+00 : f32
    %164 = vector.broadcast %cst_49 : f32 to vector<8x128xf32>
    %165 = arith.addf %164, %163 : vector<8x128xf32>
    %166 = arith.divf %164, %165 : vector<8x128xf32>
    %167 = vector.extract_strided_slice %160 {offsets = [0, 128], sizes = [8, 128], strides = [1, 1]} : vector<8x512xf32> to vector<8x128xf32>
    %168 = arith.negf %167 : vector<8x128xf32>
    %169 = math.exp %168 : vector<8x128xf32>
    %cst_50 = arith.constant 1.000000e+00 : f32
    %170 = vector.broadcast %cst_50 : f32 to vector<8x128xf32>
    %171 = arith.addf %170, %169 : vector<8x128xf32>
    %172 = arith.divf %170, %171 : vector<8x128xf32>
    %173 = vector.extract_strided_slice %160 {offsets = [0, 256], sizes = [8, 128], strides = [1, 1]} : vector<8x512xf32> to vector<8x128xf32>
    %174 = math.tanh %173 : vector<8x128xf32>
    %175 = vector.extract_strided_slice %160 {offsets = [0, 384], sizes = [8, 128], strides = [1, 1]} : vector<8x512xf32> to vector<8x128xf32>
    %176 = arith.negf %175 : vector<8x128xf32>
    %177 = math.exp %176 : vector<8x128xf32>
    %cst_51 = arith.constant 1.000000e+00 : f32
    %178 = vector.broadcast %cst_51 : f32 to vector<8x128xf32>
    %179 = arith.addf %178, %177 : vector<8x128xf32>
    %180 = arith.divf %178, %179 : vector<8x128xf32>
    %181 = arith.mulf %172, %147 : vector<8x128xf32>
    %182 = arith.mulf %166, %174 : vector<8x128xf32>
    %183 = arith.addf %181, %182 : vector<8x128xf32>
    %184 = math.tanh %183 : vector<8x128xf32>
    %185 = arith.mulf %180, %184 : vector<8x128xf32>
    %186 = arith.truncf %185 : vector<8x128xf32> to vector<8x128xbf16>
    %187 = arith.index_cast %154 : i32 to index
    %c0_52 = arith.constant 0 : index
    %188 = vector.load %arg9[%187, %c0_52] : memref<64x128xbf16, #tpu.memory_space<vmem>>, vector<8x128xbf16>
    tpu.vector_store %arg9[%187, %c0_52], %186 {strides = array<i32>} : memref<64x128xbf16, #tpu.memory_space<vmem>>, vector<8x128xbf16>,
    %c5_i32 = arith.constant 5 : i32
    %c8_i32_53 = arith.constant 8 : i32
    %189 = arith.muli %c5_i32, %c8_i32_53 : i32
    %190 = tpu.assume_multiple %189, 8 : i32
    %191 = arith.index_cast %190 : i32 to index
    %c0_54 = arith.constant 0 : index
    %192 = vector.load %arg8[%191, %c0_54] : memref<64x512xf32, #tpu.memory_space<vmem>>, vector<8x512xf32>
    %193 = arith.truncf %185 : vector<8x128xf32> to vector<8x128xbf16>
    %c0_55 = arith.constant 0 : index
    %c0_56 = arith.constant 0 : index
    %194 = vector.load %arg2[%c0_55, %c0_56] : memref<128x512xbf16, #tpu.memory_space<vmem>>, vector<128x512xbf16>
    %cst_57 = arith.constant dense<0.000000e+00> : vector<8x512xf32>
    %195 = tpu.matmul %193, %194, %cst_57 {dimension_numbers = #tpu.dot_dimension_numbers<[1], [0], [0], [1], [0, 0, 1, 1], [], []>} : vector<8x128xbf16>, vector<128x512xbf16>, vector<8x512xf32> -> vector<8x512xf32>
    %196 = arith.addf %192, %195 : vector<8x512xf32>
    %197 = vector.extract_strided_slice %196 {offsets = [0, 0], sizes = [8, 128], strides = [1, 1]} : vector<8x512xf32> to vector<8x128xf32>
    %198 = arith.negf %197 : vector<8x128xf32>
    %199 = math.exp %198 : vector<8x128xf32>
    %cst_58 = arith.constant 1.000000e+00 : f32
    %200 = vector.broadcast %cst_58 : f32 to vector<8x128xf32>
    %201 = arith.addf %200, %199 : vector<8x128xf32>
    %202 = arith.divf %200, %201 : vector<8x128xf32>
    %203 = vector.extract_strided_slice %196 {offsets = [0, 128], sizes = [8, 128], strides = [1, 1]} : vector<8x512xf32> to vector<8x128xf32>
    %204 = arith.negf %203 : vector<8x128xf32>
    %205 = math.exp %204 : vector<8x128xf32>
    %cst_59 = arith.constant 1.000000e+00 : f32
    %206 = vector.broadcast %cst_59 : f32 to vector<8x128xf32>
    %207 = arith.addf %206, %205 : vector<8x128xf32>
    %208 = arith.divf %206, %207 : vector<8x128xf32>
    %209 = vector.extract_strided_slice %196 {offsets = [0, 256], sizes = [8, 128], strides = [1, 1]} : vector<8x512xf32> to vector<8x128xf32>
    %210 = math.tanh %209 : vector<8x128xf32>
    %211 = vector.extract_strided_slice %196 {offsets = [0, 384], sizes = [8, 128], strides = [1, 1]} : vector<8x512xf32> to vector<8x128xf32>
    %212 = arith.negf %211 : vector<8x128xf32>
    %213 = math.exp %212 : vector<8x128xf32>
    %cst_60 = arith.constant 1.000000e+00 : f32
    %214 = vector.broadcast %cst_60 : f32 to vector<8x128xf32>
    %215 = arith.addf %214, %213 : vector<8x128xf32>
    %216 = arith.divf %214, %215 : vector<8x128xf32>
    %217 = arith.mulf %208, %183 : vector<8x128xf32>
    %218 = arith.mulf %202, %210 : vector<8x128xf32>
    %219 = arith.addf %217, %218 : vector<8x128xf32>
    %220 = math.tanh %219 : vector<8x128xf32>
    %221 = arith.mulf %216, %220 : vector<8x128xf32>
    %222 = arith.truncf %221 : vector<8x128xf32> to vector<8x128xbf16>
    %223 = arith.index_cast %190 : i32 to index
    %c0_61 = arith.constant 0 : index
    %224 = vector.load %arg9[%223, %c0_61] : memref<64x128xbf16, #tpu.memory_space<vmem>>, vector<8x128xbf16>
    tpu.vector_store %arg9[%223, %c0_61], %222 {strides = array<i32>} : memref<64x128xbf16, #tpu.memory_space<vmem>>, vector<8x128xbf16>,
    %c6_i32 = arith.constant 6 : i32
    %c8_i32_62 = arith.constant 8 : i32
    %225 = arith.muli %c6_i32, %c8_i32_62 : i32
    %226 = tpu.assume_multiple %225, 8 : i32
    %227 = arith.index_cast %226 : i32 to index
    %c0_63 = arith.constant 0 : index
    %228 = vector.load %arg8[%227, %c0_63] : memref<64x512xf32, #tpu.memory_space<vmem>>, vector<8x512xf32>
    %229 = arith.truncf %221 : vector<8x128xf32> to vector<8x128xbf16>
    %c0_64 = arith.constant 0 : index
    %c0_65 = arith.constant 0 : index
    %230 = vector.load %arg2[%c0_64, %c0_65] : memref<128x512xbf16, #tpu.memory_space<vmem>>, vector<128x512xbf16>
    %cst_66 = arith.constant dense<0.000000e+00> : vector<8x512xf32>
    %231 = tpu.matmul %229, %230, %cst_66 {dimension_numbers = #tpu.dot_dimension_numbers<[1], [0], [0], [1], [0, 0, 1, 1], [], []>} : vector<8x128xbf16>, vector<128x512xbf16>, vector<8x512xf32> -> vector<8x512xf32>
    %232 = arith.addf %228, %231 : vector<8x512xf32>
    %233 = vector.extract_strided_slice %232 {offsets = [0, 0], sizes = [8, 128], strides = [1, 1]} : vector<8x512xf32> to vector<8x128xf32>
    %234 = arith.negf %233 : vector<8x128xf32>
    %235 = math.exp %234 : vector<8x128xf32>
    %cst_67 = arith.constant 1.000000e+00 : f32
    %236 = vector.broadcast %cst_67 : f32 to vector<8x128xf32>
    %237 = arith.addf %236, %235 : vector<8x128xf32>
    %238 = arith.divf %236, %237 : vector<8x128xf32>
    %239 = vector.extract_strided_slice %232 {offsets = [0, 128], sizes = [8, 128], strides = [1, 1]} : vector<8x512xf32> to vector<8x128xf32>
    %240 = arith.negf %239 : vector<8x128xf32>
    %241 = math.exp %240 : vector<8x128xf32>
    %cst_68 = arith.constant 1.000000e+00 : f32
    %242 = vector.broadcast %cst_68 : f32 to vector<8x128xf32>
    %243 = arith.addf %242, %241 : vector<8x128xf32>
    %244 = arith.divf %242, %243 : vector<8x128xf32>
    %245 = vector.extract_strided_slice %232 {offsets = [0, 256], sizes = [8, 128], strides = [1, 1]} : vector<8x512xf32> to vector<8x128xf32>
    %246 = math.tanh %245 : vector<8x128xf32>
    %247 = vector.extract_strided_slice %232 {offsets = [0, 384], sizes = [8, 128], strides = [1, 1]} : vector<8x512xf32> to vector<8x128xf32>
    %248 = arith.negf %247 : vector<8x128xf32>
    %249 = math.exp %248 : vector<8x128xf32>
    %cst_69 = arith.constant 1.000000e+00 : f32
    %250 = vector.broadcast %cst_69 : f32 to vector<8x128xf32>
    %251 = arith.addf %250, %249 : vector<8x128xf32>
    %252 = arith.divf %250, %251 : vector<8x128xf32>
    %253 = arith.mulf %244, %219 : vector<8x128xf32>
    %254 = arith.mulf %238, %246 : vector<8x128xf32>
    %255 = arith.addf %253, %254 : vector<8x128xf32>
    %256 = math.tanh %255 : vector<8x128xf32>
    %257 = arith.mulf %252, %256 : vector<8x128xf32>
    %258 = arith.truncf %257 : vector<8x128xf32> to vector<8x128xbf16>
    %259 = arith.index_cast %226 : i32 to index
    %c0_70 = arith.constant 0 : index
    %260 = vector.load %arg9[%259, %c0_70] : memref<64x128xbf16, #tpu.memory_space<vmem>>, vector<8x128xbf16>
    tpu.vector_store %arg9[%259, %c0_70], %258 {strides = array<i32>} : memref<64x128xbf16, #tpu.memory_space<vmem>>, vector<8x128xbf16>,
    %c7_i32 = arith.constant 7 : i32
    %c8_i32_71 = arith.constant 8 : i32
    %261 = arith.muli %c7_i32, %c8_i32_71 : i32
    %262 = tpu.assume_multiple %261, 8 : i32
    %263 = arith.index_cast %262 : i32 to index
    %c0_72 = arith.constant 0 : index
    %264 = vector.load %arg8[%263, %c0_72] : memref<64x512xf32, #tpu.memory_space<vmem>>, vector<8x512xf32>
    %265 = arith.truncf %257 : vector<8x128xf32> to vector<8x128xbf16>
    %c0_73 = arith.constant 0 : index
    %c0_74 = arith.constant 0 : index
    %266 = vector.load %arg2[%c0_73, %c0_74] : memref<128x512xbf16, #tpu.memory_space<vmem>>, vector<128x512xbf16>
    %cst_75 = arith.constant dense<0.000000e+00> : vector<8x512xf32>
    %267 = tpu.matmul %265, %266, %cst_75 {dimension_numbers = #tpu.dot_dimension_numbers<[1], [0], [0], [1], [0, 0, 1, 1], [], []>} : vector<8x128xbf16>, vector<128x512xbf16>, vector<8x512xf32> -> vector<8x512xf32>
    %268 = arith.addf %264, %267 : vector<8x512xf32>
    %269 = vector.extract_strided_slice %268 {offsets = [0, 0], sizes = [8, 128], strides = [1, 1]} : vector<8x512xf32> to vector<8x128xf32>
    %270 = arith.negf %269 : vector<8x128xf32>
    %271 = math.exp %270 : vector<8x128xf32>
    %cst_76 = arith.constant 1.000000e+00 : f32
    %272 = vector.broadcast %cst_76 : f32 to vector<8x128xf32>
    %273 = arith.addf %272, %271 : vector<8x128xf32>
    %274 = arith.divf %272, %273 : vector<8x128xf32>
    %275 = vector.extract_strided_slice %268 {offsets = [0, 128], sizes = [8, 128], strides = [1, 1]} : vector<8x512xf32> to vector<8x128xf32>
    %276 = arith.negf %275 : vector<8x128xf32>
    %277 = math.exp %276 : vector<8x128xf32>
    %cst_77 = arith.constant 1.000000e+00 : f32
    %278 = vector.broadcast %cst_77 : f32 to vector<8x128xf32>
    %279 = arith.addf %278, %277 : vector<8x128xf32>
    %280 = arith.divf %278, %279 : vector<8x128xf32>
    %281 = vector.extract_strided_slice %268 {offsets = [0, 256], sizes = [8, 128], strides = [1, 1]} : vector<8x512xf32> to vector<8x128xf32>
    %282 = math.tanh %281 : vector<8x128xf32>
    %283 = vector.extract_strided_slice %268 {offsets = [0, 384], sizes = [8, 128], strides = [1, 1]} : vector<8x512xf32> to vector<8x128xf32>
    %284 = arith.negf %283 : vector<8x128xf32>
    %285 = math.exp %284 : vector<8x128xf32>
    %cst_78 = arith.constant 1.000000e+00 : f32
    %286 = vector.broadcast %cst_78 : f32 to vector<8x128xf32>
    %287 = arith.addf %286, %285 : vector<8x128xf32>
    %288 = arith.divf %286, %287 : vector<8x128xf32>
    %289 = arith.mulf %280, %255 : vector<8x128xf32>
    %290 = arith.mulf %274, %282 : vector<8x128xf32>
    %291 = arith.addf %289, %290 : vector<8x128xf32>
    %292 = math.tanh %291 : vector<8x128xf32>
    %293 = arith.mulf %288, %292 : vector<8x128xf32>
    %294 = arith.truncf %293 : vector<8x128xf32> to vector<8x128xbf16>
    %295 = arith.index_cast %262 : i32 to index
    %c0_79 = arith.constant 0 : index
    %296 = vector.load %arg9[%295, %c0_79] : memref<64x128xbf16, #tpu.memory_space<vmem>>, vector<8x128xbf16>
    tpu.vector_store %arg9[%295, %c0_79], %294 {strides = array<i32>} : memref<64x128xbf16, #tpu.memory_space<vmem>>, vector<8x128xbf16>,
    %c8_i32_80 = arith.constant 8 : i32
    %c0_81 = arith.constant 0 : index
    %c0_82 = arith.constant 0 : index
    %297 = vector.load %arg9[%c0_81, %c0_82] : memref<64x128xbf16, #tpu.memory_space<vmem>>, vector<64x128xbf16>
    %c0_83 = arith.constant 0 : index
    %c0_84 = arith.constant 0 : index
    %298 = vector.load %arg4[%c0_83, %c0_84] : memref<128x512xbf16, #tpu.memory_space<vmem>>, vector<128x512xbf16>
    %cst_85 = arith.constant dense<0.000000e+00> : vector<64x512xf32>
    %299 = tpu.matmul %297, %298, %cst_85 {dimension_numbers = #tpu.dot_dimension_numbers<[1], [0], [0], [1], [0, 0, 1, 1], [], []>} : vector<64x128xbf16>, vector<128x512xbf16>, vector<64x512xf32> -> vector<64x512xf32>
    %c0_86 = arith.constant 0 : index
    %c0_87 = arith.constant 0 : index
    %300 = vector.load %arg6[%c0_86, %c0_87] : memref<1x512xf32, #tpu.memory_space<vmem>>, vector<1x512xf32>
    %301 = vector.broadcast %300 : vector<1x512xf32> to vector<64x512xf32>
    %302 = arith.addf %299, %301 : vector<64x512xf32>
    %c0_88 = arith.constant 0 : index
    %c0_89 = arith.constant 0 : index
    %303 = vector.load %arg8[%c0_88, %c0_89] : memref<64x512xf32, #tpu.memory_space<vmem>>, vector<64x512xf32>
    tpu.vector_store %arg8[%c0_88, %c0_89], %302 {strides = array<i32>} : memref<64x512xf32, #tpu.memory_space<vmem>>, vector<64x512xf32>,
    %cst_90 = arith.constant 0.000000e+00 : f32
    %304 = vector.broadcast %cst_90 : f32 to vector<8x128xf32>
    %cst_91 = arith.constant 0.000000e+00 : f32
    %305 = vector.broadcast %cst_91 : f32 to vector<8x128xf32>
    %c0_i32_92 = arith.constant 0 : i32
    %c8_i32_93 = arith.constant 8 : i32
    %306 = arith.muli %c0_i32_92, %c8_i32_93 : i32
    %307 = tpu.assume_multiple %306, 8 : i32
    %308 = arith.index_cast %307 : i32 to index
    %c0_94 = arith.constant 0 : index
    %309 = vector.load %arg8[%308, %c0_94] : memref<64x512xf32, #tpu.memory_space<vmem>>, vector<8x512xf32>
    %310 = arith.truncf %304 : vector<8x128xf32> to vector<8x128xbf16>
    %c0_95 = arith.constant 0 : index
    %c0_96 = arith.constant 0 : index
    %311 = vector.load %arg5[%c0_95, %c0_96] : memref<128x512xbf16, #tpu.memory_space<vmem>>, vector<128x512xbf16>
    %cst_97 = arith.constant dense<0.000000e+00> : vector<8x512xf32>
    %312 = tpu.matmul %310, %311, %cst_97 {dimension_numbers = #tpu.dot_dimension_numbers<[1], [0], [0], [1], [0, 0, 1, 1], [], []>} : vector<8x128xbf16>, vector<128x512xbf16>, vector<8x512xf32> -> vector<8x512xf32>
    %313 = arith.addf %309, %312 : vector<8x512xf32>
    %314 = vector.extract_strided_slice %313 {offsets = [0, 0], sizes = [8, 128], strides = [1, 1]} : vector<8x512xf32> to vector<8x128xf32>
    %315 = arith.negf %314 : vector<8x128xf32>
    %316 = math.exp %315 : vector<8x128xf32>
    %cst_98 = arith.constant 1.000000e+00 : f32
    %317 = vector.broadcast %cst_98 : f32 to vector<8x128xf32>
    %318 = arith.addf %317, %316 : vector<8x128xf32>
    %319 = arith.divf %317, %318 : vector<8x128xf32>
    %320 = vector.extract_strided_slice %313 {offsets = [0, 128], sizes = [8, 128], strides = [1, 1]} : vector<8x512xf32> to vector<8x128xf32>
    %321 = arith.negf %320 : vector<8x128xf32>
    %322 = math.exp %321 : vector<8x128xf32>
    %cst_99 = arith.constant 1.000000e+00 : f32
    %323 = vector.broadcast %cst_99 : f32 to vector<8x128xf32>
    %324 = arith.addf %323, %322 : vector<8x128xf32>
    %325 = arith.divf %323, %324 : vector<8x128xf32>
    %326 = vector.extract_strided_slice %313 {offsets = [0, 256], sizes = [8, 128], strides = [1, 1]} : vector<8x512xf32> to vector<8x128xf32>
    %327 = math.tanh %326 : vector<8x128xf32>
    %328 = vector.extract_strided_slice %313 {offsets = [0, 384], sizes = [8, 128], strides = [1, 1]} : vector<8x512xf32> to vector<8x128xf32>
    %329 = arith.negf %328 : vector<8x128xf32>
    %330 = math.exp %329 : vector<8x128xf32>
    %cst_100 = arith.constant 1.000000e+00 : f32
    %331 = vector.broadcast %cst_100 : f32 to vector<8x128xf32>
    %332 = arith.addf %331, %330 : vector<8x128xf32>
    %333 = arith.divf %331, %332 : vector<8x128xf32>
    %334 = arith.mulf %325, %305 : vector<8x128xf32>
    %335 = arith.mulf %319, %327 : vector<8x128xf32>
    %336 = arith.addf %334, %335 : vector<8x128xf32>
    %337 = math.tanh %336 : vector<8x128xf32>
    %338 = arith.mulf %333, %337 : vector<8x128xf32>
    %c1_i32_101 = arith.constant 1 : i32
    %c8_i32_102 = arith.constant 8 : i32
    %339 = arith.muli %c1_i32_101, %c8_i32_102 : i32
    %340 = tpu.assume_multiple %339, 8 : i32
    %341 = arith.index_cast %340 : i32 to index
    %c0_103 = arith.constant 0 : index
    %342 = vector.load %arg8[%341, %c0_103] : memref<64x512xf32, #tpu.memory_space<vmem>>, vector<8x512xf32>
    %343 = arith.truncf %338 : vector<8x128xf32> to vector<8x128xbf16>
    %c0_104 = arith.constant 0 : index
    %c0_105 = arith.constant 0 : index
    %344 = vector.load %arg5[%c0_104, %c0_105] : memref<128x512xbf16, #tpu.memory_space<vmem>>, vector<128x512xbf16>
    %cst_106 = arith.constant dense<0.000000e+00> : vector<8x512xf32>
    %345 = tpu.matmul %343, %344, %cst_106 {dimension_numbers = #tpu.dot_dimension_numbers<[1], [0], [0], [1], [0, 0, 1, 1], [], []>} : vector<8x128xbf16>, vector<128x512xbf16>, vector<8x512xf32> -> vector<8x512xf32>
    %346 = arith.addf %342, %345 : vector<8x512xf32>
    %347 = vector.extract_strided_slice %346 {offsets = [0, 0], sizes = [8, 128], strides = [1, 1]} : vector<8x512xf32> to vector<8x128xf32>
    %348 = arith.negf %347 : vector<8x128xf32>
    %349 = math.exp %348 : vector<8x128xf32>
    %cst_107 = arith.constant 1.000000e+00 : f32
    %350 = vector.broadcast %cst_107 : f32 to vector<8x128xf32>
    %351 = arith.addf %350, %349 : vector<8x128xf32>
    %352 = arith.divf %350, %351 : vector<8x128xf32>
    %353 = vector.extract_strided_slice %346 {offsets = [0, 128], sizes = [8, 128], strides = [1, 1]} : vector<8x512xf32> to vector<8x128xf32>
    %354 = arith.negf %353 : vector<8x128xf32>
    %355 = math.exp %354 : vector<8x128xf32>
    %cst_108 = arith.constant 1.000000e+00 : f32
    %356 = vector.broadcast %cst_108 : f32 to vector<8x128xf32>
    %357 = arith.addf %356, %355 : vector<8x128xf32>
    %358 = arith.divf %356, %357 : vector<8x128xf32>
    %359 = vector.extract_strided_slice %346 {offsets = [0, 256], sizes = [8, 128], strides = [1, 1]} : vector<8x512xf32> to vector<8x128xf32>
    %360 = math.tanh %359 : vector<8x128xf32>
    %361 = vector.extract_strided_slice %346 {offsets = [0, 384], sizes = [8, 128], strides = [1, 1]} : vector<8x512xf32> to vector<8x128xf32>
    %362 = arith.negf %361 : vector<8x128xf32>
    %363 = math.exp %362 : vector<8x128xf32>
    %cst_109 = arith.constant 1.000000e+00 : f32
    %364 = vector.broadcast %cst_109 : f32 to vector<8x128xf32>
    %365 = arith.addf %364, %363 : vector<8x128xf32>
    %366 = arith.divf %364, %365 : vector<8x128xf32>
    %367 = arith.mulf %358, %336 : vector<8x128xf32>
    %368 = arith.mulf %352, %360 : vector<8x128xf32>
    %369 = arith.addf %367, %368 : vector<8x128xf32>
    %370 = math.tanh %369 : vector<8x128xf32>
    %371 = arith.mulf %366, %370 : vector<8x128xf32>
    %c2_i32_110 = arith.constant 2 : i32
    %c8_i32_111 = arith.constant 8 : i32
    %372 = arith.muli %c2_i32_110, %c8_i32_111 : i32
    %373 = tpu.assume_multiple %372, 8 : i32
    %374 = arith.index_cast %373 : i32 to index
    %c0_112 = arith.constant 0 : index
    %375 = vector.load %arg8[%374, %c0_112] : memref<64x512xf32, #tpu.memory_space<vmem>>, vector<8x512xf32>
    %376 = arith.truncf %371 : vector<8x128xf32> to vector<8x128xbf16>
    %c0_113 = arith.constant 0 : index
    %c0_114 = arith.constant 0 : index
    %377 = vector.load %arg5[%c0_113, %c0_114] : memref<128x512xbf16, #tpu.memory_space<vmem>>, vector<128x512xbf16>
    %cst_115 = arith.constant dense<0.000000e+00> : vector<8x512xf32>
    %378 = tpu.matmul %376, %377, %cst_115 {dimension_numbers = #tpu.dot_dimension_numbers<[1], [0], [0], [1], [0, 0, 1, 1], [], []>} : vector<8x128xbf16>, vector<128x512xbf16>, vector<8x512xf32> -> vector<8x512xf32>
    %379 = arith.addf %375, %378 : vector<8x512xf32>
    %380 = vector.extract_strided_slice %379 {offsets = [0, 0], sizes = [8, 128], strides = [1, 1]} : vector<8x512xf32> to vector<8x128xf32>
    %381 = arith.negf %380 : vector<8x128xf32>
    %382 = math.exp %381 : vector<8x128xf32>
    %cst_116 = arith.constant 1.000000e+00 : f32
    %383 = vector.broadcast %cst_116 : f32 to vector<8x128xf32>
    %384 = arith.addf %383, %382 : vector<8x128xf32>
    %385 = arith.divf %383, %384 : vector<8x128xf32>
    %386 = vector.extract_strided_slice %379 {offsets = [0, 128], sizes = [8, 128], strides = [1, 1]} : vector<8x512xf32> to vector<8x128xf32>
    %387 = arith.negf %386 : vector<8x128xf32>
    %388 = math.exp %387 : vector<8x128xf32>
    %cst_117 = arith.constant 1.000000e+00 : f32
    %389 = vector.broadcast %cst_117 : f32 to vector<8x128xf32>
    %390 = arith.addf %389, %388 : vector<8x128xf32>
    %391 = arith.divf %389, %390 : vector<8x128xf32>
    %392 = vector.extract_strided_slice %379 {offsets = [0, 256], sizes = [8, 128], strides = [1, 1]} : vector<8x512xf32> to vector<8x128xf32>
    %393 = math.tanh %392 : vector<8x128xf32>
    %394 = vector.extract_strided_slice %379 {offsets = [0, 384], sizes = [8, 128], strides = [1, 1]} : vector<8x512xf32> to vector<8x128xf32>
    %395 = arith.negf %394 : vector<8x128xf32>
    %396 = math.exp %395 : vector<8x128xf32>
    %cst_118 = arith.constant 1.000000e+00 : f32
    %397 = vector.broadcast %cst_118 : f32 to vector<8x128xf32>
    %398 = arith.addf %397, %396 : vector<8x128xf32>
    %399 = arith.divf %397, %398 : vector<8x128xf32>
    %400 = arith.mulf %391, %369 : vector<8x128xf32>
    %401 = arith.mulf %385, %393 : vector<8x128xf32>
    %402 = arith.addf %400, %401 : vector<8x128xf32>
    %403 = math.tanh %402 : vector<8x128xf32>
    %404 = arith.mulf %399, %403 : vector<8x128xf32>
    %c3_i32_119 = arith.constant 3 : i32
    %c8_i32_120 = arith.constant 8 : i32
    %405 = arith.muli %c3_i32_119, %c8_i32_120 : i32
    %406 = tpu.assume_multiple %405, 8 : i32
    %407 = arith.index_cast %406 : i32 to index
    %c0_121 = arith.constant 0 : index
    %408 = vector.load %arg8[%407, %c0_121] : memref<64x512xf32, #tpu.memory_space<vmem>>, vector<8x512xf32>
    %409 = arith.truncf %404 : vector<8x128xf32> to vector<8x128xbf16>
    %c0_122 = arith.constant 0 : index
    %c0_123 = arith.constant 0 : index
    %410 = vector.load %arg5[%c0_122, %c0_123] : memref<128x512xbf16, #tpu.memory_space<vmem>>, vector<128x512xbf16>
    %cst_124 = arith.constant dense<0.000000e+00> : vector<8x512xf32>
    %411 = tpu.matmul %409, %410, %cst_124 {dimension_numbers = #tpu.dot_dimension_numbers<[1], [0], [0], [1], [0, 0, 1, 1], [], []>} : vector<8x128xbf16>, vector<128x512xbf16>, vector<8x512xf32> -> vector<8x512xf32>
    %412 = arith.addf %408, %411 : vector<8x512xf32>
    %413 = vector.extract_strided_slice %412 {offsets = [0, 0], sizes = [8, 128], strides = [1, 1]} : vector<8x512xf32> to vector<8x128xf32>
    %414 = arith.negf %413 : vector<8x128xf32>
    %415 = math.exp %414 : vector<8x128xf32>
    %cst_125 = arith.constant 1.000000e+00 : f32
    %416 = vector.broadcast %cst_125 : f32 to vector<8x128xf32>
    %417 = arith.addf %416, %415 : vector<8x128xf32>
    %418 = arith.divf %416, %417 : vector<8x128xf32>
    %419 = vector.extract_strided_slice %412 {offsets = [0, 128], sizes = [8, 128], strides = [1, 1]} : vector<8x512xf32> to vector<8x128xf32>
    %420 = arith.negf %419 : vector<8x128xf32>
    %421 = math.exp %420 : vector<8x128xf32>
    %cst_126 = arith.constant 1.000000e+00 : f32
    %422 = vector.broadcast %cst_126 : f32 to vector<8x128xf32>
    %423 = arith.addf %422, %421 : vector<8x128xf32>
    %424 = arith.divf %422, %423 : vector<8x128xf32>
    %425 = vector.extract_strided_slice %412 {offsets = [0, 256], sizes = [8, 128], strides = [1, 1]} : vector<8x512xf32> to vector<8x128xf32>
    %426 = math.tanh %425 : vector<8x128xf32>
    %427 = vector.extract_strided_slice %412 {offsets = [0, 384], sizes = [8, 128], strides = [1, 1]} : vector<8x512xf32> to vector<8x128xf32>
    %428 = arith.negf %427 : vector<8x128xf32>
    %429 = math.exp %428 : vector<8x128xf32>
    %cst_127 = arith.constant 1.000000e+00 : f32
    %430 = vector.broadcast %cst_127 : f32 to vector<8x128xf32>
    %431 = arith.addf %430, %429 : vector<8x128xf32>
    %432 = arith.divf %430, %431 : vector<8x128xf32>
    %433 = arith.mulf %424, %402 : vector<8x128xf32>
    %434 = arith.mulf %418, %426 : vector<8x128xf32>
    %435 = arith.addf %433, %434 : vector<8x128xf32>
    %436 = math.tanh %435 : vector<8x128xf32>
    %437 = arith.mulf %432, %436 : vector<8x128xf32>
    %c4_i32_128 = arith.constant 4 : i32
    %c8_i32_129 = arith.constant 8 : i32
    %438 = arith.muli %c4_i32_128, %c8_i32_129 : i32
    %439 = tpu.assume_multiple %438, 8 : i32
    %440 = arith.index_cast %439 : i32 to index
    %c0_130 = arith.constant 0 : index
    %441 = vector.load %arg8[%440, %c0_130] : memref<64x512xf32, #tpu.memory_space<vmem>>, vector<8x512xf32>
    %442 = arith.truncf %437 : vector<8x128xf32> to vector<8x128xbf16>
    %c0_131 = arith.constant 0 : index
    %c0_132 = arith.constant 0 : index
    %443 = vector.load %arg5[%c0_131, %c0_132] : memref<128x512xbf16, #tpu.memory_space<vmem>>, vector<128x512xbf16>
    %cst_133 = arith.constant dense<0.000000e+00> : vector<8x512xf32>
    %444 = tpu.matmul %442, %443, %cst_133 {dimension_numbers = #tpu.dot_dimension_numbers<[1], [0], [0], [1], [0, 0, 1, 1], [], []>} : vector<8x128xbf16>, vector<128x512xbf16>, vector<8x512xf32> -> vector<8x512xf32>
    %445 = arith.addf %441, %444 : vector<8x512xf32>
    %446 = vector.extract_strided_slice %445 {offsets = [0, 0], sizes = [8, 128], strides = [1, 1]} : vector<8x512xf32> to vector<8x128xf32>
    %447 = arith.negf %446 : vector<8x128xf32>
    %448 = math.exp %447 : vector<8x128xf32>
    %cst_134 = arith.constant 1.000000e+00 : f32
    %449 = vector.broadcast %cst_134 : f32 to vector<8x128xf32>
    %450 = arith.addf %449, %448 : vector<8x128xf32>
    %451 = arith.divf %449, %450 : vector<8x128xf32>
    %452 = vector.extract_strided_slice %445 {offsets = [0, 128], sizes = [8, 128], strides = [1, 1]} : vector<8x512xf32> to vector<8x128xf32>
    %453 = arith.negf %452 : vector<8x128xf32>
    %454 = math.exp %453 : vector<8x128xf32>
    %cst_135 = arith.constant 1.000000e+00 : f32
    %455 = vector.broadcast %cst_135 : f32 to vector<8x128xf32>
    %456 = arith.addf %455, %454 : vector<8x128xf32>
    %457 = arith.divf %455, %456 : vector<8x128xf32>
    %458 = vector.extract_strided_slice %445 {offsets = [0, 256], sizes = [8, 128], strides = [1, 1]} : vector<8x512xf32> to vector<8x128xf32>
    %459 = math.tanh %458 : vector<8x128xf32>
    %460 = vector.extract_strided_slice %445 {offsets = [0, 384], sizes = [8, 128], strides = [1, 1]} : vector<8x512xf32> to vector<8x128xf32>
    %461 = arith.negf %460 : vector<8x128xf32>
    %462 = math.exp %461 : vector<8x128xf32>
    %cst_136 = arith.constant 1.000000e+00 : f32
    %463 = vector.broadcast %cst_136 : f32 to vector<8x128xf32>
    %464 = arith.addf %463, %462 : vector<8x128xf32>
    %465 = arith.divf %463, %464 : vector<8x128xf32>
    %466 = arith.mulf %457, %435 : vector<8x128xf32>
    %467 = arith.mulf %451, %459 : vector<8x128xf32>
    %468 = arith.addf %466, %467 : vector<8x128xf32>
    %469 = math.tanh %468 : vector<8x128xf32>
    %470 = arith.mulf %465, %469 : vector<8x128xf32>
    %c5_i32_137 = arith.constant 5 : i32
    %c8_i32_138 = arith.constant 8 : i32
    %471 = arith.muli %c5_i32_137, %c8_i32_138 : i32
    %472 = tpu.assume_multiple %471, 8 : i32
    %473 = arith.index_cast %472 : i32 to index
    %c0_139 = arith.constant 0 : index
    %474 = vector.load %arg8[%473, %c0_139] : memref<64x512xf32, #tpu.memory_space<vmem>>, vector<8x512xf32>
    %475 = arith.truncf %470 : vector<8x128xf32> to vector<8x128xbf16>
    %c0_140 = arith.constant 0 : index
    %c0_141 = arith.constant 0 : index
    %476 = vector.load %arg5[%c0_140, %c0_141] : memref<128x512xbf16, #tpu.memory_space<vmem>>, vector<128x512xbf16>
    %cst_142 = arith.constant dense<0.000000e+00> : vector<8x512xf32>
    %477 = tpu.matmul %475, %476, %cst_142 {dimension_numbers = #tpu.dot_dimension_numbers<[1], [0], [0], [1], [0, 0, 1, 1], [], []>} : vector<8x128xbf16>, vector<128x512xbf16>, vector<8x512xf32> -> vector<8x512xf32>
    %478 = arith.addf %474, %477 : vector<8x512xf32>
    %479 = vector.extract_strided_slice %478 {offsets = [0, 0], sizes = [8, 128], strides = [1, 1]} : vector<8x512xf32> to vector<8x128xf32>
    %480 = arith.negf %479 : vector<8x128xf32>
    %481 = math.exp %480 : vector<8x128xf32>
    %cst_143 = arith.constant 1.000000e+00 : f32
    %482 = vector.broadcast %cst_143 : f32 to vector<8x128xf32>
    %483 = arith.addf %482, %481 : vector<8x128xf32>
    %484 = arith.divf %482, %483 : vector<8x128xf32>
    %485 = vector.extract_strided_slice %478 {offsets = [0, 128], sizes = [8, 128], strides = [1, 1]} : vector<8x512xf32> to vector<8x128xf32>
    %486 = arith.negf %485 : vector<8x128xf32>
    %487 = math.exp %486 : vector<8x128xf32>
    %cst_144 = arith.constant 1.000000e+00 : f32
    %488 = vector.broadcast %cst_144 : f32 to vector<8x128xf32>
    %489 = arith.addf %488, %487 : vector<8x128xf32>
    %490 = arith.divf %488, %489 : vector<8x128xf32>
    %491 = vector.extract_strided_slice %478 {offsets = [0, 256], sizes = [8, 128], strides = [1, 1]} : vector<8x512xf32> to vector<8x128xf32>
    %492 = math.tanh %491 : vector<8x128xf32>
    %493 = vector.extract_strided_slice %478 {offsets = [0, 384], sizes = [8, 128], strides = [1, 1]} : vector<8x512xf32> to vector<8x128xf32>
    %494 = arith.negf %493 : vector<8x128xf32>
    %495 = math.exp %494 : vector<8x128xf32>
    %cst_145 = arith.constant 1.000000e+00 : f32
    %496 = vector.broadcast %cst_145 : f32 to vector<8x128xf32>
    %497 = arith.addf %496, %495 : vector<8x128xf32>
    %498 = arith.divf %496, %497 : vector<8x128xf32>
    %499 = arith.mulf %490, %468 : vector<8x128xf32>
    %500 = arith.mulf %484, %492 : vector<8x128xf32>
    %501 = arith.addf %499, %500 : vector<8x128xf32>
    %502 = math.tanh %501 : vector<8x128xf32>
    %503 = arith.mulf %498, %502 : vector<8x128xf32>
    %c6_i32_146 = arith.constant 6 : i32
    %c8_i32_147 = arith.constant 8 : i32
    %504 = arith.muli %c6_i32_146, %c8_i32_147 : i32
    %505 = tpu.assume_multiple %504, 8 : i32
    %506 = arith.index_cast %505 : i32 to index
    %c0_148 = arith.constant 0 : index
    %507 = vector.load %arg8[%506, %c0_148] : memref<64x512xf32, #tpu.memory_space<vmem>>, vector<8x512xf32>
    %508 = arith.truncf %503 : vector<8x128xf32> to vector<8x128xbf16>
    %c0_149 = arith.constant 0 : index
    %c0_150 = arith.constant 0 : index
    %509 = vector.load %arg5[%c0_149, %c0_150] : memref<128x512xbf16, #tpu.memory_space<vmem>>, vector<128x512xbf16>
    %cst_151 = arith.constant dense<0.000000e+00> : vector<8x512xf32>
    %510 = tpu.matmul %508, %509, %cst_151 {dimension_numbers = #tpu.dot_dimension_numbers<[1], [0], [0], [1], [0, 0, 1, 1], [], []>} : vector<8x128xbf16>, vector<128x512xbf16>, vector<8x512xf32> -> vector<8x512xf32>
    %511 = arith.addf %507, %510 : vector<8x512xf32>
    %512 = vector.extract_strided_slice %511 {offsets = [0, 0], sizes = [8, 128], strides = [1, 1]} : vector<8x512xf32> to vector<8x128xf32>
    %513 = arith.negf %512 : vector<8x128xf32>
    %514 = math.exp %513 : vector<8x128xf32>
    %cst_152 = arith.constant 1.000000e+00 : f32
    %515 = vector.broadcast %cst_152 : f32 to vector<8x128xf32>
    %516 = arith.addf %515, %514 : vector<8x128xf32>
    %517 = arith.divf %515, %516 : vector<8x128xf32>
    %518 = vector.extract_strided_slice %511 {offsets = [0, 128], sizes = [8, 128], strides = [1, 1]} : vector<8x512xf32> to vector<8x128xf32>
    %519 = arith.negf %518 : vector<8x128xf32>
    %520 = math.exp %519 : vector<8x128xf32>
    %cst_153 = arith.constant 1.000000e+00 : f32
    %521 = vector.broadcast %cst_153 : f32 to vector<8x128xf32>
    %522 = arith.addf %521, %520 : vector<8x128xf32>
    %523 = arith.divf %521, %522 : vector<8x128xf32>
    %524 = vector.extract_strided_slice %511 {offsets = [0, 256], sizes = [8, 128], strides = [1, 1]} : vector<8x512xf32> to vector<8x128xf32>
    %525 = math.tanh %524 : vector<8x128xf32>
    %526 = vector.extract_strided_slice %511 {offsets = [0, 384], sizes = [8, 128], strides = [1, 1]} : vector<8x512xf32> to vector<8x128xf32>
    %527 = arith.negf %526 : vector<8x128xf32>
    %528 = math.exp %527 : vector<8x128xf32>
    %cst_154 = arith.constant 1.000000e+00 : f32
    %529 = vector.broadcast %cst_154 : f32 to vector<8x128xf32>
    %530 = arith.addf %529, %528 : vector<8x128xf32>
    %531 = arith.divf %529, %530 : vector<8x128xf32>
    %532 = arith.mulf %523, %501 : vector<8x128xf32>
    %533 = arith.mulf %517, %525 : vector<8x128xf32>
    %534 = arith.addf %532, %533 : vector<8x128xf32>
    %535 = math.tanh %534 : vector<8x128xf32>
    %536 = arith.mulf %531, %535 : vector<8x128xf32>
    %c7_i32_155 = arith.constant 7 : i32
    %c8_i32_156 = arith.constant 8 : i32
    %537 = arith.muli %c7_i32_155, %c8_i32_156 : i32
    %538 = tpu.assume_multiple %537, 8 : i32
    %539 = arith.index_cast %538 : i32 to index
    %c0_157 = arith.constant 0 : index
    %540 = vector.load %arg8[%539, %c0_157] : memref<64x512xf32, #tpu.memory_space<vmem>>, vector<8x512xf32>
    %541 = arith.truncf %536 : vector<8x128xf32> to vector<8x128xbf16>
    %c0_158 = arith.constant 0 : index
    %c0_159 = arith.constant 0 : index
    %542 = vector.load %arg5[%c0_158, %c0_159] : memref<128x512xbf16, #tpu.memory_space<vmem>>, vector<128x512xbf16>
    %cst_160 = arith.constant dense<0.000000e+00> : vector<8x512xf32>
    %543 = tpu.matmul %541, %542, %cst_160 {dimension_numbers = #tpu.dot_dimension_numbers<[1], [0], [0], [1], [0, 0, 1, 1], [], []>} : vector<8x128xbf16>, vector<128x512xbf16>, vector<8x512xf32> -> vector<8x512xf32>
    %544 = arith.addf %540, %543 : vector<8x512xf32>
    %545 = vector.extract_strided_slice %544 {offsets = [0, 0], sizes = [8, 128], strides = [1, 1]} : vector<8x512xf32> to vector<8x128xf32>
    %546 = arith.negf %545 : vector<8x128xf32>
    %547 = math.exp %546 : vector<8x128xf32>
    %cst_161 = arith.constant 1.000000e+00 : f32
    %548 = vector.broadcast %cst_161 : f32 to vector<8x128xf32>
    %549 = arith.addf %548, %547 : vector<8x128xf32>
    %550 = arith.divf %548, %549 : vector<8x128xf32>
    %551 = vector.extract_strided_slice %544 {offsets = [0, 128], sizes = [8, 128], strides = [1, 1]} : vector<8x512xf32> to vector<8x128xf32>
    %552 = arith.negf %551 : vector<8x128xf32>
    %553 = math.exp %552 : vector<8x128xf32>
    %cst_162 = arith.constant 1.000000e+00 : f32
    %554 = vector.broadcast %cst_162 : f32 to vector<8x128xf32>
    %555 = arith.addf %554, %553 : vector<8x128xf32>
    %556 = arith.divf %554, %555 : vector<8x128xf32>
    %557 = vector.extract_strided_slice %544 {offsets = [0, 256], sizes = [8, 128], strides = [1, 1]} : vector<8x512xf32> to vector<8x128xf32>
    %558 = math.tanh %557 : vector<8x128xf32>
    %559 = vector.extract_strided_slice %544 {offsets = [0, 384], sizes = [8, 128], strides = [1, 1]} : vector<8x512xf32> to vector<8x128xf32>
    %560 = arith.negf %559 : vector<8x128xf32>
    %561 = math.exp %560 : vector<8x128xf32>
    %cst_163 = arith.constant 1.000000e+00 : f32
    %562 = vector.broadcast %cst_163 : f32 to vector<8x128xf32>
    %563 = arith.addf %562, %561 : vector<8x128xf32>
    %564 = arith.divf %562, %563 : vector<8x128xf32>
    %565 = arith.mulf %556, %534 : vector<8x128xf32>
    %566 = arith.mulf %550, %558 : vector<8x128xf32>
    %567 = arith.addf %565, %566 : vector<8x128xf32>
    %568 = math.tanh %567 : vector<8x128xf32>
    %569 = arith.mulf %564, %568 : vector<8x128xf32>
    %c8_i32_164 = arith.constant 8 : i32
    %c0_165 = arith.constant 0 : index
    %c0_166 = arith.constant 0 : index
    %570 = vector.load %arg7[%c0_165, %c0_166] : memref<8x128xf32, #tpu.memory_space<vmem>>, vector<8x128xf32>
    tpu.vector_store %arg7[%c0_165, %c0_166], %569 {strides = array<i32>} : memref<8x128xf32, #tpu.memory_space<vmem>>, vector<8x128xf32>,
    return
  }
}

</mosaic_0001>

<bundles_post_ra>
// kernel: lstm_forward.1
= control target key start
LH: loop header
LB: loop body
LE: loop exit
PB: predicated region body
PF: predicated region fallthrough
CT: control target
= control target key end

     0   :  { %v7222_v1 = vmov 0   ;;  %s7210_s1 = inlined_call_operand.vmem [shape: bf16[128,512], index: 1, kind: input, shape index: {}]   ;;  %s7211_s0 = inlined_call_operand.vmem [shape: bf16[64,128], index: 0, kind: input, shape index: {}]   ;;  %s7212_s2 = inlined_call_operand.vmem [shape: bf16[128,512], index: 2, kind: input, shape index: {}]   ;;  %s7213_s3 = inlined_call_operand.vmem [shape: f32[1,512], index: 3, kind: input, shape index: {}]   ;;  %s7214_s4 = inlined_call_operand.vmem [shape: bf16[128,512], index: 4, kind: input, shape index: {}]   ;;  %s7215_s5 = inlined_call_operand.vmem [shape: bf16[128,512], index: 5, kind: input, shape index: {}]   ;;  %s7216_s6 = inlined_call_operand.vmem [shape: f32[1,512], index: 6, kind: input, shape index: {}]   ;;  %s7217_s7 = inlined_call_operand.vmem [shape: f32[8,128], index: 7, kind: output, shape index: {}]  }
   0x1   :  { %v4902_v0 = vld [vmem:[%s7210_s1 + $0xe4] ss:$16 sps:$4 sm:$0xff]   ;;  %305 = vmatprep.mubr.bf16.mxu0 %v7222_v1  ;;  %378 = vmatprep.mubr.bf16.mxu1 %v7222_v1  ;;  %v4904_v2 = vld [vmem:[%s7210_s1 + $0xec] ss:$16 sps:$4 sm:$0xff]   ;;  %v4906_v3 = vld [vmem:[%s7210_s1 + $0xe0] ss:$16 sps:$4 sm:$0xff]  }
   0x2   :  { %273 = vmatprep.subr.bf16.mxu0 %v4902_v0  ;;  %v4907_v4 = vld [vmem:[%s7210_s1 + $0xe8] ss:$16 sps:$4 sm:$0xff]   ;;  %346 = vmatprep.subr.bf16.mxu1 %v4904_v2  ;;  %v4908_v5 = vld [vmem:[%s7210_s1 + $0xc4] ss:$16 sps:$4 sm:$0xff]   ;;  %v4910_v6 = vld [vmem:[%s7210_s1 + $0xcc] ss:$16 sps:$4 sm:$0xff]  }
   0x3   :  { %274 = vmatpush1.bf16.msra.mxu0 %v4906_v3  ;;  %347 = vmatpush1.bf16.msra.mxu1 %v4907_v4  ;;  %v4912_v7 = vld [vmem:[%s7210_s1 + $0xc0] ss:$16 sps:$4 sm:$0xff]   ;;  %v4913_v8 = vld [vmem:[%s7210_s1 + $0xc8] ss:$16 sps:$4 sm:$0xff]   ;;  %v4914_v9 = vld [vmem:[%s7210_s1 + $0xa4] ss:$16 sps:$4 sm:$0xff]  }
   0x4   :  { %275 = vmatprep.subr.bf16.mxu0 %v4908_v5  ;;  %348 = vmatprep.subr.bf16.mxu1 %v4910_v6  ;;  %v4916_v10 = vld [vmem:[%s7210_s1 + $0xac] ss:$16 sps:$4 sm:$0xff]   ;;  %v4918_v11 = vld [vmem:[%s7210_s1 + $0xa0] ss:$16 sps:$4 sm:$0xff]   ;;  %v4919_v12 = vld [vmem:[%s7210_s1 + $0xa8] ss:$16 sps:$4 sm:$0xff]   ;;  %v69_v6 = vlaneseq }
   0x5   :  { %v4920_v13 = vld [vmem:[%s7210_s1 + $0x84] ss:$16 sps:$4 sm:$0xff]   ;;  %v4922_v14 = vld [vmem:[%s7210_s1 + $0x8c] ss:$16 sps:$4 sm:$0xff]   ;;  %v4924_v15 = vld [vmem:[%s7210_s1 + $0x80] ss:$16 sps:$4 sm:$0xff]  }
   0x6   :  { %v4925_v16 = vld [vmem:[%s7210_s1 + $0x88] ss:$16 sps:$4 sm:$0xff]   ;;  %v4926_v17 = vld [vmem:[%s7210_s1 + $0x64] ss:$16 sps:$4 sm:$0xff]   ;;  %v4928_v18 = vld [vmem:[%s7210_s1 + $0x6c] ss:$16 sps:$4 sm:$0xff]  }
   0x7   :  { %276 = vmatpush1.bf16.msra.mxu0 %v4912_v7  ;;  %349 = vmatpush1.bf16.msra.mxu1 %v4913_v8  ;;  %v4930_v19 = vld [vmem:[%s7210_s1 + $0x60] ss:$16 sps:$4 sm:$0xff]   ;;  %v4931_v20 = vld [vmem:[%s7210_s1 + $0x68] ss:$16 sps:$4 sm:$0xff]   ;;  %v4932_v21 = vld [vmem:[%s7210_s1 + $0x44] ss:$16 sps:$4 sm:$0xff]  }
   0x8   :  { %277 = vmatprep.subr.bf16.mxu0 %v4914_v9  ;;  %350 = vmatprep.subr.bf16.mxu1 %v4916_v10  ;;  %v4934_v22 = vld [vmem:[%s7210_s1 + $0x4c] ss:$16 sps:$4 sm:$0xff]   ;;  %v4936_v23 = vld [vmem:[%s7210_s1 + $0x40] ss:$16 sps:$4 sm:$0xff]   ;;  %v4937_v24 = vld [vmem:[%s7210_s1 + $0x48] ss:$16 sps:$4 sm:$0xff]  }
   0x9   :  { %v4938_v25 = vld [vmem:[%s7210_s1 + $0x24] ss:$16 sps:$4 sm:$0xff]   ;;  %v4940_v26 = vld [vmem:[%s7210_s1 + $0x2c] ss:$16 sps:$4 sm:$0xff]   ;;  %v4942_v27 = vld [vmem:[%s7210_s1 + $0x20] ss:$16 sps:$4 sm:$0xff]  }
   0xa   :  { %v4943_v28 = vld [vmem:[%s7210_s1 + $0x28] ss:$16 sps:$4 sm:$0xff]   ;;  %v4944_v29 = vld [vmem:[%s7210_s1 + $0x4] ss:$16 sps:$4 sm:$0xff]   ;;  %v4946_v30 = vld [vmem:[%s7210_s1 + $0xc] ss:$16 sps:$4 sm:$0xff]  }
   0xb   :  { %278 = vmatpush1.bf16.msra.mxu0 %v4918_v11  ;;  %351 = vmatpush1.bf16.msra.mxu1 %v4919_v12  ;;  %v4948_v31 = vld [vmem:[%s7210_s1] ss:$16 sps:$4 sm:$0xff]   ;;  %v4949_v32 = vld [vmem:[%s7210_s1 + $0x8] ss:$16 sps:$4 sm:$0xff]   ;;  %v5580_v33 = vld [vmem:[%s7212_s2 + $0xe4] ss:$16 sps:$4 sm:$0xff]  }
   0xc   :  { %279 = vmatprep.subr.bf16.mxu0 %v4920_v13  ;;  %352 = vmatprep.subr.bf16.mxu1 %v4922_v14  ;;  %v5585_v34 = vld [vmem:[%s7212_s2 + $0xec] ss:$16 sps:$4 sm:$0xff]   ;;  %v4950_v35 = vld [vmem:[%s7211_s0] sm:$0xff]   ;;  %v5598_v37 = vld [vmem:[%s7212_s2 + $0xe8] ss:$16 sps:$4 sm:$0xff]   ;;  %v5827_v7 = vshrl.u32 %v69_v6, 7 }
   0xd   :  { %v5593_v36 = vld [vmem:[%s7212_s2 + $0xe0] ss:$16 sps:$4 sm:$0xff]   ;;  %v5605_v38 = vld [vmem:[%s7212_s2 + $0xc4] ss:$16 sps:$4 sm:$0xff]   ;;  %v5610_v39 = vld [vmem:[%s7212_s2 + $0xcc] ss:$16 sps:$4 sm:$0xff]  }
   0xe   :  { %v5615_v40 = vld [vmem:[%s7212_s2 + $0xc0] ss:$16 sps:$4 sm:$0xff]   ;;  %v5622_v41 = vld [vmem:[%s7212_s2 + $0xc8] ss:$16 sps:$4 sm:$0xff]   ;;  %v5629_v42 = vld [vmem:[%s7212_s2 + $0xa4] ss:$16 sps:$4 sm:$0xff]  }
   0xf   :  { %280 = vmatpush1.bf16.msra.mxu0 %v4924_v15  ;;  %353 = vmatpush1.bf16.msra.mxu1 %v4925_v16  ;;  %v5634_v43 = vld [vmem:[%s7212_s2 + $0xac] ss:$16 sps:$4 sm:$0xff]   ;;  %v5644_v45 = vld [vmem:[%s7212_s2 + $0xa0] ss:$16 sps:$4 sm:$0xff]   ;;  %v5649_v46 = vld [vmem:[%s7212_s2 + $0xa8] ss:$16 sps:$4 sm:$0xff]  }
  0x10   :  { %281 = vmatprep.subr.bf16.mxu0 %v4926_v17  ;;  %354 = vmatprep.subr.bf16.mxu1 %v4928_v18  ;;  %v4963_v44 = vld [vmem:[%s7211_s0 + $0x8] sm:$0xff]   ;;  %v5656_v47 = vld [vmem:[%s7212_s2 + $0x84] ss:$16 sps:$4 sm:$0xff]   ;;  %v5668_v49 = vld [vmem:[%s7212_s2 + $0x80] ss:$16 sps:$4 sm:$0xff]   ;;  %7226 = vst [vmem:[#allocation4_spill] sm:$0xff] %v5827_v7 }
  0x11   :  { %v5663_v48 = vld [vmem:[%s7212_s2 + $0x8c] ss:$16 sps:$4 sm:$0xff]   ;;  %v5673_v50 = vld [vmem:[%s7212_s2 + $0x88] ss:$16 sps:$4 sm:$0xff]   ;;  %v5680_v51 = vld [vmem:[%s7212_s2 + $0x64] ss:$16 sps:$4 sm:$0xff]  }
  0x12   :  { %v5687_v52 = vld [vmem:[%s7212_s2 + $0x6c] ss:$16 sps:$4 sm:$0xff]   ;;  %v4976_v53 = vld [vmem:[%s7211_s0 + $0x10] sm:$0xff]   ;;  %v5702_v55 = vld [vmem:[%s7212_s2 + $0x68] ss:$16 sps:$4 sm:$0xff]   ;;  %v7218_v8 = vsub.s32 2, %v5827_v7 }
  0x13   :  { %282 = vmatpush1.bf16.msra.mxu0 %v4930_v19  ;;  %355 = vmatpush1.bf16.msra.mxu1 %v4931_v20  ;;  %v5697_v54 = vld [vmem:[%s7212_s2 + $0x60] ss:$16 sps:$4 sm:$0xff]   ;;  %v5707_v56 = vld [vmem:[%s7212_s2 + $0x44] ss:$16 sps:$4 sm:$0xff]   ;;  %v5712_v57 = vld [vmem:[%s7212_s2 + $0x4c] ss:$16 sps:$4 sm:$0xff]  }
  0x14   :  { %283 = vmatprep.subr.bf16.mxu0 %v4932_v21  ;;  %356 = vmatprep.subr.bf16.mxu1 %v4934_v22  ;;  %v5721_v58 = vld [vmem:[%s7212_s2 + $0x40] ss:$16 sps:$4 sm:$0xff]   ;;  %v5726_v59 = vld [vmem:[%s7212_s2 + $0x48] ss:$16 sps:$4 sm:$0xff]   ;;  %v5731_v60 = vld [vmem:[%s7212_s2 + $0x24] ss:$16 sps:$4 sm:$0xff]  }
  0x15   :  { %v5736_v61 = vld [vmem:[%s7212_s2 + $0x2c] ss:$16 sps:$4 sm:$0xff]   ;;  %v5750_v63 = vld [vmem:[%s7212_s2 + $0x20] ss:$16 sps:$4 sm:$0xff]   ;;  %v5755_v0 = vld [vmem:[%s7212_s2 + $0x28] ss:$16 sps:$4 sm:$0xff]  }
  0x16   :  { %v4989_v62 = vld [vmem:[%s7211_s0 + $0x18] sm:$0xff]   ;;  %v5760_v2 = vld [vmem:[%s7212_s2 + $0x4] ss:$16 sps:$4 sm:$0xff]   ;;  %v5776_v4 = vld [vmem:[%s7212_s2] ss:$16 sps:$4 sm:$0xff]   ;;  %v7221_v9 = vsub.s32 0, %v5827_v7 }
  0x17   :  { %284 = vmatpush1.bf16.msra.mxu0 %v4936_v23  ;;  %357 = vmatpush1.bf16.msra.mxu1 %v4937_v24  ;;  %v5769_v3 = vld [vmem:[%s7212_s2 + $0xc] ss:$16 sps:$4 sm:$0xff]   ;;  %v5781_v5 = vld [vmem:[%s7212_s2 + $0x8] ss:$16 sps:$4 sm:$0xff]   ;;  %v7219_v10 = vsub.s32 3, %v5827_v7  ;;  %v7220_v15 = vsub.s32 1, %v5827_v7 }
  0x18   :  { %285 = vmatprep.subr.bf16.mxu0 %v4938_v25  ;;  %358 = vmatprep.subr.bf16.mxu1 %v4940_v26  ;;  %v67_v11 = vld [vmem:[%s7213_s3] sm:$0xf] }
  0x19   :  { %v5841_v14 = vrot.slane %v67_v11, %v7218_v8  ;;  %v72_v18 = vrot.slane %v67_v11, %v7221_v9  ;;  %v5852_v19 = vrot.slane %v67_v11, %v7219_v10  ;;  %v76_v22 = vrot.slane %v67_v11, %v7220_v15 }
  0x1b   :  { %286 = vmatpush1.bf16.msra.mxu0 %v4942_v27  ;;  %359 = vmatpush1.bf16.msra.mxu1 %v4943_v28 }
  0x1c   :  { %287 = vmatprep.subr.bf16.mxu0 %v4944_v29  ;;  %360 = vmatprep.subr.bf16.mxu1 %v4946_v30 }
  0x1f   :  { %288 = vmatpush1.bf16.msra.mxu0 %v4948_v31  ;;  %361 = vmatpush1.bf16.msra.mxu1 %v4949_v32 }
  0x20   :  { %650 = vmatprep.subr.bf16.mxu0 %v5580_v33  ;;  %691 = vmatprep.subr.bf16.mxu1 %v5585_v34 }
  0x22   :  { %306 = vmatmul.mubr.bf16.vlgmr.msra.gmra.mxu0 %v4950_v35  ;;  %379 = vmatmul.mubr.bf16.vlgmr.msra.gmra.mxu1 %v4950_v35 }
  0x23   :  { %651 = vmatpush1.bf16.msra.mxu0 %v5593_v36  ;;  %692 = vmatpush1.bf16.msra.mxu1 %v5598_v37 }
  0x24   :  { %652 = vmatprep.subr.bf16.mxu0 %v5605_v38  ;;  %693 = vmatprep.subr.bf16.mxu1 %v5610_v39 }
  0x25   :  { %315 = vmatprep.mubr.bf16.mxu0 %v7222_v1  ;;  %388 = vmatprep.mubr.bf16.mxu1 %v7222_v1 }
  0x27   :  { %653 = vmatpush1.bf16.msra.mxu0 %v5615_v40  ;;  %694 = vmatpush1.bf16.msra.mxu1 %v5622_v41 }
  0x28   :  { %654 = vmatprep.subr.bf16.mxu0 %v5629_v42  ;;  %695 = vmatprep.subr.bf16.mxu1 %v5634_v43 }
  0x2a   :  { %316 = vmatmul.mubr.bf16.gmra.mxu0 %v4963_v44  ;;  %389 = vmatmul.mubr.bf16.gmra.mxu1 %v4963_v44 }
  0x2b   :  { %655 = vmatpush1.bf16.msra.mxu0 %v5644_v45  ;;  %696 = vmatpush1.bf16.msra.mxu1 %v5649_v46 }
  0x2c   :  { %656 = vmatprep.subr.bf16.mxu0 %v5656_v47  ;;  %697 = vmatprep.subr.bf16.mxu1 %v5663_v48 }
  0x2d   :  { %325 = vmatprep.mubr.bf16.mxu0 %v7222_v1  ;;  %398 = vmatprep.mubr.bf16.mxu1 %v7222_v1 }
  0x2f   :  { %657 = vmatpush1.bf16.msra.mxu0 %v5668_v49  ;;  %698 = vmatpush1.bf16.msra.mxu1 %v5673_v50 }
  0x30   :  { %658 = vmatprep.subr.bf16.mxu0 %v5680_v51  ;;  %699 = vmatprep.subr.bf16.mxu1 %v5687_v52 }
  0x32   :  { %326 = vmatmul.mubr.bf16.gmra.mxu0 %v4976_v53  ;;  %399 = vmatmul.mubr.bf16.gmra.mxu1 %v4976_v53 }
  0x33   :  { %659 = vmatpush1.bf16.msra.mxu0 %v5697_v54  ;;  %700 = vmatpush1.bf16.msra.mxu1 %v5702_v55 }
  0x34   :  { %660 = vmatprep.subr.bf16.mxu0 %v5707_v56  ;;  %701 = vmatprep.subr.bf16.mxu1 %v5712_v57 }
  0x35   :  { %335 = vmatprep.mubr.bf16.mxu0 %v7222_v1  ;;  %408 = vmatprep.mubr.bf16.mxu1 %v7222_v1 }
  0x37   :  { %661 = vmatpush1.bf16.msra.mxu0 %v5721_v58  ;;  %702 = vmatpush1.bf16.msra.mxu1 %v5726_v59 }
  0x38   :  { %662 = vmatprep.subr.bf16.mxu0 %v5731_v60  ;;  %703 = vmatprep.subr.bf16.mxu1 %v5736_v61 }
  0x3a   :  { %336 = vmatmul.mubr.bf16.gmra.mxu0 %v4989_v62  ;;  %409 = vmatmul.mubr.bf16.gmra.mxu1 %v4989_v62 }
  0x3b   :  { %663 = vmatpush1.bf16.msra.mxu0 %v5750_v63  ;;  %704 = vmatpush1.bf16.msra.mxu1 %v5755_v0 }
  0x3c   :  { %664 = vmatprep.subr.bf16.mxu0 %v5760_v2  ;;  %705 = vmatprep.subr.bf16.mxu1 %v5769_v3 }
  0x3d   :  { %682 = vmatprep.mubr.bf16.mxu0 %v7222_v1  ;;  %723 = vmatprep.mubr.bf16.mxu1 %v7222_v1 }
  0x3f   :  { %665 = vmatpush1.bf16.msra.mxu0 %v5776_v4  ;;  %706 = vmatpush1.bf16.msra.mxu1 %v5781_v5 }
  0x40   :  { %961 = vmatprep.subr.bf16.mxu0 %v5580_v33  ;;  %1002 = vmatprep.subr.bf16.mxu1 %v5585_v34 }
  0x42   :  { %683 = vmatmul.mubr.bf16.vlgmr.msra.gmra.mxu0 %v7222_v1  ;;  %724 = vmatmul.mubr.bf16.vlgmr.msra.gmra.mxu1 %v7222_v1 }
  0x43   :  { %962 = vmatpush1.bf16.msra.mxu0 %v5593_v36  ;;  %1003 = vmatpush1.bf16.msra.mxu1 %v5598_v37 }
  0x44   :  { %963 = vmatprep.subr.bf16.mxu0 %v5605_v38  ;;  %1004 = vmatprep.subr.bf16.mxu1 %v5610_v39 }
  0x45   :  { %993 = vmatprep.mubr.bf16.mxu0 %v7222_v1  ;;  %1034 = vmatprep.mubr.bf16.mxu1 %v7222_v1 }
  0x47   :  { %964 = vmatpush1.bf16.msra.mxu0 %v5615_v40  ;;  %1005 = vmatpush1.bf16.msra.mxu1 %v5622_v41 }
  0x48   :  { %965 = vmatprep.subr.bf16.mxu0 %v5629_v42  ;;  %1006 = vmatprep.subr.bf16.mxu1 %v5634_v43 }
  0x4b   :  { %966 = vmatpush1.bf16.msra.mxu0 %v5644_v45  ;;  %1007 = vmatpush1.bf16.msra.mxu1 %v5649_v46 }
  0x4c   :  { %967 = vmatprep.subr.bf16.mxu0 %v5656_v47  ;;  %1008 = vmatprep.subr.bf16.mxu1 %v5663_v48 }
  0x4f   :  { %968 = vmatpush1.bf16.msra.mxu0 %v5668_v49  ;;  %1009 = vmatpush1.bf16.msra.mxu1 %v5673_v50 }
  0x50   :  { %969 = vmatprep.subr.bf16.mxu0 %v5680_v51  ;;  %1010 = vmatprep.subr.bf16.mxu1 %v5687_v52 }
  0x53   :  { %970 = vmatpush1.bf16.msra.mxu0 %v5697_v54  ;;  %1011 = vmatpush1.bf16.msra.mxu1 %v5702_v55 }
  0x54   :  { %971 = vmatprep.subr.bf16.mxu0 %v5707_v56  ;;  %1012 = vmatprep.subr.bf16.mxu1 %v5712_v57 }
  0x57   :  { %972 = vmatpush1.bf16.msra.mxu0 %v5721_v58  ;;  %1013 = vmatpush1.bf16.msra.mxu1 %v5726_v59 }
  0x58   :  { %973 = vmatprep.subr.bf16.mxu0 %v5731_v60  ;;  %1014 = vmatprep.subr.bf16.mxu1 %v5736_v61 }
  0x5b   :  { %974 = vmatpush1.bf16.msra.mxu0 %v5750_v63  ;;  %1015 = vmatpush1.bf16.msra.mxu1 %v5755_v0 }
  0x5c   :  { %975 = vmatprep.subr.bf16.mxu0 %v5760_v2  ;;  %1016 = vmatprep.subr.bf16.mxu1 %v5769_v3 }
  0x5f   :  { %976 = vmatpush1.bf16.msra.mxu0 %v5776_v4  ;;  %1017 = vmatpush1.bf16.msra.mxu1 %v5781_v5 }
  0x60   :  { %1273 = vmatprep.subr.bf16.mxu0 %v5580_v33  ;;  %1314 = vmatprep.subr.bf16.mxu1 %v5585_v34 }
  0xe2   :  { %v5835_v12 = vpop.f32.mrf.mxu0  ;;  %v5837_v13 = vpop.f32.mrf.mxu1 }
  0xe4   :  { %v5844_v16 = vpop.f32.mrf.mxu0  ;;  %v5846_v17 = vpop.f32.mrf.mxu1 }
  0xe6   :  { %v311_v20 = vpop.f32.mrf.mxu0  ;;  %v384_v21 = vpop.f32.mrf.mxu1 }
  0xe7   :  { %v5856_v23 = vadd.f32 %v311_v20, %v72_v18  ;;  %v5859_v24 = vadd.f32 %v384_v21, %v5841_v14 }
  0xe8   :  { %v313_v25 = vpop.f32.mrf.mxu0  ;;  %v386_v26 = vpop.f32.mrf.mxu1 }
  0xe9   :  { %v5861_v27 = vadd.f32 %v313_v25, %v76_v22  ;;  %v5864_v28 = vadd.f32 %v386_v26, %v5852_v19 }
  0xea   :  { %v317_v29 = vpop.f32.mrf.mxu0  ;;  %v390_v30 = vpop.f32.mrf.mxu1 }
  0xeb   :  { %v5866_v31 = vadd.f32 %v317_v29, %v72_v18  ;;  %v5869_v32 = vadd.f32 %v390_v30, %v5841_v14 }
  0xec   :  { %v319_v35 = vpop.f32.mrf.mxu0  ;;  %v392_v44 = vpop.f32.mrf.mxu1 }
  0xed   :  { %7227 = vst [vmem:[#allocation5_spill] sm:$0xff] %v5869_v32  ;;  %v5871_v53 = vadd.f32 %v319_v35, %v76_v22  ;;  %v5874_v62 = vadd.f32 %v392_v44, %v5852_v19 }
  0xee   :  { %v321_v6 = vpop.f32.mrf.mxu0  ;;  %v394_v11 = vpop.f32.mrf.mxu1 }
  0xef   :  { %v5876_v20 = vadd.f32 %v321_v6, %v72_v18  ;;  %v5879_v21 = vadd.f32 %v394_v11, %v5841_v14 }
  0xf0   :  { %v323_v25 = vpop.f32.mrf.mxu0  ;;  %v396_v26 = vpop.f32.mrf.mxu1 }
  0xf1   :  { %7228 = vst [vmem:[#allocation6_spill] sm:$0xff] %v5876_v20  ;;  %7229 = vst [vmem:[#allocation7_spill] sm:$0xff] %v5879_v21  ;;  %v5881_v29 = vadd.f32 %v323_v25, %v76_v22  ;;  %v5884_v30 = vadd.f32 %v396_v26, %v5852_v19 }
  0xf2   :  { %v327_v8 = vpop.f32.mrf.mxu0  ;;  %v400_v35 = vpop.f32.mrf.mxu1 }
  0xf3   :  { %7230 = vst [vmem:[#allocation8_spill] sm:$0xff] %v5881_v29  ;;  %7231 = vst [vmem:[#allocation9_spill] sm:$0xff] %v5884_v30  ;;  %v5886_v10 = vadd.f32 %v327_v8, %v72_v18  ;;  %v5889_v44 = vadd.f32 %v400_v35, %v5841_v14 }
  0xf4   :  { %v329_v15 = vpop.f32.mrf.mxu0  ;;  %v402_v6 = vpop.f32.mrf.mxu1 }
  0xf5   :  { %7232 = vst [vmem:[#allocation10_spill] sm:$0xff] %v5886_v10  ;;  %7233 = vst [vmem:[#allocation11_spill] sm:$0xff] %v5889_v44  ;;  %v5891_v9 = vadd.f32 %v329_v15, %v76_v22  ;;  %v5894_v11 = vadd.f32 %v402_v6, %v5852_v19 }
  0xf6   :  { %v331_v1 = vpop.f32.mrf.mxu0  ;;  %v404_v25 = vpop.f32.mrf.mxu1 }
  0xf7   :  { %7234 = vst [vmem:[#allocation12_spill] sm:$0xff] %v5891_v9  ;;  %7235 = vst [vmem:[#allocation13_spill] sm:$0xff] %v5894_v11  ;;  %v5896_v7 = vadd.f32 %v331_v1, %v72_v18  ;;  %v5899_v26 = vadd.f32 %v404_v25, %v5841_v14 }
  0xf8   :  { %v333_v21 = vpop.f32.mrf.mxu0  ;;  %v406_v8 = vpop.f32.mrf.mxu1 }
  0xf9   :  { %7236 = vst [vmem:[#allocation14_spill] sm:$0xff] %v5896_v7  ;;  %7237 = vst [vmem:[#allocation15_spill] sm:$0xff] %v5899_v26  ;;  %v5901_v10 = vadd.f32 %v333_v21, %v76_v22  ;;  %v5904_v35 = vadd.f32 %v406_v8, %v5852_v19 }
  0xfa   :  { %v337_v44 = vpop.f32.mrf.mxu0  ;;  %v410_v15 = vpop.f32.mrf.mxu1 }
  0xfb   :  { %7238 = vst [vmem:[#allocation16_spill] sm:$0xff] %v5901_v10  ;;  %7239 = vst [vmem:[#allocation17_spill] sm:$0xff] %v5904_v35  ;;  %v5906_v9 = vadd.f32 %v337_v44, %v72_v18  ;;  %v5909_v6 = vadd.f32 %v410_v15, %v5841_v14 }
  0xfc   :  { %v339_v11 = vpop.f32.mrf.mxu0  ;;  %v412_v1 = vpop.f32.mrf.mxu1 }
  0xfd   :  { %7240 = vst [vmem:[#allocation18_spill] sm:$0xff] %v5906_v9  ;;  %7241 = vst [vmem:[#allocation19_spill] sm:$0xff] %v5909_v6  ;;  %v5911_v7 = vadd.f32 %v339_v11, %v76_v22  ;;  %v5914_v25 = vadd.f32 %v412_v1, %v5852_v19  ;;  %v308_v9 = vadd.f32 %v5835_v12, %v72_v18 }
  0xfe   :  { %v341_v26 = vpop.f32.mrf.mxu0  ;;  %v414_v21 = vpop.f32.mrf.mxu1  ;;  %v310_v1 = vadd.f32 %v5844_v16, %v76_v22 }
  0xff   :  { %7242 = vst [vmem:[#allocation20_spill] sm:$0xff] %v5911_v7  ;;  %7243 = vst [vmem:[#allocation21_spill] sm:$0xff] %v5914_v25  ;;  %v5916_v10 = vadd.f32 %v341_v26, %v72_v18  ;;  %v5919_v8 = vadd.f32 %v414_v21, %v5841_v14  ;;  %v383_v18 = vadd.f32 %v5846_v17, %v5852_v19 }
 0x100   :  { %v343_v35 = vpop.f32.mrf.mxu0  ;;  %v416_v44 = vpop.f32.mrf.mxu1 }
 0x101   :  { %7244 = vst [vmem:[#allocation22_spill] sm:$0xff] %v5916_v10  ;;  %7245 = vst [vmem:[#allocation23_spill] sm:$0xff] %v5919_v8  ;;  %v5922_v15 = vadd.f32 %v343_v35, %v76_v22  ;;  %v5925_v6 = vadd.f32 %v416_v44, %v5852_v19  ;;  %v381_v44 = vadd.f32 %v5837_v13, %v5841_v14 }
 0x102   :  { %v684_v11 = vpop.f32.mrf.mxu0  ;;  %v725_v7 = vpop.f32.mrf.mxu1 }
 0x103   :  { %v732_v25 = vadd.f32 %v684_v11, %v308_v9  ;;  %v734_v22 = vadd.f32 %v725_v7, %v381_v44 }
 0x104   :  { %v686_v30 = vpop.f32.mrf.mxu0  ;;  %v727_v26 = vpop.f32.mrf.mxu1 }
 0x105   :  { %v4561_v10 = vmul.f32 -1.442695, %v732_v25  ;;  %v733_v29 = vadd.f32 %v686_v30, %v310_v1  ;;  %v735_v35 = vadd.f32 %v727_v26, %v383_v18 }
 0x106   :  { %v688_v21 = vpop.f32.mrf.mxu0  ;;  %v729_v8 = vpop.f32.mrf.mxu1 }
 0x107   :  { %5150 = vpow2.f32 %v4561_v10  ;;  %v4562_v20 = vmul.f32 -1.442695, %v733_v29  ;;  %v4563_v16 = vmul.f32 -1.442695, %v735_v35  ;;  %v7246_v21 = vmov 0  }
 0x108   :  { %v689_v32 = vpop.f32.mrf.mxu0  ;;  %v730_v12 = vpop.f32.mrf.mxu1 }
 0x109   :  { %5152 = vpow2.f32 %v4562_v20 }
 0x10a   :  { %5154 = vpow2.f32 %v4563_v16 }
 0x114   :  { %v5151_v9 = vpop.eup %5150 }
 0x115   :  { %v739_v11 = vadd.f32 1.0, %v5151_v9 }
 0x116   :  { %v5153_v25 = vpop.eup %5152 }
 0x117   :  { %5156 = vrcp.f32 %v739_v11  ;;  %v745_v30 = vadd.f32 1.0, %v5153_v25  ;;  %v5155_v10 = vpop.eup %5154 }
 0x118   :  { %5158 = vtanh.f32 %v734_v22  ;;  %v752_v8 = vadd.f32 1.0, %v5155_v10 }
 0x119   :  { %5160 = vrcp.f32 %v745_v30 }
 0x11a   :  { %5162 = vrcp.f32 %v752_v8 }
 0x124   :  { %v5157_v32 = vpop.eup %5156 }
 0x125   :  { %v5159_v20 = vpop.eup %5158 }
 0x126   :  { %v5161_v29 = vpop.eup %5160  ;;  %v756_v19 = vmul.f32 %v5159_v20, %v5157_v32 }
 0x127   :  { %v755_v17 = vmul.f32 0.0, %v5161_v29  ;;  %v5163_v7 = vpop.eup %5162 }
 0x129   :  { %v5932_v1 = vadd.f32 %v756_v19, %v755_v17 }
 0x12b   :  { %5164 = vtanh.f32 %v5932_v1 }
 0x138   :  { %v5165_v13 = vpop.eup %5164 }
 0x139   :  { %v759_v14 = vmul.f32 %v5165_v13, %v5163_v7 }
 0x13b   :  { %v760_v26 = vpack.c.bf16 %v759_v14, %v759_v14 }
 0x13d   :  { %761 = vst [vmem:[#allocation3] sm:$0xf] %v760_v26  ;;  %994 = vmatmul.mubr.bf16.vlgmr.msra.gmra.mxu0 %v760_v26  ;;  %1035 = vmatmul.mubr.bf16.vlgmr.msra.gmra.mxu1 %v760_v26 }
 0x13e   :  { %1274 = vmatpush1.bf16.msra.mxu0 %v5593_v36  ;;  %1315 = vmatpush1.bf16.msra.mxu1 %v5598_v37 }
 0x13f   :  { %1275 = vmatprep.subr.bf16.mxu0 %v5605_v38  ;;  %1316 = vmatprep.subr.bf16.mxu1 %v5610_v39 }
 0x140   :  { %1305 = vmatprep.mubr.bf16.mxu0 %v7246_v21  ;;  %1346 = vmatprep.mubr.bf16.mxu1 %v7246_v21 }
 0x142   :  { %1276 = vmatpush1.bf16.msra.mxu0 %v5615_v40  ;;  %1317 = vmatpush1.bf16.msra.mxu1 %v5622_v41 }
 0x143   :  { %1277 = vmatprep.subr.bf16.mxu0 %v5629_v42  ;;  %1318 = vmatprep.subr.bf16.mxu1 %v5634_v43 }
 0x146   :  { %1278 = vmatpush1.bf16.msra.mxu0 %v5644_v45  ;;  %1319 = vmatpush1.bf16.msra.mxu1 %v5649_v46 }
 0x147   :  { %1279 = vmatprep.subr.bf16.mxu0 %v5656_v47  ;;  %1320 = vmatprep.subr.bf16.mxu1 %v5663_v48 }
 0x14a   :  { %1280 = vmatpush1.bf16.msra.mxu0 %v5668_v49  ;;  %1321 = vmatpush1.bf16.msra.mxu1 %v5673_v50 }
 0x14b   :  { %1281 = vmatprep.subr.bf16.mxu0 %v5680_v51  ;;  %1322 = vmatprep.subr.bf16.mxu1 %v5687_v52 }
 0x14e   :  { %1282 = vmatpush1.bf16.msra.mxu0 %v5697_v54  ;;  %1323 = vmatpush1.bf16.msra.mxu1 %v5702_v55 }
 0x14f   :  { %1283 = vmatprep.subr.bf16.mxu0 %v5707_v56  ;;  %1324 = vmatprep.subr.bf16.mxu1 %v5712_v57 }
 0x152   :  { %1284 = vmatpush1.bf16.msra.mxu0 %v5721_v58  ;;  %1325 = vmatpush1.bf16.msra.mxu1 %v5726_v59 }
 0x153   :  { %1285 = vmatprep.subr.bf16.mxu0 %v5731_v60  ;;  %1326 = vmatprep.subr.bf16.mxu1 %v5736_v61 }
 0x156   :  { %1286 = vmatpush1.bf16.msra.mxu0 %v5750_v63  ;;  %1327 = vmatpush1.bf16.msra.mxu1 %v5755_v0 }
 0x157   :  { %1287 = vmatprep.subr.bf16.mxu0 %v5760_v2  ;;  %1328 = vmatprep.subr.bf16.mxu1 %v5769_v3 }
 0x15a   :  { %1288 = vmatpush1.bf16.msra.mxu0 %v5776_v4  ;;  %1329 = vmatpush1.bf16.msra.mxu1 %v5781_v5 }
 0x15b   :  { %1585 = vmatprep.subr.bf16.mxu0 %v5580_v33  ;;  %1626 = vmatprep.subr.bf16.mxu1 %v5585_v34 }
 0x1fd   :  { %v995_v12 = vpop.f32.mrf.mxu0  ;;  %v1036_v18 = vpop.f32.mrf.mxu1 }
 0x1fe   :  { %v1043_v35 = vadd.f32 %v995_v12, %v5856_v23  ;;  %v1045_v34 = vadd.f32 %v1036_v18, %v5859_v24 }
 0x1ff   :  { %v997_v44 = vpop.f32.mrf.mxu0  ;;  %v1038_v16 = vpop.f32.mrf.mxu1 }
 0x200   :  { %v4596_v9 = vmul.f32 -1.442695, %v1043_v35  ;;  %v1044_v22 = vadd.f32 %v997_v44, %v5861_v27  ;;  %v1046_v33 = vadd.f32 %v1038_v16, %v5864_v28  ;;  %v6032_v16 = vld [vmem:[%s7212_s2 + $0xe0] ss:$16 sps:$4 sm:$0xff]  }
 0x201   :  { %v999_v11 = vpop.f32.mrf.mxu0  ;;  %v1040_v25 = vpop.f32.mrf.mxu1 }
 0x202   :  { %5166 = vpow2.f32 %v4596_v9  ;;  %v4597_v30 = vmul.f32 -1.442695, %v1044_v22  ;;  %v4598_v20 = vmul.f32 -1.442695, %v1046_v33  ;;  %v6037_v9 = vld [vmem:[%s7212_s2 + $0xe8] ss:$16 sps:$4 sm:$0xff]  }
 0x203   :  { %v1000_v10 = vpop.f32.mrf.mxu0  ;;  %v1041_v32 = vpop.f32.mrf.mxu1  ;;  %v6046_v22 = vld [vmem:[%s7212_s2 + $0xc4] ss:$16 sps:$4 sm:$0xff]   ;;  %v6051_v11 = vld [vmem:[%s7212_s2 + $0xcc] ss:$16 sps:$4 sm:$0xff]   ;;  %v6056_v25 = vld [vmem:[%s7212_s2 + $0xc0] ss:$16 sps:$4 sm:$0xff]  }
 0x204   :  { %5168 = vpow2.f32 %v4597_v30  ;;  %v6061_v30 = vld [vmem:[%s7212_s2 + $0xc8] ss:$16 sps:$4 sm:$0xff]   ;;  %v6070_v10 = vld [vmem:[%s7212_s2 + $0xa4] ss:$16 sps:$4 sm:$0xff]   ;;  %v6075_v32 = vld [vmem:[%s7212_s2 + $0xac] ss:$16 sps:$4 sm:$0xff]  }
 0x205   :  { %5170 = vtanh.f32 %v1045_v34  ;;  %v6080_v33 = vld [vmem:[%s7212_s2 + $0xa0] ss:$16 sps:$4 sm:$0xff]   ;;  %v6085_v34 = vld [vmem:[%s7212_s2 + $0xa8] ss:$16 sps:$4 sm:$0xff]  }
 0x206   :  { %5172 = vpow2.f32 %v4598_v20  ;;  %v6094_v20 = vld [vmem:[%s7212_s2 + $0x84] ss:$16 sps:$4 sm:$0xff]  }
 0x20f   :  { %v5167_v29 = vpop.eup %5166 }
 0x210   :  { %v1050_v8 = vadd.f32 1.0, %v5167_v29  ;;  %v6099_v29 = vld [vmem:[%s7212_s2 + $0x8c] ss:$16 sps:$4 sm:$0xff]  }
 0x211   :  { %v5169_v23 = vpop.eup %5168 }
 0x212   :  { %5174 = vrcp.f32 %v1050_v8  ;;  %v1056_v17 = vadd.f32 1.0, %v5169_v23  ;;  %v5171_v27 = vpop.eup %5170  ;;  %v6104_v8 = vld [vmem:[%s7212_s2 + $0x80] ss:$16 sps:$4 sm:$0xff]   ;;  %v6109_v23 = vld [vmem:[%s7212_s2 + $0x88] ss:$16 sps:$4 sm:$0xff]  }
 0x213   :  { %v5173_v19 = vpop.eup %5172 }
 0x214   :  { %5176 = vrcp.f32 %v1056_v17  ;;  %v1063_v26 = vadd.f32 1.0, %v5173_v19  ;;  %v6116_v17 = vld [vmem:[%s7212_s2 + $0x64] ss:$16 sps:$4 sm:$0xff]   ;;  %v6128_v19 = vld [vmem:[%s7212_s2 + $0x60] ss:$16 sps:$4 sm:$0xff]  }
 0x216   :  { %5178 = vrcp.f32 %v1063_v26  ;;  %v6152_v26 = vld [vmem:[%s7212_s2 + $0x40] ss:$16 sps:$4 sm:$0xff]  }
 0x21f   :  { %v5175_v7 = vpop.eup %5174 }
 0x220   :  { %v1067_v13 = vmul.f32 %v5175_v7, %v5171_v27  ;;  %v6121_v27 = vld [vmem:[%s7212_s2 + $0x6c] ss:$16 sps:$4 sm:$0xff]   ;;  %v6133_v7 = vld [vmem:[%s7212_s2 + $0x68] ss:$16 sps:$4 sm:$0xff]  }
 0x221   :  { %v5177_v14 = vpop.eup %5176 }
 0x222   :  { %v1066_v12 = vmul.f32 %v5177_v14, %v5932_v1  ;;  %v6027_v1 = vld [vmem:[%s7212_s2 + $0xec] ss:$16 sps:$4 sm:$0xff]  }
 0x223   :  { %v5179_v24 = vpop.eup %5178  ;;  %v6145_v14 = vld [vmem:[%s7212_s2 + $0x4c] ss:$16 sps:$4 sm:$0xff]  }
 0x224   :  { %v5974_v28 = vadd.f32 %v1067_v13, %v1066_v12  ;;  %v6140_v13 = vld [vmem:[%s7212_s2 + $0x44] ss:$16 sps:$4 sm:$0xff]   ;;  %v6157_v12 = vld [vmem:[%s7212_s2 + $0x48] ss:$16 sps:$4 sm:$0xff]  }
 0x226   :  { %5180 = vtanh.f32 %v5974_v28 }
 0x233   :  { %v5181_v18 = vpop.eup %5180 }
 0x234   :  { %v1070_v35 = vmul.f32 %v5181_v18, %v5179_v24  ;;  %v6169_v24 = vld [vmem:[%s7212_s2 + $0x2c] ss:$16 sps:$4 sm:$0xff]   ;;  %v6176_v18 = vld [vmem:[%s7212_s2 + $0x20] ss:$16 sps:$4 sm:$0xff]  }
 0x236   :  { %v1071_v44 = vpack.c.bf16 %v1070_v35, %v1070_v35  ;;  %v6181_v35 = vld [vmem:[%s7212_s2 + $0x28] ss:$16 sps:$4 sm:$0xff]  }
 0x238   :  { %1073 = vst [vmem:[#allocation3 + $0x4] sm:$0xf] %v1071_v44  ;;  %1306 = vmatmul.mubr.bf16.vlgmr.msra.gmra.mxu0 %v1071_v44  ;;  %1347 = vmatmul.mubr.bf16.vlgmr.msra.gmra.mxu1 %v1071_v44  ;;  %v6188_v44 = vld [vmem:[%s7212_s2 + $0x4] ss:$16 sps:$4 sm:$0xff]  }
 0x239   :  { %1586 = vmatpush1.bf16.msra.mxu0 %v5593_v36  ;;  %1627 = vmatpush1.bf16.msra.mxu1 %v5598_v37 }
 0x23a   :  { %1587 = vmatprep.subr.bf16.mxu0 %v5605_v38  ;;  %1628 = vmatprep.subr.bf16.mxu1 %v5610_v39 }
 0x23b   :  { %1617 = vmatprep.mubr.bf16.mxu0 %v7246_v21  ;;  %1658 = vmatprep.mubr.bf16.mxu1 %v7246_v21 }
 0x23d   :  { %1588 = vmatpush1.bf16.msra.mxu0 %v5615_v40  ;;  %1629 = vmatpush1.bf16.msra.mxu1 %v5622_v41 }
 0x23e   :  { %1589 = vmatprep.subr.bf16.mxu0 %v5629_v42  ;;  %1630 = vmatprep.subr.bf16.mxu1 %v5634_v43 }
 0x241   :  { %1590 = vmatpush1.bf16.msra.mxu0 %v5644_v45  ;;  %1631 = vmatpush1.bf16.msra.mxu1 %v5649_v46 }
 0x242   :  { %1591 = vmatprep.subr.bf16.mxu0 %v5656_v47  ;;  %1632 = vmatprep.subr.bf16.mxu1 %v5663_v48 }
 0x245   :  { %1592 = vmatpush1.bf16.msra.mxu0 %v5668_v49  ;;  %1633 = vmatpush1.bf16.msra.mxu1 %v5673_v50  ;;  %v7247_v50 = vld [vmem:[#allocation5_spill] sm:$0xff] }
 0x246   :  { %1593 = vmatprep.subr.bf16.mxu0 %v5680_v51  ;;  %1634 = vmatprep.subr.bf16.mxu1 %v5687_v52 }
 0x249   :  { %1594 = vmatpush1.bf16.msra.mxu0 %v5697_v54  ;;  %1635 = vmatpush1.bf16.msra.mxu1 %v5702_v55 }
 0x24a   :  { %1595 = vmatprep.subr.bf16.mxu0 %v5707_v56  ;;  %1636 = vmatprep.subr.bf16.mxu1 %v5712_v57 }
 0x24d   :  { %1596 = vmatpush1.bf16.msra.mxu0 %v5721_v58  ;;  %1637 = vmatpush1.bf16.msra.mxu1 %v5726_v59 }
 0x24e   :  { %1597 = vmatprep.subr.bf16.mxu0 %v5731_v60  ;;  %1638 = vmatprep.subr.bf16.mxu1 %v5736_v61 }
 0x251   :  { %1598 = vmatpush1.bf16.msra.mxu0 %v5750_v63  ;;  %1639 = vmatpush1.bf16.msra.mxu1 %v5755_v0 }
 0x252   :  { %1599 = vmatprep.subr.bf16.mxu0 %v5760_v2  ;;  %1640 = vmatprep.subr.bf16.mxu1 %v5769_v3 }
 0x255   :  { %1600 = vmatpush1.bf16.msra.mxu0 %v5776_v4  ;;  %1641 = vmatpush1.bf16.msra.mxu1 %v5781_v5 }
 0x256   :  { %1938 = vmatprep.subr.bf16.mxu1 %v6027_v1 }
 0x2f8   :  { %v1307_v36 = vpop.f32.mrf.mxu0  ;;  %v1348_v37 = vpop.f32.mrf.mxu1 }
 0x2f9   :  { %v1355_v38 = vadd.f32 %v1307_v36, %v5866_v31  ;;  %v1357_v51 = vadd.f32 %v1348_v37, %v7247_v50  ;;  %v6193_v36 = vld [vmem:[%s7212_s2 + $0xc] ss:$16 sps:$4 sm:$0xff]   ;;  %v6200_v37 = vld [vmem:[%s7212_s2] ss:$16 sps:$4 sm:$0xff]  }
 0x2fa   :  { %v1309_v39 = vpop.f32.mrf.mxu0  ;;  %v1350_v40 = vpop.f32.mrf.mxu1 }
 0x2fb   :  { %v4631_v41 = vmul.f32 -1.442695, %v1355_v38  ;;  %v1356_v42 = vadd.f32 %v1309_v39, %v5871_v53  ;;  %v1358_v49 = vadd.f32 %v1350_v40, %v5874_v62  ;;  %v6022_v62 = vld [vmem:[%s7212_s2 + $0xe4] ss:$16 sps:$4 sm:$0xff]   ;;  %v6205_v38 = vld [vmem:[%s7212_s2 + $0x8] ss:$16 sps:$4 sm:$0xff]  }
 0x2fc   :  { %v1311_v43 = vpop.f32.mrf.mxu0  ;;  %v1352_v45 = vpop.f32.mrf.mxu1  ;;  %1897 = vmatprep.subr.bf16.mxu0 %v6022_v62 }
 0x2fd   :  { %5182 = vpow2.f32 %v4631_v41  ;;  %v4632_v46 = vmul.f32 -1.442695, %v1356_v42  ;;  %v4633_v52 = vmul.f32 -1.442695, %v1358_v49  ;;  %v7248_v41 = vld [vmem:[#allocation6_spill] sm:$0xff] }
 0x2fe   :  { %v1312_v47 = vpop.f32.mrf.mxu0  ;;  %v1353_v48 = vpop.f32.mrf.mxu1 }
 0x2ff   :  { %5184 = vpow2.f32 %v4632_v46  ;;  %v7249_v47 = vld [vmem:[#allocation8_spill] sm:$0xff] }
 0x300   :  { %5186 = vtanh.f32 %v1357_v51 }
 0x301   :  { %5188 = vpow2.f32 %v4633_v52 }
 0x30a   :  { %v5183_v54 = vpop.eup %5182 }
 0x30b   :  { %v1362_v55 = vadd.f32 1.0, %v5183_v54 }
 0x30c   :  { %v5185_v56 = vpop.eup %5184 }
 0x30d   :  { %5190 = vrcp.f32 %v1362_v55  ;;  %v1368_v57 = vadd.f32 1.0, %v5185_v56  ;;  %v5187_v58 = vpop.eup %5186  ;;  %v7250_v55 = vld [vmem:[#allocation9_spill] sm:$0xff] }
 0x30e   :  { %v5189_v59 = vpop.eup %5188 }
 0x30f   :  { %5192 = vrcp.f32 %v1368_v57  ;;  %v1375_v0 = vadd.f32 1.0, %v5189_v59  ;;  %v7251_v57 = vld [vmem:[#allocation7_spill] sm:$0xff] }
 0x311   :  { %5194 = vrcp.f32 %v1375_v0 }
 0x31a   :  { %v5191_v60 = vpop.eup %5190 }
 0x31b   :  { %v1379_v61 = vmul.f32 %v5191_v60, %v5187_v58 }
 0x31c   :  { %v5193_v63 = vpop.eup %5192 }
 0x31d   :  { %v1378_v2 = vmul.f32 %v5193_v63, %v5974_v28  ;;  %v6164_v28 = vld [vmem:[%s7212_s2 + $0x24] ss:$16 sps:$4 sm:$0xff]  }
 0x31e   :  { %v5195_v4 = vpop.eup %5194 }
 0x31f   :  { %v6014_v3 = vadd.f32 %v1379_v61, %v1378_v2 }
 0x321   :  { %5196 = vtanh.f32 %v6014_v3 }
 0x32e   :  { %v5197_v5 = vpop.eup %5196 }
 0x32f   :  { %v1382_v31 = vmul.f32 %v5197_v5, %v5195_v4 }
 0x331   :  { %v1383_v53 = vpack.c.bf16 %v1382_v31, %v1382_v31 }
 0x333   :  { %1385 = vst [vmem:[#allocation3 + $0x8] sm:$0xf] %v1383_v53  ;;  %1618 = vmatmul.mubr.bf16.vlgmr.msra.gmra.mxu0 %v1383_v53  ;;  %1659 = vmatmul.mubr.bf16.vlgmr.msra.gmra.mxu1 %v1383_v53 }
 0x334   :  { %1929 = vmatprep.mubr.bf16.mxu0 %v7246_v21  ;;  %1970 = vmatprep.mubr.bf16.mxu1 %v7246_v21 }
 0x335   :  { %1898 = vmatpush1.bf16.msra.mxu0 %v6032_v16  ;;  %1939 = vmatpush1.bf16.msra.mxu1 %v6037_v9 }
 0x336   :  { %1899 = vmatprep.subr.bf16.mxu0 %v6046_v22  ;;  %1940 = vmatprep.subr.bf16.mxu1 %v6051_v11 }
 0x339   :  { %1900 = vmatpush1.bf16.msra.mxu0 %v6056_v25  ;;  %1941 = vmatpush1.bf16.msra.mxu1 %v6061_v30 }
 0x33a   :  { %1901 = vmatprep.subr.bf16.mxu0 %v6070_v10  ;;  %1942 = vmatprep.subr.bf16.mxu1 %v6075_v32 }
 0x33d   :  { %1902 = vmatpush1.bf16.msra.mxu0 %v6080_v33  ;;  %1943 = vmatpush1.bf16.msra.mxu1 %v6085_v34 }
 0x33e   :  { %1903 = vmatprep.subr.bf16.mxu0 %v6094_v20  ;;  %1944 = vmatprep.subr.bf16.mxu1 %v6099_v29 }
 0x341   :  { %1904 = vmatpush1.bf16.msra.mxu0 %v6104_v8  ;;  %1945 = vmatpush1.bf16.msra.mxu1 %v6109_v23 }
 0x342   :  { %1905 = vmatprep.subr.bf16.mxu0 %v6116_v17  ;;  %1946 = vmatprep.subr.bf16.mxu1 %v6121_v27 }
 0x345   :  { %1906 = vmatpush1.bf16.msra.mxu0 %v6128_v19  ;;  %1947 = vmatpush1.bf16.msra.mxu1 %v6133_v7 }
 0x346   :  { %1907 = vmatprep.subr.bf16.mxu0 %v6140_v13  ;;  %1948 = vmatprep.subr.bf16.mxu1 %v6145_v14 }
 0x349   :  { %1908 = vmatpush1.bf16.msra.mxu0 %v6152_v26  ;;  %1949 = vmatpush1.bf16.msra.mxu1 %v6157_v12 }
 0x34a   :  { %1909 = vmatprep.subr.bf16.mxu0 %v6164_v28  ;;  %1950 = vmatprep.subr.bf16.mxu1 %v6169_v24 }
 0x34d   :  { %1910 = vmatpush1.bf16.msra.mxu0 %v6176_v18  ;;  %1951 = vmatpush1.bf16.msra.mxu1 %v6181_v35 }
 0x34e   :  { %1911 = vmatprep.subr.bf16.mxu0 %v6188_v44  ;;  %1952 = vmatprep.subr.bf16.mxu1 %v6193_v36 }
 0x351   :  { %1912 = vmatpush1.bf16.msra.mxu0 %v6200_v37  ;;  %1953 = vmatpush1.bf16.msra.mxu1 %v6205_v38 }
 0x352   :  { %2209 = vmatprep.subr.bf16.mxu0 %v6022_v62  ;;  %2250 = vmatprep.subr.bf16.mxu1 %v6027_v1 }
 0x3f3   :  { %v1619_v39 = vpop.f32.mrf.mxu0  ;;  %v1660_v40 = vpop.f32.mrf.mxu1 }
 0x3f4   :  { %v1667_v42 = vadd.f32 %v1619_v39, %v7248_v41  ;;  %v1669_v58 = vadd.f32 %v1660_v40, %v7251_v57 }
 0x3f5   :  { %v1621_v43 = vpop.f32.mrf.mxu0  ;;  %v1662_v45 = vpop.f32.mrf.mxu1 }
 0x3f6   :  { %v4666_v46 = vmul.f32 -1.442695, %v1667_v42  ;;  %v1668_v48 = vadd.f32 %v1621_v43, %v7249_v47  ;;  %v1670_v56 = vadd.f32 %v1662_v45, %v7250_v55 }
 0x3f7   :  { %v1623_v49 = vpop.f32.mrf.mxu0  ;;  %v1664_v50 = vpop.f32.mrf.mxu1 }
 0x3f8   :  { %5198 = vpow2.f32 %v4666_v46  ;;  %v4667_v51 = vmul.f32 -1.442695, %v1668_v48  ;;  %v4668_v59 = vmul.f32 -1.442695, %v1670_v56  ;;  %v7252_v48 = vld [vmem:[#allocation10_spill] sm:$0xff] }
 0x3f9   :  { %v1624_v52 = vpop.f32.mrf.mxu0  ;;  %v1665_v54 = vpop.f32.mrf.mxu1 }
 0x3fa   :  { %5200 = vpow2.f32 %v4667_v51  ;;  %v7253_v54 = vld [vmem:[#allocation12_spill] sm:$0xff] }
 0x3fb   :  { %5202 = vtanh.f32 %v1669_v58 }
 0x3fc   :  { %5204 = vpow2.f32 %v4668_v59 }
 0x405   :  { %v5199_v60 = vpop.eup %5198 }
 0x406   :  { %v1674_v61 = vadd.f32 1.0, %v5199_v60 }
 0x407   :  { %v5201_v63 = vpop.eup %5200 }
 0x408   :  { %5206 = vrcp.f32 %v1674_v61  ;;  %v1680_v0 = vadd.f32 1.0, %v5201_v63  ;;  %v5203_v2 = vpop.eup %5202  ;;  %v7254_v61 = vld [vmem:[#allocation13_spill] sm:$0xff] }
 0x409   :  { %v5205_v4 = vpop.eup %5204 }
 0x40a   :  { %5208 = vrcp.f32 %v1680_v0  ;;  %v1687_v39 = vadd.f32 1.0, %v5205_v4  ;;  %v7255_v0 = vld [vmem:[#allocation11_spill] sm:$0xff] }
 0x40c   :  { %5210 = vrcp.f32 %v1687_v39 }
 0x415   :  { %v5207_v5 = vpop.eup %5206 }
 0x416   :  { %v1691_v31 = vmul.f32 %v5207_v5, %v5203_v2 }
 0x417   :  { %v5209_v53 = vpop.eup %5208 }
 0x418   :  { %v1690_v41 = vmul.f32 %v5209_v53, %v6014_v3 }
 0x419   :  { %v5211_v40 = vpop.eup %5210 }
 0x41a   :  { %v6218_v42 = vadd.f32 %v1691_v31, %v1690_v41 }
 0x41c   :  { %5212 = vtanh.f32 %v6218_v42 }
 0x429   :  { %v5213_v43 = vpop.eup %5212 }
 0x42a   :  { %v1694_v45 = vmul.f32 %v5213_v43, %v5211_v40 }
 0x42c   :  { %v1695_v46 = vpack.c.bf16 %v1694_v45, %v1694_v45 }
 0x42e   :  { %1697 = vst [vmem:[#allocation3 + $0xc] sm:$0xf] %v1695_v46  ;;  %1930 = vmatmul.mubr.bf16.vlgmr.msra.gmra.mxu0 %v1695_v46  ;;  %1971 = vmatmul.mubr.bf16.vlgmr.msra.gmra.mxu1 %v1695_v46 }
 0x42f   :  { %2210 = vmatpush1.bf16.msra.mxu0 %v6032_v16  ;;  %2251 = vmatpush1.bf16.msra.mxu1 %v6037_v9 }
 0x430   :  { %2211 = vmatprep.subr.bf16.mxu0 %v6046_v22  ;;  %2252 = vmatprep.subr.bf16.mxu1 %v6051_v11 }
 0x431   :  { %2241 = vmatprep.mubr.bf16.mxu0 %v7246_v21  ;;  %2282 = vmatprep.mubr.bf16.mxu1 %v7246_v21 }
 0x433   :  { %2212 = vmatpush1.bf16.msra.mxu0 %v6056_v25  ;;  %2253 = vmatpush1.bf16.msra.mxu1 %v6061_v30 }
 0x434   :  { %2213 = vmatprep.subr.bf16.mxu0 %v6070_v10  ;;  %2254 = vmatprep.subr.bf16.mxu1 %v6075_v32 }
 0x437   :  { %2214 = vmatpush1.bf16.msra.mxu0 %v6080_v33  ;;  %2255 = vmatpush1.bf16.msra.mxu1 %v6085_v34 }
 0x438   :  { %2215 = vmatprep.subr.bf16.mxu0 %v6094_v20  ;;  %2256 = vmatprep.subr.bf16.mxu1 %v6099_v29 }
 0x43b   :  { %2216 = vmatpush1.bf16.msra.mxu0 %v6104_v8  ;;  %2257 = vmatpush1.bf16.msra.mxu1 %v6109_v23 }
 0x43c   :  { %2217 = vmatprep.subr.bf16.mxu0 %v6116_v17  ;;  %2258 = vmatprep.subr.bf16.mxu1 %v6121_v27 }
 0x43f   :  { %2218 = vmatpush1.bf16.msra.mxu0 %v6128_v19  ;;  %2259 = vmatpush1.bf16.msra.mxu1 %v6133_v7 }
 0x440   :  { %2219 = vmatprep.subr.bf16.mxu0 %v6140_v13  ;;  %2260 = vmatprep.subr.bf16.mxu1 %v6145_v14 }
 0x443   :  { %2220 = vmatpush1.bf16.msra.mxu0 %v6152_v26  ;;  %2261 = vmatpush1.bf16.msra.mxu1 %v6157_v12 }
 0x444   :  { %2221 = vmatprep.subr.bf16.mxu0 %v6164_v28  ;;  %2262 = vmatprep.subr.bf16.mxu1 %v6169_v24 }
 0x447   :  { %2222 = vmatpush1.bf16.msra.mxu0 %v6176_v18  ;;  %2263 = vmatpush1.bf16.msra.mxu1 %v6181_v35 }
 0x448   :  { %2223 = vmatprep.subr.bf16.mxu0 %v6188_v44  ;;  %2264 = vmatprep.subr.bf16.mxu1 %v6193_v36 }
 0x44b   :  { %2224 = vmatpush1.bf16.msra.mxu0 %v6200_v37  ;;  %2265 = vmatpush1.bf16.msra.mxu1 %v6205_v38 }
 0x44c   :  { %2521 = vmatprep.subr.bf16.mxu0 %v6022_v62  ;;  %2562 = vmatprep.subr.bf16.mxu1 %v6027_v1 }
 0x4ee   :  { %v1931_v3 = vpop.f32.mrf.mxu0  ;;  %v1972_v47 = vpop.f32.mrf.mxu1 }
 0x4ef   :  { %v1979_v49 = vadd.f32 %v1931_v3, %v7252_v48  ;;  %v1981_v2 = vadd.f32 %v1972_v47, %v7255_v0 }
 0x4f0   :  { %v1933_v50 = vpop.f32.mrf.mxu0  ;;  %v1974_v51 = vpop.f32.mrf.mxu1 }
 0x4f1   :  { %v4701_v52 = vmul.f32 -1.442695, %v1979_v49  ;;  %v1980_v55 = vadd.f32 %v1933_v50, %v7253_v54  ;;  %v1982_v63 = vadd.f32 %v1974_v51, %v7254_v61 }
 0x4f2   :  { %v1935_v56 = vpop.f32.mrf.mxu0  ;;  %v1976_v57 = vpop.f32.mrf.mxu1 }
 0x4f3   :  { %5214 = vpow2.f32 %v4701_v52  ;;  %v4702_v58 = vmul.f32 -1.442695, %v1980_v55  ;;  %v4703_v4 = vmul.f32 -1.442695, %v1982_v63  ;;  %v7256_v55 = vld [vmem:[#allocation14_spill] sm:$0xff] }
 0x4f4   :  { %v1936_v59 = vpop.f32.mrf.mxu0  ;;  %v1977_v60 = vpop.f32.mrf.mxu1 }
 0x4f5   :  { %5216 = vpow2.f32 %v4702_v58  ;;  %v7257_v60 = vld [vmem:[#allocation16_spill] sm:$0xff] }
 0x4f6   :  { %5218 = vtanh.f32 %v1981_v2 }
 0x4f7   :  { %5220 = vpow2.f32 %v4703_v4 }
 0x500   :  { %v5215_v5 = vpop.eup %5214 }
 0x501   :  { %v1986_v31 = vadd.f32 1.0, %v5215_v5 }
 0x502   :  { %v5217_v53 = vpop.eup %5216 }
 0x503   :  { %5222 = vrcp.f32 %v1986_v31  ;;  %v1992_v39 = vadd.f32 1.0, %v5217_v53  ;;  %v5219_v41 = vpop.eup %5218  ;;  %v7258_v31 = vld [vmem:[#allocation17_spill] sm:$0xff]  ;;  %v7259_v53 = vld [vmem:[#allocation15_spill] sm:$0xff] }
 0x504   :  { %v5221_v40 = vpop.eup %5220 }
 0x505   :  { %5224 = vrcp.f32 %v1992_v39  ;;  %v1999_v3 = vadd.f32 1.0, %v5221_v40 }
 0x507   :  { %5226 = vrcp.f32 %v1999_v3 }
 0x510   :  { %v5223_v43 = vpop.eup %5222 }
 0x511   :  { %v2003_v45 = vmul.f32 %v5223_v43, %v5219_v41 }
 0x512   :  { %v5225_v46 = vpop.eup %5224 }
 0x513   :  { %v2002_v48 = vmul.f32 %v5225_v46, %v6218_v42 }
 0x514   :  { %v5227_v47 = vpop.eup %5226 }
 0x515   :  { %v6260_v49 = vadd.f32 %v2003_v45, %v2002_v48 }
 0x517   :  { %5228 = vtanh.f32 %v6260_v49 }
 0x524   :  { %v5229_v50 = vpop.eup %5228 }
 0x525   :  { %v2006_v51 = vmul.f32 %v5229_v50, %v5227_v47 }
 0x527   :  { %v2007_v52 = vpack.c.bf16 %v2006_v51, %v2006_v51 }
 0x529   :  { %2009 = vst [vmem:[#allocation3 + $0x10] sm:$0xf] %v2007_v52  ;;  %2242 = vmatmul.mubr.bf16.vlgmr.msra.gmra.mxu0 %v2007_v52  ;;  %2283 = vmatmul.mubr.bf16.vlgmr.msra.gmra.mxu1 %v2007_v52 }
 0x52a   :  { %2522 = vmatpush1.bf16.msra.mxu0 %v6032_v16  ;;  %2563 = vmatpush1.bf16.msra.mxu1 %v6037_v9 }
 0x52b   :  { %2523 = vmatprep.subr.bf16.mxu0 %v6046_v22  ;;  %2564 = vmatprep.subr.bf16.mxu1 %v6051_v11 }
 0x52c   :  { %2553 = vmatprep.mubr.bf16.mxu0 %v7246_v21  ;;  %2594 = vmatprep.mubr.bf16.mxu1 %v7246_v21 }
 0x52e   :  { %2524 = vmatpush1.bf16.msra.mxu0 %v6056_v25  ;;  %2565 = vmatpush1.bf16.msra.mxu1 %v6061_v30 }
 0x52f   :  { %2525 = vmatprep.subr.bf16.mxu0 %v6070_v10  ;;  %2566 = vmatprep.subr.bf16.mxu1 %v6075_v32 }
 0x532   :  { %2526 = vmatpush1.bf16.msra.mxu0 %v6080_v33  ;;  %2567 = vmatpush1.bf16.msra.mxu1 %v6085_v34 }
 0x533   :  { %2527 = vmatprep.subr.bf16.mxu0 %v6094_v20  ;;  %2568 = vmatprep.subr.bf16.mxu1 %v6099_v29 }
 0x536   :  { %2528 = vmatpush1.bf16.msra.mxu0 %v6104_v8  ;;  %2569 = vmatpush1.bf16.msra.mxu1 %v6109_v23 }
 0x537   :  { %2529 = vmatprep.subr.bf16.mxu0 %v6116_v17  ;;  %2570 = vmatprep.subr.bf16.mxu1 %v6121_v27 }
 0x53a   :  { %2530 = vmatpush1.bf16.msra.mxu0 %v6128_v19  ;;  %2571 = vmatpush1.bf16.msra.mxu1 %v6133_v7 }
 0x53b   :  { %2531 = vmatprep.subr.bf16.mxu0 %v6140_v13  ;;  %2572 = vmatprep.subr.bf16.mxu1 %v6145_v14 }
 0x53e   :  { %2532 = vmatpush1.bf16.msra.mxu0 %v6152_v26  ;;  %2573 = vmatpush1.bf16.msra.mxu1 %v6157_v12 }
 0x53f   :  { %2533 = vmatprep.subr.bf16.mxu0 %v6164_v28  ;;  %2574 = vmatprep.subr.bf16.mxu1 %v6169_v24 }
 0x542   :  { %2534 = vmatpush1.bf16.msra.mxu0 %v6176_v18  ;;  %2575 = vmatpush1.bf16.msra.mxu1 %v6181_v35 }
 0x543   :  { %2535 = vmatprep.subr.bf16.mxu0 %v6188_v44  ;;  %2576 = vmatprep.subr.bf16.mxu1 %v6193_v36 }
 0x546   :  { %2536 = vmatpush1.bf16.msra.mxu0 %v6200_v37  ;;  %2577 = vmatpush1.bf16.msra.mxu1 %v6205_v38 }
 0x547   :  { %2833 = vmatprep.subr.bf16.mxu0 %v6022_v62  ;;  %2874 = vmatprep.subr.bf16.mxu1 %v6027_v1 }
 0x5e9   :  { %v2243_v42 = vpop.f32.mrf.mxu0  ;;  %v2284_v54 = vpop.f32.mrf.mxu1 }
 0x5ea   :  { %v2291_v56 = vadd.f32 %v2243_v42, %v7256_v55  ;;  %v2293_v1 = vadd.f32 %v2284_v54, %v7259_v53  ;;  %v5059_v53 = vld [vmem:[%s7214_s4 + $0xc8] ss:$16 sps:$4 sm:$0xff]  }
 0x5eb   :  { %v2245_v57 = vpop.f32.mrf.mxu0  ;;  %v2286_v58 = vpop.f32.mrf.mxu1 }
 0x5ec   :  { %v4736_v59 = vmul.f32 -1.442695, %v2291_v56  ;;  %v2292_v61 = vadd.f32 %v2245_v57, %v7257_v60  ;;  %v2294_v62 = vadd.f32 %v2286_v58, %v7258_v31  ;;  %v5061_v31 = vld [vmem:[%s7214_s4 + $0xcc] ss:$16 sps:$4 sm:$0xff]  }
 0x5ed   :  { %v2247_v63 = vpop.f32.mrf.mxu0  ;;  %v2288_v0 = vpop.f32.mrf.mxu1 }
 0x5ee   :  { %5230 = vpow2.f32 %v4736_v59  ;;  %v4737_v2 = vmul.f32 -1.442695, %v2292_v61  ;;  %v4738_v39 = vmul.f32 -1.442695, %v2294_v62  ;;  %v5050_v0 = vld [vmem:[%s7214_s4 + $0xe0] ss:$16 sps:$4 sm:$0xff]  }
 0x5ef   :  { %v2248_v4 = vpop.f32.mrf.mxu0  ;;  %v2289_v5 = vpop.f32.mrf.mxu1  ;;  %v5056_v62 = vld [vmem:[%s7214_s4 + $0xc0] ss:$16 sps:$4 sm:$0xff]  }
 0x5f0   :  { %5232 = vpow2.f32 %v4737_v2  ;;  %v5053_v2 = vld [vmem:[%s7214_s4 + $0xe8] ss:$16 sps:$4 sm:$0xff]   ;;  %v5058_v5 = vld [vmem:[%s7214_s4 + $0xc4] ss:$16 sps:$4 sm:$0xff]  }
 0x5f1   :  { %5234 = vtanh.f32 %v2293_v1  ;;  %v5064_v1 = vld [vmem:[%s7214_s4 + $0xa4] ss:$16 sps:$4 sm:$0xff]  }
 0x5f2   :  { %5236 = vpow2.f32 %v4738_v39  ;;  %v5067_v39 = vld [vmem:[%s7214_s4 + $0xac] ss:$16 sps:$4 sm:$0xff]  }
 0x5fb   :  { %v5231_v41 = vpop.eup %5230 }
 0x5fc   :  { %v2298_v40 = vadd.f32 1.0, %v5231_v41  ;;  %v5062_v41 = vld [vmem:[%s7214_s4 + $0xa0] ss:$16 sps:$4 sm:$0xff]  }
 0x5fd   :  { %v5233_v43 = vpop.eup %5232 }
 0x5fe   :  { %5238 = vrcp.f32 %v2298_v40  ;;  %v2304_v45 = vadd.f32 1.0, %v5233_v43  ;;  %v5235_v46 = vpop.eup %5234  ;;  %v5065_v40 = vld [vmem:[%s7214_s4 + $0xa8] ss:$16 sps:$4 sm:$0xff]   ;;  %v5070_v43 = vld [vmem:[%s7214_s4 + $0x84] ss:$16 sps:$4 sm:$0xff]  }
 0x5ff   :  { %v5237_v3 = vpop.eup %5236 }
 0x600   :  { %5240 = vrcp.f32 %v2304_v45  ;;  %v2311_v51 = vadd.f32 1.0, %v5237_v3  ;;  %v5073_v45 = vld [vmem:[%s7214_s4 + $0x8c] ss:$16 sps:$4 sm:$0xff]   ;;  %v5071_v3 = vld [vmem:[%s7214_s4 + $0x88] ss:$16 sps:$4 sm:$0xff]  }
 0x602   :  { %5242 = vrcp.f32 %v2311_v51  ;;  %v5077_v51 = vld [vmem:[%s7214_s4 + $0x68] ss:$16 sps:$4 sm:$0xff]  }
 0x60b   :  { %v5239_v48 = vpop.eup %5238 }
 0x60c   :  { %v2315_v47 = vmul.f32 %v5239_v48, %v5235_v46  ;;  %v5068_v46 = vld [vmem:[%s7214_s4 + $0x80] ss:$16 sps:$4 sm:$0xff]   ;;  %v5076_v48 = vld [vmem:[%s7214_s4 + $0x64] ss:$16 sps:$4 sm:$0xff]  }
 0x60d   :  { %v5241_v50 = vpop.eup %5240 }
 0x60e   :  { %v2314_v52 = vmul.f32 %v5241_v50, %v6260_v49  ;;  %v5074_v50 = vld [vmem:[%s7214_s4 + $0x60] ss:$16 sps:$4 sm:$0xff]  }
 0x60f   :  { %v5243_v54 = vpop.eup %5242 }
 0x610   :  { %v6302_v42 = vadd.f32 %v2315_v47, %v2314_v52  ;;  %v5079_v47 = vld [vmem:[%s7214_s4 + $0x6c] ss:$16 sps:$4 sm:$0xff]   ;;  %v5082_v52 = vld [vmem:[%s7214_s4 + $0x44] ss:$16 sps:$4 sm:$0xff]  }
 0x612   :  { %5244 = vtanh.f32 %v6302_v42 }
 0x61f   :  { %v5245_v55 = vpop.eup %5244 }
 0x620   :  { %v2318_v56 = vmul.f32 %v5245_v55, %v5243_v54  ;;  %v5080_v54 = vld [vmem:[%s7214_s4 + $0x40] ss:$16 sps:$4 sm:$0xff]   ;;  %v5083_v55 = vld [vmem:[%s7214_s4 + $0x48] ss:$16 sps:$4 sm:$0xff]  }
 0x622   :  { %v2319_v57 = vpack.c.bf16 %v2318_v56, %v2318_v56  ;;  %v5088_v56 = vld [vmem:[%s7214_s4 + $0x24] ss:$16 sps:$4 sm:$0xff]  }
 0x624   :  { %2321 = vst [vmem:[#allocation3 + $0x14] sm:$0xf] %v2319_v57  ;;  %2554 = vmatmul.mubr.bf16.vlgmr.msra.gmra.mxu0 %v2319_v57  ;;  %2595 = vmatmul.mubr.bf16.vlgmr.msra.gmra.mxu1 %v2319_v57  ;;  %v5091_v57 = vld [vmem:[%s7214_s4 + $0x2c] ss:$16 sps:$4 sm:$0xff]  }
 0x625   :  { %2834 = vmatpush1.bf16.msra.mxu0 %v6032_v16  ;;  %2875 = vmatpush1.bf16.msra.mxu1 %v6037_v9  ;;  %v5052_v16 = vld [vmem:[%s7214_s4 + $0xe4] ss:$16 sps:$4 sm:$0xff]   ;;  %v5055_v9 = vld [vmem:[%s7214_s4 + $0xec] ss:$16 sps:$4 sm:$0xff]  }
 0x626   :  { %2835 = vmatprep.subr.bf16.mxu0 %v6046_v22  ;;  %2876 = vmatprep.subr.bf16.mxu1 %v6051_v11 }
 0x627   :  { %2865 = vmatprep.mubr.bf16.mxu0 %v7246_v21  ;;  %2906 = vmatprep.mubr.bf16.mxu1 %v7246_v21 }
 0x629   :  { %2836 = vmatpush1.bf16.msra.mxu0 %v6056_v25  ;;  %2877 = vmatpush1.bf16.msra.mxu1 %v6061_v30  ;;  %v7260_v25 = vld [vmem:[#allocation18_spill] sm:$0xff] }
 0x62a   :  { %2837 = vmatprep.subr.bf16.mxu0 %v6070_v10  ;;  %2878 = vmatprep.subr.bf16.mxu1 %v6075_v32 }
 0x62d   :  { %2838 = vmatpush1.bf16.msra.mxu0 %v6080_v33  ;;  %2879 = vmatpush1.bf16.msra.mxu1 %v6085_v34  ;;  %v7261_v34 = vld [vmem:[#allocation20_spill] sm:$0xff] }
 0x62e   :  { %2839 = vmatprep.subr.bf16.mxu0 %v6094_v20  ;;  %2880 = vmatprep.subr.bf16.mxu1 %v6099_v29 }
 0x631   :  { %2840 = vmatpush1.bf16.msra.mxu0 %v6104_v8  ;;  %2881 = vmatpush1.bf16.msra.mxu1 %v6109_v23 }
 0x632   :  { %2841 = vmatprep.subr.bf16.mxu0 %v6116_v17  ;;  %2882 = vmatprep.subr.bf16.mxu1 %v6121_v27 }
 0x635   :  { %2842 = vmatpush1.bf16.msra.mxu0 %v6128_v19  ;;  %2883 = vmatpush1.bf16.msra.mxu1 %v6133_v7  ;;  %v7262_v19 = vld [vmem:[#allocation21_spill] sm:$0xff] }
 0x636   :  { %2843 = vmatprep.subr.bf16.mxu0 %v6140_v13  ;;  %2884 = vmatprep.subr.bf16.mxu1 %v6145_v14  ;;  %v7263_v13 = vld [vmem:[#allocation19_spill] sm:$0xff] }
 0x639   :  { %2844 = vmatpush1.bf16.msra.mxu0 %v6152_v26  ;;  %2885 = vmatpush1.bf16.msra.mxu1 %v6157_v12 }
 0x63a   :  { %2845 = vmatprep.subr.bf16.mxu0 %v6164_v28  ;;  %2886 = vmatprep.subr.bf16.mxu1 %v6169_v24 }
 0x63d   :  { %2846 = vmatpush1.bf16.msra.mxu0 %v6176_v18  ;;  %2887 = vmatpush1.bf16.msra.mxu1 %v6181_v35 }
 0x63e   :  { %2847 = vmatprep.subr.bf16.mxu0 %v6188_v44  ;;  %2888 = vmatprep.subr.bf16.mxu1 %v6193_v36 }
 0x641   :  { %2848 = vmatpush1.bf16.msra.mxu0 %v6200_v37  ;;  %2889 = vmatpush1.bf16.msra.mxu1 %v6205_v38 }
 0x642   :  { %3192 = vmatprep.subr.bf16.mxu0 %v5052_v16  ;;  %3265 = vmatprep.subr.bf16.mxu1 %v5055_v9  ;;  %v5086_v16 = vld [vmem:[%s7214_s4 + $0x20] ss:$16 sps:$4 sm:$0xff]   ;;  %v5089_v9 = vld [vmem:[%s7214_s4 + $0x28] ss:$16 sps:$4 sm:$0xff]  }
 0x6e4   :  { %v2555_v22 = vpop.f32.mrf.mxu0  ;;  %v2596_v11 = vpop.f32.mrf.mxu1 }
 0x6e5   :  { %v2603_v30 = vadd.f32 %v2555_v22, %v7260_v25  ;;  %v2605_v14 = vadd.f32 %v2596_v11, %v7263_v13  ;;  %v5094_v22 = vld [vmem:[%s7214_s4 + $0x4] ss:$16 sps:$4 sm:$0xff]   ;;  %v5097_v11 = vld [vmem:[%s7214_s4 + $0xc] ss:$16 sps:$4 sm:$0xff]   ;;  %v5092_v25 = vld [vmem:[%s7214_s4] ss:$16 sps:$4 sm:$0xff]  }
 0x6e6   :  { %v2557_v10 = vpop.f32.mrf.mxu0  ;;  %v2598_v32 = vpop.f32.mrf.mxu1  ;;  %v6505_v13 = vld [vmem:[%s7215_s5 + $0xac] ss:$16 sps:$4 sm:$0xff]  }
 0x6e7   :  { %v4771_v33 = vmul.f32 -1.442695, %v2603_v30  ;;  %v2604_v20 = vadd.f32 %v2557_v10, %v7261_v34  ;;  %v2606_v7 = vadd.f32 %v2598_v32, %v7262_v19  ;;  %v5095_v30 = vld [vmem:[%s7214_s4 + $0x8] ss:$16 sps:$4 sm:$0xff]   ;;  %v5098_v10 = vld [vmem:[#allocation3] sm:$0xff]  }
 0x6e8   :  { %v2559_v29 = vpop.f32.mrf.mxu0  ;;  %v2600_v8 = vpop.f32.mrf.mxu1  ;;  %v5099_v32 = vld [vmem:[#allocation3 + $0x8] sm:$0xff]   ;;  %v6452_v34 = vld [vmem:[%s7215_s5 + $0xe4] ss:$16 sps:$4 sm:$0xff]  }
 0x6e9   :  { %5246 = vpow2.f32 %v4771_v33  ;;  %v4772_v23 = vmul.f32 -1.442695, %v2604_v20  ;;  %v4773_v26 = vmul.f32 -1.442695, %v2606_v7  ;;  %v5100_v33 = vld [vmem:[#allocation3 + $0x10] sm:$0xff]  }
 0x6ea   :  { %v2560_v17 = vpop.f32.mrf.mxu0  ;;  %v2601_v27 = vpop.f32.mrf.mxu1  ;;  %v6457_v20 = vld [vmem:[%s7215_s5 + $0xec] ss:$16 sps:$4 sm:$0xff]   ;;  %v6463_v29 = vld [vmem:[%s7215_s5 + $0xe0] ss:$16 sps:$4 sm:$0xff]   ;;  %v6468_v8 = vld [vmem:[%s7215_s5 + $0xe8] ss:$16 sps:$4 sm:$0xff]  }
 0x6eb   :  { %5248 = vpow2.f32 %v4772_v23  ;;  %v6476_v23 = vld [vmem:[%s7215_s5 + $0xc4] ss:$16 sps:$4 sm:$0xff]   ;;  %v6481_v17 = vld [vmem:[%s7215_s5 + $0xcc] ss:$16 sps:$4 sm:$0xff]   ;;  %v6486_v27 = vld [vmem:[%s7215_s5 + $0xc0] ss:$16 sps:$4 sm:$0xff]  }
 0x6ec   :  { %5250 = vtanh.f32 %v2605_v14  ;;  %v6491_v19 = vld [vmem:[%s7215_s5 + $0xc8] ss:$16 sps:$4 sm:$0xff]   ;;  %v6500_v7 = vld [vmem:[%s7215_s5 + $0xa4] ss:$16 sps:$4 sm:$0xff]   ;;  %v6510_v14 = vld [vmem:[%s7215_s5 + $0xa0] ss:$16 sps:$4 sm:$0xff]  }
 0x6ed   :  { %5252 = vpow2.f32 %v4773_v26  ;;  %v6515_v26 = vld [vmem:[%s7215_s5 + $0xa8] ss:$16 sps:$4 sm:$0xff]  }
 0x6f6   :  { %v5247_v12 = vpop.eup %5246 }
 0x6f7   :  { %v2610_v28 = vadd.f32 1.0, %v5247_v12  ;;  %v6524_v12 = vld [vmem:[%s7215_s5 + $0x84] ss:$16 sps:$4 sm:$0xff]  }
 0x6f8   :  { %v5249_v24 = vpop.eup %5248 }
 0x6f9   :  { %5254 = vrcp.f32 %v2610_v28  ;;  %v2616_v18 = vadd.f32 1.0, %v5249_v24  ;;  %v5251_v35 = vpop.eup %5250  ;;  %v6529_v28 = vld [vmem:[%s7215_s5 + $0x8c] ss:$16 sps:$4 sm:$0xff]   ;;  %v6534_v24 = vld [vmem:[%s7215_s5 + $0x80] ss:$16 sps:$4 sm:$0xff]  }
 0x6fa   :  { %v5253_v44 = vpop.eup %5252 }
 0x6fb   :  { %5256 = vrcp.f32 %v2616_v18  ;;  %v2623_v49 = vadd.f32 1.0, %v5253_v44  ;;  %v6539_v18 = vld [vmem:[%s7215_s5 + $0x88] ss:$16 sps:$4 sm:$0xff]   ;;  %v6553_v44 = vld [vmem:[%s7215_s5 + $0x6c] ss:$16 sps:$4 sm:$0xff]  }
 0x6fd   :  { %5258 = vrcp.f32 %v2623_v49  ;;  %v6573_v49 = vld [vmem:[%s7215_s5 + $0x4c] ss:$16 sps:$4 sm:$0xff]  }
 0x706   :  { %v5255_v36 = vpop.eup %5254 }
 0x707   :  { %v2627_v37 = vmul.f32 %v5255_v36, %v5251_v35  ;;  %v6548_v35 = vld [vmem:[%s7215_s5 + $0x64] ss:$16 sps:$4 sm:$0xff]   ;;  %v6558_v36 = vld [vmem:[%s7215_s5 + $0x60] ss:$16 sps:$4 sm:$0xff]  }
 0x708   :  { %v5257_v38 = vpop.eup %5256 }
 0x709   :  { %v2626_v58 = vmul.f32 %v5257_v38, %v6302_v42  ;;  %v5085_v42 = vld [vmem:[%s7214_s4 + $0x4c] ss:$16 sps:$4 sm:$0xff]   ;;  %v6568_v38 = vld [vmem:[%s7215_s5 + $0x44] ss:$16 sps:$4 sm:$0xff]  }
 0x70a   :  { %v5259_v60 = vpop.eup %5258 }
 0x70b   :  { %v6348_v59 = vadd.f32 %v2627_v37, %v2626_v58  ;;  %v6563_v37 = vld [vmem:[%s7215_s5 + $0x68] ss:$16 sps:$4 sm:$0xff]   ;;  %v6582_v58 = vld [vmem:[%s7215_s5 + $0x40] ss:$16 sps:$4 sm:$0xff]  }
 0x70d   :  { %5260 = vtanh.f32 %v6348_v59 }
 0x71a   :  { %v5261_v61 = vpop.eup %5260 }
 0x71b   :  { %v2630_v63 = vmul.f32 %v5261_v61, %v5259_v60  ;;  %v6587_v60 = vld [vmem:[%s7215_s5 + $0x48] ss:$16 sps:$4 sm:$0xff]   ;;  %v6596_v61 = vld [vmem:[%s7215_s5 + $0x24] ss:$16 sps:$4 sm:$0xff]  }
 0x71d   :  { %v2631_v4 = vpack.c.bf16 %v2630_v63, %v2630_v63  ;;  %v6601_v63 = vld [vmem:[%s7215_s5 + $0x2c] ss:$16 sps:$4 sm:$0xff]  }
 0x71f   :  { %2633 = vst [vmem:[#allocation3 + $0x18] sm:$0xf] %v2631_v4  ;;  %2866 = vmatmul.mubr.bf16.vlgmr.msra.gmra.mxu0 %v2631_v4  ;;  %2907 = vmatmul.mubr.bf16.vlgmr.msra.gmra.mxu1 %v2631_v4  ;;  %v6616_v4 = vld [vmem:[%s7215_s5 + $0x4] ss:$16 sps:$4 sm:$0xff]  }
 0x720   :  { %3193 = vmatpush1.bf16.msra.mxu0 %v5050_v0  ;;  %3266 = vmatpush1.bf16.msra.mxu1 %v5053_v2  ;;  %v6606_v0 = vld [vmem:[%s7215_s5 + $0x20] ss:$16 sps:$4 sm:$0xff]   ;;  %v6611_v2 = vld [vmem:[%s7215_s5 + $0x28] ss:$16 sps:$4 sm:$0xff]  }
 0x721   :  { %3194 = vmatprep.subr.bf16.mxu0 %v5058_v5  ;;  %3267 = vmatprep.subr.bf16.mxu1 %v5061_v31  ;;  %v6623_v5 = vld [vmem:[%s7215_s5 + $0xc] ss:$16 sps:$4 sm:$0xff]   ;;  %v6630_v31 = vld [vmem:[%s7215_s5] ss:$16 sps:$4 sm:$0xff]  }
 0x722   :  { %3224 = vmatprep.mubr.bf16.mxu0 %v7246_v21  ;;  %3297 = vmatprep.mubr.bf16.mxu1 %v7246_v21 }
 0x724   :  { %3195 = vmatpush1.bf16.msra.mxu0 %v5056_v62  ;;  %3268 = vmatpush1.bf16.msra.mxu1 %v5059_v53  ;;  %v6635_v62 = vld [vmem:[%s7215_s5 + $0x8] ss:$16 sps:$4 sm:$0xff]  }
 0x725   :  { %3196 = vmatprep.subr.bf16.mxu0 %v5064_v1  ;;  %3269 = vmatprep.subr.bf16.mxu1 %v5067_v39  ;;  %v7264_v39 = vld [vmem:[#allocation22_spill] sm:$0xff] }
 0x728   :  { %3197 = vmatpush1.bf16.msra.mxu0 %v5062_v41  ;;  %3270 = vmatpush1.bf16.msra.mxu1 %v5065_v40 }
 0x729   :  { %3198 = vmatprep.subr.bf16.mxu0 %v5070_v43  ;;  %3271 = vmatprep.subr.bf16.mxu1 %v5073_v45 }
 0x72c   :  { %3199 = vmatpush1.bf16.msra.mxu0 %v5068_v46  ;;  %3272 = vmatpush1.bf16.msra.mxu1 %v5071_v3 }
 0x72d   :  { %3200 = vmatprep.subr.bf16.mxu0 %v5076_v48  ;;  %3273 = vmatprep.subr.bf16.mxu1 %v5079_v47 }
 0x730   :  { %3201 = vmatpush1.bf16.msra.mxu0 %v5074_v50  ;;  %3274 = vmatpush1.bf16.msra.mxu1 %v5077_v51 }
 0x731   :  { %3202 = vmatprep.subr.bf16.mxu0 %v5082_v52  ;;  %3275 = vmatprep.subr.bf16.mxu1 %v5085_v42  ;;  %v7265_v42 = vld [vmem:[#allocation23_spill] sm:$0xff] }
 0x734   :  { %3203 = vmatpush1.bf16.msra.mxu0 %v5080_v54  ;;  %3276 = vmatpush1.bf16.msra.mxu1 %v5083_v55 }
 0x735   :  { %3204 = vmatprep.subr.bf16.mxu0 %v5088_v56  ;;  %3277 = vmatprep.subr.bf16.mxu1 %v5091_v57 }
 0x738   :  { %3205 = vmatpush1.bf16.msra.mxu0 %v5086_v16  ;;  %3278 = vmatpush1.bf16.msra.mxu1 %v5089_v9 }
 0x739   :  { %3206 = vmatprep.subr.bf16.mxu0 %v5094_v22  ;;  %3279 = vmatprep.subr.bf16.mxu1 %v5097_v11 }
 0x73c   :  { %3207 = vmatpush1.bf16.msra.mxu0 %v5092_v25  ;;  %3280 = vmatpush1.bf16.msra.mxu1 %v5095_v30 }
 0x73d   :  { %3566 = vmatprep.subr.bf16.mxu0 %v6452_v34  ;;  %3607 = vmatprep.subr.bf16.mxu1 %v6457_v20 }
 0x73f   :  { %3225 = vmatmul.mubr.bf16.vlgmr.msra.gmra.mxu0 %v5098_v10  ;;  %3298 = vmatmul.mubr.bf16.vlgmr.msra.gmra.mxu1 %v5098_v10 }
 0x740   :  { %3234 = vmatprep.mubr.bf16.mxu0 %v7246_v21  ;;  %3307 = vmatprep.mubr.bf16.mxu1 %v7246_v21 }
 0x741   :  { %3567 = vmatpush1.bf16.msra.mxu0 %v6463_v29  ;;  %3608 = vmatpush1.bf16.msra.mxu1 %v6468_v8 }
 0x742   :  { %3568 = vmatprep.subr.bf16.mxu0 %v6476_v23  ;;  %3609 = vmatprep.subr.bf16.mxu1 %v6481_v17 }
 0x745   :  { %3569 = vmatpush1.bf16.msra.mxu0 %v6486_v27  ;;  %3610 = vmatpush1.bf16.msra.mxu1 %v6491_v19 }
 0x746   :  { %3570 = vmatprep.subr.bf16.mxu0 %v6500_v7  ;;  %3611 = vmatprep.subr.bf16.mxu1 %v6505_v13 }
 0x747   :  { %3235 = vmatmul.mubr.bf16.gmra.mxu0 %v5099_v32  ;;  %3308 = vmatmul.mubr.bf16.gmra.mxu1 %v5099_v32 }
 0x748   :  { %3244 = vmatprep.mubr.bf16.mxu0 %v7246_v21  ;;  %3317 = vmatprep.mubr.bf16.mxu1 %v7246_v21 }
 0x749   :  { %3571 = vmatpush1.bf16.msra.mxu0 %v6510_v14  ;;  %3612 = vmatpush1.bf16.msra.mxu1 %v6515_v26 }
 0x74a   :  { %3572 = vmatprep.subr.bf16.mxu0 %v6524_v12  ;;  %3613 = vmatprep.subr.bf16.mxu1 %v6529_v28 }
 0x74d   :  { %3573 = vmatpush1.bf16.msra.mxu0 %v6534_v24  ;;  %3614 = vmatpush1.bf16.msra.mxu1 %v6539_v18 }
 0x74e   :  { %3574 = vmatprep.subr.bf16.mxu0 %v6548_v35  ;;  %3615 = vmatprep.subr.bf16.mxu1 %v6553_v44 }
 0x74f   :  { %3245 = vmatmul.mubr.bf16.gmra.mxu0 %v5100_v33  ;;  %3318 = vmatmul.mubr.bf16.gmra.mxu1 %v5100_v33 }
 0x750   :  { %3254 = vmatprep.mubr.bf16.mxu0 %v7246_v21  ;;  %3327 = vmatprep.mubr.bf16.mxu1 %v7246_v21 }
 0x751   :  { %3575 = vmatpush1.bf16.msra.mxu0 %v6558_v36  ;;  %3616 = vmatpush1.bf16.msra.mxu1 %v6563_v37 }
 0x752   :  { %3576 = vmatprep.subr.bf16.mxu0 %v6568_v38  ;;  %3617 = vmatprep.subr.bf16.mxu1 %v6573_v49 }
 0x755   :  { %3577 = vmatpush1.bf16.msra.mxu0 %v6582_v58  ;;  %3618 = vmatpush1.bf16.msra.mxu1 %v6587_v60 }
 0x756   :  { %3578 = vmatprep.subr.bf16.mxu0 %v6596_v61  ;;  %3619 = vmatprep.subr.bf16.mxu1 %v6601_v63 }
 0x759   :  { %3579 = vmatpush1.bf16.msra.mxu0 %v6606_v0  ;;  %3620 = vmatpush1.bf16.msra.mxu1 %v6611_v2 }
 0x75a   :  { %3580 = vmatprep.subr.bf16.mxu0 %v6616_v4  ;;  %3621 = vmatprep.subr.bf16.mxu1 %v6623_v5 }
 0x75d   :  { %3581 = vmatpush1.bf16.msra.mxu0 %v6630_v31  ;;  %3622 = vmatpush1.bf16.msra.mxu1 %v6635_v62 }
 0x75e   :  { %3681 = vmatprep.subr.bf16.mxu0 %v6452_v34  ;;  %3722 = vmatprep.subr.bf16.mxu1 %v6457_v20 }
 0x7df   :  { %v2867_v53 = vpop.f32.mrf.mxu0  ;;  %v2908_v1 = vpop.f32.mrf.mxu1 }
 0x7e0   :  { %v2915_v41 = vadd.f32 %v2867_v53, %v7264_v39  ;;  %v2917_v54 = vadd.f32 %v2908_v1, %v7265_v42 }
 0x7e1   :  { %v2869_v40 = vpop.f32.mrf.mxu0  ;;  %v2910_v43 = vpop.f32.mrf.mxu1 }
 0x7e2   :  { %v4806_v45 = vmul.f32 -1.442695, %v2915_v41  ;;  %v2916_v46 = vadd.f32 %v2869_v40, %v5922_v15  ;;  %v2918_v52 = vadd.f32 %v2910_v43, %v5925_v6 }
 0x7e3   :  { %v2871_v3 = vpop.f32.mrf.mxu0  ;;  %v2912_v48 = vpop.f32.mrf.mxu1 }
 0x7e4   :  { %5262 = vpow2.f32 %v4806_v45  ;;  %v4807_v47 = vmul.f32 -1.442695, %v2916_v46  ;;  %v4808_v55 = vmul.f32 -1.442695, %v2918_v52 }
 0x7e5   :  { %v2872_v50 = vpop.f32.mrf.mxu0  ;;  %v2913_v51 = vpop.f32.mrf.mxu1 }
 0x7e6   :  { %5264 = vpow2.f32 %v4807_v47 }
 0x7e7   :  { %5266 = vtanh.f32 %v2917_v54 }
 0x7e8   :  { %5268 = vpow2.f32 %v4808_v55 }
 0x7f1   :  { %v5263_v56 = vpop.eup %5262 }
 0x7f2   :  { %v2922_v57 = vadd.f32 1.0, %v5263_v56 }
 0x7f3   :  { %v5265_v16 = vpop.eup %5264 }
 0x7f4   :  { %5270 = vrcp.f32 %v2922_v57  ;;  %v2928_v9 = vadd.f32 1.0, %v5265_v16  ;;  %v5267_v15 = vpop.eup %5266 }
 0x7f5   :  { %v5269_v22 = vpop.eup %5268 }
 0x7f6   :  { %5272 = vrcp.f32 %v2928_v9  ;;  %v2935_v10 = vadd.f32 1.0, %v5269_v22 }
 0x7f8   :  { %5274 = vrcp.f32 %v2935_v10 }
 0x7ff   :  { %v3299_v40 = vpop.f32.mrf.mxu1 }
 0x801   :  { %v5271_v11 = vpop.eup %5270  ;;  %v3301_v45 = vpop.f32.mrf.mxu1 }
 0x802   :  { %v2939_v25 = vmul.f32 %v5271_v11, %v5267_v15 }
 0x803   :  { %v5273_v30 = vpop.eup %5272  ;;  %v6688_v3 = vpop.f32.mrf.mxu1 }
 0x804   :  { %v2938_v32 = vmul.f32 %v5273_v30, %v6348_v59  ;;  %v3226_v59 = vpop.f32.mrf.mxu0 }
 0x805   :  { %v5275_v33 = vpop.eup %5274  ;;  %v6692_v47 = vpop.f32.mrf.mxu1 }
 0x806   :  { %v2940_v6 = vadd.f32 %v2939_v25, %v2938_v32  ;;  %v3228_v43 = vpop.f32.mrf.mxu0  ;;  %v2986_v32 = vld [vmem:[%s7216_s6] sm:$0xf] }
 0x807   :  { %v6696_v51 = vpop.f32.mrf.mxu1 }
 0x808   :  { %5276 = vtanh.f32 %v2940_v6  ;;  %v6686_v46 = vpop.f32.mrf.mxu0  ;;  %7266 = vst [vmem:[#allocation5_spill] sm:$0xff] %v6696_v51 }
 0x809   :  { %v6700_v42 = vpop.f32.mrf.mxu1 }
 0x80a   :  { %v6690_v48 = vpop.f32.mrf.mxu0 }
 0x80b   :  { %v6704_v55 = vpop.f32.mrf.mxu1 }
 0x80c   :  { %v6694_v50 = vpop.f32.mrf.mxu0  ;;  %7268 = vst [vmem:[#allocation8_spill] sm:$0xff] %v6704_v55 }
 0x80d   :  { %v6708_v57 = vpop.f32.mrf.mxu1 }
 0x80e   :  { %v6698_v52 = vpop.f32.mrf.mxu0  ;;  %7270 = vst [vmem:[#allocation7_spill] sm:$0xff] %v6708_v57 }
 0x80f   :  { %v6712_v9 = vpop.f32.mrf.mxu1 }
 0x810   :  { %v6702_v54 = vpop.f32.mrf.mxu0  ;;  %7272 = vst [vmem:[#allocation12_spill] sm:$0xff] %v6712_v9 }
 0x811   :  { %7267 = vst [vmem:[#allocation6_spill] sm:$0xff] %v6702_v54  ;;  %v6716_v22 = vpop.f32.mrf.mxu1 }
 0x812   :  { %v6706_v56 = vpop.f32.mrf.mxu0  ;;  %7274 = vst [vmem:[#allocation11_spill] sm:$0xff] %v6716_v22 }
 0x813   :  { %7269 = vst [vmem:[#allocation9_spill] sm:$0xff] %v6706_v56  ;;  %v6720_v25 = vpop.f32.mrf.mxu1 }
 0x814   :  { %v6710_v16 = vpop.f32.mrf.mxu0  ;;  %7276 = vst [vmem:[#allocation16_spill] sm:$0xff] %v6720_v25 }
 0x815   :  { %v5277_v53 = vpop.eup %5276  ;;  %7271 = vst [vmem:[#allocation10_spill] sm:$0xff] %v6710_v16  ;;  %v6724_v10 = vpop.f32.mrf.mxu1 }
 0x816   :  { %v2942_v1 = vmul.f32 %v5277_v53, %v5275_v33  ;;  %v6714_v15 = vpop.f32.mrf.mxu0  ;;  %7278 = vst [vmem:[#allocation15_spill] sm:$0xff] %v6724_v10 }
 0x817   :  { %7273 = vst [vmem:[#allocation13_spill] sm:$0xff] %v6714_v15 }
 0x818   :  { %v2943_v39 = vpack.c.bf16 %v2942_v1, %v2942_v1  ;;  %v6718_v11 = vpop.f32.mrf.mxu0 }
 0x819   :  { %7275 = vst [vmem:[#allocation14_spill] sm:$0xff] %v6718_v11 }
 0x81a   :  { %2945 = vst [vmem:[#allocation3 + $0x1c] sm:$0xf] %v2943_v39  ;;  %v6722_v30 = vpop.f32.mrf.mxu0  ;;  %v7283_v39 = vld [vmem:[#allocation4_spill] sm:$0xff] }
 0x81b   :  { %7277 = vst [vmem:[#allocation17_spill] sm:$0xff] %v6722_v30  ;;  %v7287_v10 = vsub.s32 1, %v7283_v39  ;;  %v7290_v54 = vsub.s32 3, %v7283_v39 }
 0x81d   :  { %v6747_v9 = vrot.slane %v2986_v32, %v7287_v10 }
 0x81f   :  { %v3229_v15 = vadd.f32 %v3228_v43, %v6747_v9  ;;  %v7291_v43 = vsub.s32 2, %v7283_v39 }
 0x821   :  { %v5137_v41 = vld [vmem:[#allocation3 + $0x18] sm:$0xff]  }
 0x822   :  { %3255 = vmatmul.mubr.bf16.gmra.mxu0 %v5137_v41  ;;  %3328 = vmatmul.mubr.bf16.gmra.mxu1 %v5137_v41  ;;  %v7284_v41 = vsub.s32 0, %v7283_v39 }
 0x823   :  { %3598 = vmatprep.mubr.bf16.mxu0 %v7246_v21  ;;  %3639 = vmatprep.mubr.bf16.mxu1 %v7246_v21 }
 0x824   :  { %v6739_v11 = vrot.slane %v2986_v32, %v7284_v41 }
 0x82a   :  { %3599 = vmatmul.mubr.bf16.vlgmr.msra.gmra.mxu0 %v7246_v21  ;;  %3640 = vmatmul.mubr.bf16.vlgmr.msra.gmra.mxu1 %v7246_v21 }
 0x82b   :  { %3682 = vmatpush1.bf16.msra.mxu0 %v6463_v29  ;;  %3723 = vmatpush1.bf16.msra.mxu1 %v6468_v8 }
 0x82c   :  { %3683 = vmatprep.subr.bf16.mxu0 %v6476_v23  ;;  %3724 = vmatprep.subr.bf16.mxu1 %v6481_v17 }
 0x82d   :  { %3713 = vmatprep.mubr.bf16.mxu0 %v7246_v21  ;;  %3754 = vmatprep.mubr.bf16.mxu1 %v7246_v21 }
 0x82f   :  { %3684 = vmatpush1.bf16.msra.mxu0 %v6486_v27  ;;  %3725 = vmatpush1.bf16.msra.mxu1 %v6491_v19 }
 0x830   :  { %3685 = vmatprep.subr.bf16.mxu0 %v6500_v7  ;;  %3726 = vmatprep.subr.bf16.mxu1 %v6505_v13 }
 0x833   :  { %3686 = vmatpush1.bf16.msra.mxu0 %v6510_v14  ;;  %3727 = vmatpush1.bf16.msra.mxu1 %v6515_v26 }
 0x834   :  { %3687 = vmatprep.subr.bf16.mxu0 %v6524_v12  ;;  %3728 = vmatprep.subr.bf16.mxu1 %v6529_v28 }
 0x837   :  { %3688 = vmatpush1.bf16.msra.mxu0 %v6534_v24  ;;  %3729 = vmatpush1.bf16.msra.mxu1 %v6539_v18 }
 0x838   :  { %3689 = vmatprep.subr.bf16.mxu0 %v6548_v35  ;;  %3730 = vmatprep.subr.bf16.mxu1 %v6553_v44 }
 0x83b   :  { %3690 = vmatpush1.bf16.msra.mxu0 %v6558_v36  ;;  %3731 = vmatpush1.bf16.msra.mxu1 %v6563_v37 }
 0x83c   :  { %3691 = vmatprep.subr.bf16.mxu0 %v6568_v38  ;;  %3732 = vmatprep.subr.bf16.mxu1 %v6573_v49 }
 0x83f   :  { %3692 = vmatpush1.bf16.msra.mxu0 %v6582_v58  ;;  %3733 = vmatpush1.bf16.msra.mxu1 %v6587_v60 }
 0x840   :  { %3693 = vmatprep.subr.bf16.mxu0 %v6596_v61  ;;  %3734 = vmatprep.subr.bf16.mxu1 %v6601_v63 }
 0x843   :  { %3694 = vmatpush1.bf16.msra.mxu0 %v6606_v0  ;;  %3735 = vmatpush1.bf16.msra.mxu1 %v6611_v2 }
 0x844   :  { %3695 = vmatprep.subr.bf16.mxu0 %v6616_v4  ;;  %3736 = vmatprep.subr.bf16.mxu1 %v6623_v5 }
 0x847   :  { %3696 = vmatpush1.bf16.msra.mxu0 %v6630_v31  ;;  %3737 = vmatpush1.bf16.msra.mxu1 %v6635_v62 }
 0x848   :  { %3796 = vmatprep.subr.bf16.mxu0 %v6452_v34  ;;  %3837 = vmatprep.subr.bf16.mxu1 %v6457_v20 }
 0x8e2   :  { %v6729_v6 = vpop.f32.mrf.mxu0  ;;  %v6731_v33 = vpop.f32.mrf.mxu1 }
 0x8e3   :  { %7279 = vst [vmem:[#allocation18_spill] sm:$0xff] %v6729_v6  ;;  %7280 = vst [vmem:[#allocation20_spill] sm:$0xff] %v6731_v33  ;;  %v3227_v33 = vadd.f32 %v3226_v59, %v6739_v11 }
 0x8e4   :  { %v6733_v53 = vpop.f32.mrf.mxu0  ;;  %v6735_v1 = vpop.f32.mrf.mxu1 }
 0x8e5   :  { %7281 = vst [vmem:[#allocation21_spill] sm:$0xff] %v6733_v53  ;;  %7282 = vst [vmem:[#allocation19_spill] sm:$0xff] %v6735_v1 }
 0x8e6   :  { %v6741_v25 = vpop.f32.mrf.mxu0  ;;  %v6743_v30 = vpop.f32.mrf.mxu1 }
 0x8e7   :  { %7285 = vst [vmem:[#allocation22_spill] sm:$0xff] %v6741_v25  ;;  %7286 = vst [vmem:[#allocation23_spill] sm:$0xff] %v6743_v30 }
 0x8e8   :  { %v6749_v22 = vpop.f32.mrf.mxu0  ;;  %v6751_v6 = vpop.f32.mrf.mxu1 }
 0x8e9   :  { %7288 = vst [vmem:[#allocation4_spill] sm:$0xff] %v6749_v22  ;;  %7289 = vst [vmem:[#allocation24_spill] sm:$0xff] %v6751_v6  ;;  %v6757_v22 = vrot.slane %v2986_v32, %v7290_v54 }
 0x8ea   :  { %v3600_v53 = vpop.f32.mrf.mxu0  ;;  %v3641_v1 = vpop.f32.mrf.mxu1 }
 0x8eb   :  { %v3648_v41 = vadd.f32 %v3600_v53, %v3227_v33  ;;  %v3302_v59 = vadd.f32 %v3301_v45, %v6757_v22  ;;  %v6762_v33 = vrot.slane %v2986_v32, %v7291_v43 }
 0x8ec   :  { %v3602_v16 = vpop.f32.mrf.mxu0  ;;  %v3643_v55 = vpop.f32.mrf.mxu1 }
 0x8ed   :  { %v4877_v25 = vmul.f32 -1.442695, %v3648_v41  ;;  %v3649_v57 = vadd.f32 %v3602_v16, %v3229_v15  ;;  %v3651_v53 = vadd.f32 %v3643_v55, %v3302_v59  ;;  %v3300_v16 = vadd.f32 %v3299_v40, %v6762_v33 }
 0x8ee   :  { %v3604_v30 = vpop.f32.mrf.mxu0  ;;  %v3645_v56 = vpop.f32.mrf.mxu1 }
 0x8ef   :  { %5278 = vpow2.f32 %v4877_v25  ;;  %v4878_v10 = vmul.f32 -1.442695, %v3649_v57  ;;  %v4879_v15 = vmul.f32 -1.442695, %v3651_v53  ;;  %v3650_v25 = vadd.f32 %v3641_v1, %v3300_v16 }
 0x8f0   :  { %v3605_v6 = vpop.f32.mrf.mxu0  ;;  %v3646_v51 = vpop.f32.mrf.mxu1  ;;  %v3231_v53 = vadd.f32 %v6686_v46, %v6739_v11  ;;  %v3306_v46 = vadd.f32 %v6692_v47, %v6757_v22 }
 0x8f1   :  { %5280 = vpow2.f32 %v4878_v10 }
 0x8f2   :  { %5282 = vpow2.f32 %v4879_v15 }
 0x8fc   :  { %v5279_v56 = vpop.eup %5278 }
 0x8fd   :  { %v3655_v57 = vadd.f32 1.0, %v5279_v56  ;;  %v3233_v56 = vadd.f32 %v6690_v48, %v6747_v9 }
 0x8fe   :  { %v5281_v30 = vpop.eup %5280 }
 0x8ff   :  { %5284 = vrcp.f32 %v3655_v57  ;;  %v3661_v54 = vadd.f32 1.0, %v5281_v30  ;;  %v5283_v51 = vpop.eup %5282 }
 0x900   :  { %5286 = vtanh.f32 %v3650_v25  ;;  %v3668_v39 = vadd.f32 1.0, %v5283_v51 }
 0x901   :  { %5288 = vrcp.f32 %v3661_v54 }
 0x902   :  { %5290 = vrcp.f32 %v3668_v39 }
 0x90c   :  { %v5285_v6 = vpop.eup %5284 }
 0x90d   :  { %v5287_v45 = vpop.eup %5286 }
 0x90e   :  { %v5289_v41 = vpop.eup %5288  ;;  %v3672_v10 = vmul.f32 %v5287_v45, %v5285_v6 }
 0x90f   :  { %v3671_v32 = vmul.f32 0.0, %v5289_v41  ;;  %v5291_v40 = vpop.eup %5290 }
 0x911   :  { %v6765_v55 = vadd.f32 %v3672_v10, %v3671_v32 }
 0x913   :  { %5292 = vtanh.f32 %v6765_v55 }
 0x920   :  { %v5293_v1 = vpop.eup %5292 }
 0x921   :  { %v3675_v59 = vmul.f32 %v5293_v1, %v5291_v40  ;;  %v3304_v40 = vadd.f32 %v6688_v3, %v6762_v33 }
 0x923   :  { %v3680_v43 = vpack.c.bf16 %v3675_v59, %v3675_v59 }
 0x925   :  { %3714 = vmatmul.mubr.bf16.vlgmr.msra.gmra.mxu0 %v3680_v43  ;;  %3755 = vmatmul.mubr.bf16.vlgmr.msra.gmra.mxu1 %v3680_v43 }
 0x926   :  { %3797 = vmatpush1.bf16.msra.mxu0 %v6463_v29  ;;  %3838 = vmatpush1.bf16.msra.mxu1 %v6468_v8 }
 0x927   :  { %3798 = vmatprep.subr.bf16.mxu0 %v6476_v23  ;;  %3839 = vmatprep.subr.bf16.mxu1 %v6481_v17 }
 0x928   :  { %3828 = vmatprep.mubr.bf16.mxu0 %v7246_v21  ;;  %3869 = vmatprep.mubr.bf16.mxu1 %v7246_v21 }
 0x92a   :  { %3799 = vmatpush1.bf16.msra.mxu0 %v6486_v27  ;;  %3840 = vmatpush1.bf16.msra.mxu1 %v6491_v19 }
 0x92b   :  { %3800 = vmatprep.subr.bf16.mxu0 %v6500_v7  ;;  %3841 = vmatprep.subr.bf16.mxu1 %v6505_v13 }
 0x92e   :  { %3801 = vmatpush1.bf16.msra.mxu0 %v6510_v14  ;;  %3842 = vmatpush1.bf16.msra.mxu1 %v6515_v26 }
 0x92f   :  { %3802 = vmatprep.subr.bf16.mxu0 %v6524_v12  ;;  %3843 = vmatprep.subr.bf16.mxu1 %v6529_v28 }
 0x932   :  { %3803 = vmatpush1.bf16.msra.mxu0 %v6534_v24  ;;  %3844 = vmatpush1.bf16.msra.mxu1 %v6539_v18 }
 0x933   :  { %3804 = vmatprep.subr.bf16.mxu0 %v6548_v35  ;;  %3845 = vmatprep.subr.bf16.mxu1 %v6553_v44 }
 0x936   :  { %3805 = vmatpush1.bf16.msra.mxu0 %v6558_v36  ;;  %3846 = vmatpush1.bf16.msra.mxu1 %v6563_v37 }
 0x937   :  { %3806 = vmatprep.subr.bf16.mxu0 %v6568_v38  ;;  %3847 = vmatprep.subr.bf16.mxu1 %v6573_v49 }
 0x93a   :  { %3807 = vmatpush1.bf16.msra.mxu0 %v6582_v58  ;;  %3848 = vmatpush1.bf16.msra.mxu1 %v6587_v60 }
 0x93b   :  { %3808 = vmatprep.subr.bf16.mxu0 %v6596_v61  ;;  %3849 = vmatprep.subr.bf16.mxu1 %v6601_v63 }
 0x93e   :  { %3809 = vmatpush1.bf16.msra.mxu0 %v6606_v0  ;;  %3850 = vmatpush1.bf16.msra.mxu1 %v6611_v2 }
 0x93f   :  { %3810 = vmatprep.subr.bf16.mxu0 %v6616_v4  ;;  %3851 = vmatprep.subr.bf16.mxu1 %v6623_v5 }
 0x942   :  { %3811 = vmatpush1.bf16.msra.mxu0 %v6630_v31  ;;  %3852 = vmatpush1.bf16.msra.mxu1 %v6635_v62 }
 0x943   :  { %3911 = vmatprep.subr.bf16.mxu0 %v6452_v34  ;;  %3952 = vmatprep.subr.bf16.mxu1 %v6457_v20 }
 0x9e5   :  { %v3715_v16 = vpop.f32.mrf.mxu0  ;;  %v3756_v15 = vpop.f32.mrf.mxu1 }
 0x9e6   :  { %v3763_v25 = vadd.f32 %v3715_v16, %v3231_v53  ;;  %v3765_v48 = vadd.f32 %v3756_v15, %v3304_v40 }
 0x9e7   :  { %v3717_v57 = vpop.f32.mrf.mxu0  ;;  %v3758_v30 = vpop.f32.mrf.mxu1 }
 0x9e8   :  { %v4880_v54 = vmul.f32 -1.442695, %v3763_v25  ;;  %v3764_v51 = vadd.f32 %v3717_v57, %v3233_v56  ;;  %v3766_v10 = vadd.f32 %v3758_v30, %v3306_v46  ;;  %v3239_v46 = vadd.f32 %v6698_v52, %v6747_v9 }
 0x9e9   :  { %v3719_v6 = vpop.f32.mrf.mxu0  ;;  %v3760_v45 = vpop.f32.mrf.mxu1 }
 0x9ea   :  { %5294 = vpow2.f32 %v4880_v54  ;;  %v4881_v41 = vmul.f32 -1.442695, %v3764_v51  ;;  %v4882_v1 = vmul.f32 -1.442695, %v3766_v10 }
 0x9eb   :  { %v3720_v39 = vpop.f32.mrf.mxu0  ;;  %v3761_v32 = vpop.f32.mrf.mxu1 }
 0x9ec   :  { %5296 = vpow2.f32 %v4881_v41 }
 0x9ed   :  { %5298 = vtanh.f32 %v3765_v48 }
 0x9ee   :  { %5300 = vpow2.f32 %v4882_v1 }
 0x9f7   :  { %v5295_v59 = vpop.eup %5294 }
 0x9f8   :  { %v3770_v43 = vadd.f32 1.0, %v5295_v59 }
 0x9f9   :  { %v5297_v53 = vpop.eup %5296 }
 0x9fa   :  { %5302 = vrcp.f32 %v3770_v43  ;;  %v3776_v16 = vadd.f32 1.0, %v5297_v53  ;;  %v5299_v56 = vpop.eup %5298 }
 0x9fb   :  { %v5301_v25 = vpop.eup %5300 }
 0x9fc   :  { %5304 = vrcp.f32 %v3776_v16  ;;  %v3783_v47 = vadd.f32 1.0, %v5301_v25 }
 0x9fe   :  { %5306 = vrcp.f32 %v3783_v47 }
 0xa07   :  { %v5303_v57 = vpop.eup %5302 }
 0xa08   :  { %v3787_v54 = vmul.f32 %v5303_v57, %v5299_v56 }
 0xa09   :  { %v5305_v51 = vpop.eup %5304 }
 0xa0a   :  { %v3786_v30 = vmul.f32 %v5305_v51, %v6765_v55  ;;  %v3237_v55 = vadd.f32 %v6694_v50, %v6739_v11  ;;  %v3312_v50 = vadd.f32 %v6700_v42, %v6757_v22 }
 0xa0b   :  { %v5307_v3 = vpop.eup %5306 }
 0xa0c   :  { %v6811_v6 = vadd.f32 %v3787_v54, %v3786_v30  ;;  %v7292_v54 = vld [vmem:[#allocation5_spill] sm:$0xff] }
 0xa0d   :  { %v3310_v51 = vadd.f32 %v7292_v54, %v6762_v33 }
 0xa0e   :  { %5308 = vtanh.f32 %v6811_v6 }
 0xa1b   :  { %v5309_v15 = vpop.eup %5308 }
 0xa1c   :  { %v3790_v45 = vmul.f32 %v5309_v15, %v5307_v3 }
 0xa1e   :  { %v3795_v41 = vpack.c.bf16 %v3790_v45, %v3790_v45 }
 0xa20   :  { %3829 = vmatmul.mubr.bf16.vlgmr.msra.gmra.mxu0 %v3795_v41  ;;  %3870 = vmatmul.mubr.bf16.vlgmr.msra.gmra.mxu1 %v3795_v41 }
 0xa21   :  { %3912 = vmatpush1.bf16.msra.mxu0 %v6463_v29  ;;  %3953 = vmatpush1.bf16.msra.mxu1 %v6468_v8 }
 0xa22   :  { %3913 = vmatprep.subr.bf16.mxu0 %v6476_v23  ;;  %3954 = vmatprep.subr.bf16.mxu1 %v6481_v17 }
 0xa23   :  { %3943 = vmatprep.mubr.bf16.mxu0 %v7246_v21  ;;  %3984 = vmatprep.mubr.bf16.mxu1 %v7246_v21 }
 0xa25   :  { %3914 = vmatpush1.bf16.msra.mxu0 %v6486_v27  ;;  %3955 = vmatpush1.bf16.msra.mxu1 %v6491_v19 }
 0xa26   :  { %3915 = vmatprep.subr.bf16.mxu0 %v6500_v7  ;;  %3956 = vmatprep.subr.bf16.mxu1 %v6505_v13 }
 0xa29   :  { %3916 = vmatpush1.bf16.msra.mxu0 %v6510_v14  ;;  %3957 = vmatpush1.bf16.msra.mxu1 %v6515_v26 }
 0xa2a   :  { %3917 = vmatprep.subr.bf16.mxu0 %v6524_v12  ;;  %3958 = vmatprep.subr.bf16.mxu1 %v6529_v28 }
 0xa2d   :  { %3918 = vmatpush1.bf16.msra.mxu0 %v6534_v24  ;;  %3959 = vmatpush1.bf16.msra.mxu1 %v6539_v18 }
 0xa2e   :  { %3919 = vmatprep.subr.bf16.mxu0 %v6548_v35  ;;  %3960 = vmatprep.subr.bf16.mxu1 %v6553_v44 }
 0xa31   :  { %3920 = vmatpush1.bf16.msra.mxu0 %v6558_v36  ;;  %3961 = vmatpush1.bf16.msra.mxu1 %v6563_v37 }
 0xa32   :  { %3921 = vmatprep.subr.bf16.mxu0 %v6568_v38  ;;  %3962 = vmatprep.subr.bf16.mxu1 %v6573_v49 }
 0xa35   :  { %3922 = vmatpush1.bf16.msra.mxu0 %v6582_v58  ;;  %3963 = vmatpush1.bf16.msra.mxu1 %v6587_v60 }
 0xa36   :  { %3923 = vmatprep.subr.bf16.mxu0 %v6596_v61  ;;  %3964 = vmatprep.subr.bf16.mxu1 %v6601_v63 }
 0xa39   :  { %3924 = vmatpush1.bf16.msra.mxu0 %v6606_v0  ;;  %3965 = vmatpush1.bf16.msra.mxu1 %v6611_v2 }
 0xa3a   :  { %3925 = vmatprep.subr.bf16.mxu0 %v6616_v4  ;;  %3966 = vmatprep.subr.bf16.mxu1 %v6623_v5 }
 0xa3d   :  { %3926 = vmatpush1.bf16.msra.mxu0 %v6630_v31  ;;  %3967 = vmatpush1.bf16.msra.mxu1 %v6635_v62 }
 0xa3e   :  { %4026 = vmatprep.subr.bf16.mxu0 %v6452_v34  ;;  %4067 = vmatprep.subr.bf16.mxu1 %v6457_v20 }
 0xae0   :  { %v3830_v39 = vpop.f32.mrf.mxu0  ;;  %v3871_v32 = vpop.f32.mrf.mxu1 }
 0xae1   :  { %v3878_v10 = vadd.f32 %v3830_v39, %v3237_v55  ;;  %v3880_v52 = vadd.f32 %v3871_v32, %v3310_v51 }
 0xae2   :  { %v3832_v40 = vpop.f32.mrf.mxu0  ;;  %v3873_v48 = vpop.f32.mrf.mxu1 }
 0xae3   :  { %v4883_v1 = vmul.f32 -1.442695, %v3878_v10  ;;  %v3879_v59 = vadd.f32 %v3832_v40, %v3239_v46  ;;  %v3881_v57 = vadd.f32 %v3873_v48, %v3312_v50 }
 0xae4   :  { %v3834_v43 = vpop.f32.mrf.mxu0  ;;  %v3875_v53 = vpop.f32.mrf.mxu1 }
 0xae5   :  { %5310 = vpow2.f32 %v4883_v1  ;;  %v4884_v16 = vmul.f32 -1.442695, %v3879_v59  ;;  %v4885_v47 = vmul.f32 -1.442695, %v3881_v57 }
 0xae6   :  { %v3835_v56 = vpop.f32.mrf.mxu0  ;;  %v3876_v25 = vpop.f32.mrf.mxu1 }
 0xae7   :  { %5312 = vpow2.f32 %v4884_v16  ;;  %v7294_v25 = vld [vmem:[#allocation9_spill] sm:$0xff] }
 0xae8   :  { %5314 = vtanh.f32 %v3880_v52  ;;  %v3243_v50 = vadd.f32 %v7294_v25, %v6747_v9 }
 0xae9   :  { %5316 = vpow2.f32 %v4885_v47 }
 0xaf2   :  { %v5311_v30 = vpop.eup %5310 }
 0xaf3   :  { %v3885_v3 = vadd.f32 1.0, %v5311_v30 }
 0xaf4   :  { %v5313_v15 = vpop.eup %5312 }
 0xaf5   :  { %5318 = vrcp.f32 %v3885_v3  ;;  %v3891_v45 = vadd.f32 1.0, %v5313_v15  ;;  %v5315_v41 = vpop.eup %5314 }
 0xaf6   :  { %v5317_v55 = vpop.eup %5316 }
 0xaf7   :  { %5320 = vrcp.f32 %v3891_v45  ;;  %v3898_v42 = vadd.f32 1.0, %v5317_v55 }
 0xaf9   :  { %5322 = vrcp.f32 %v3898_v42 }
 0xb02   :  { %v5319_v39 = vpop.eup %5318 }
 0xb03   :  { %v3902_v46 = vmul.f32 %v5319_v39, %v5315_v41  ;;  %v7296_v39 = vld [vmem:[#allocation8_spill] sm:$0xff] }
 0xb04   :  { %v5321_v10 = vpop.eup %5320 }
 0xb05   :  { %v3901_v40 = vmul.f32 %v5321_v10, %v6811_v6  ;;  %v7293_v6 = vld [vmem:[#allocation6_spill] sm:$0xff] }
 0xb06   :  { %v5323_v32 = vpop.eup %5322  ;;  %v3241_v53 = vadd.f32 %v7293_v6, %v6739_v11 }
 0xb07   :  { %v6857_v48 = vadd.f32 %v3902_v46, %v3901_v40  ;;  %v3314_v46 = vadd.f32 %v7296_v39, %v6762_v33 }
 0xb09   :  { %5324 = vtanh.f32 %v6857_v48 }
 0xb16   :  { %v5325_v1 = vpop.eup %5324 }
 0xb17   :  { %v3905_v59 = vmul.f32 %v5325_v1, %v5323_v32 }
 0xb19   :  { %v3910_v43 = vpack.c.bf16 %v3905_v59, %v3905_v59 }
 0xb1b   :  { %3944 = vmatmul.mubr.bf16.vlgmr.msra.gmra.mxu0 %v3910_v43  ;;  %3985 = vmatmul.mubr.bf16.vlgmr.msra.gmra.mxu1 %v3910_v43 }
 0xb1c   :  { %4027 = vmatpush1.bf16.msra.mxu0 %v6463_v29  ;;  %4068 = vmatpush1.bf16.msra.mxu1 %v6468_v8 }
 0xb1d   :  { %4028 = vmatprep.subr.bf16.mxu0 %v6476_v23  ;;  %4069 = vmatprep.subr.bf16.mxu1 %v6481_v17 }
 0xb1e   :  { %4058 = vmatprep.mubr.bf16.mxu0 %v7246_v21  ;;  %4099 = vmatprep.mubr.bf16.mxu1 %v7246_v21 }
 0xb20   :  { %4029 = vmatpush1.bf16.msra.mxu0 %v6486_v27  ;;  %4070 = vmatpush1.bf16.msra.mxu1 %v6491_v19 }
 0xb21   :  { %4030 = vmatprep.subr.bf16.mxu0 %v6500_v7  ;;  %4071 = vmatprep.subr.bf16.mxu1 %v6505_v13 }
 0xb24   :  { %4031 = vmatpush1.bf16.msra.mxu0 %v6510_v14  ;;  %4072 = vmatpush1.bf16.msra.mxu1 %v6515_v26 }
 0xb25   :  { %4032 = vmatprep.subr.bf16.mxu0 %v6524_v12  ;;  %4073 = vmatprep.subr.bf16.mxu1 %v6529_v28 }
 0xb28   :  { %4033 = vmatpush1.bf16.msra.mxu0 %v6534_v24  ;;  %4074 = vmatpush1.bf16.msra.mxu1 %v6539_v18 }
 0xb29   :  { %4034 = vmatprep.subr.bf16.mxu0 %v6548_v35  ;;  %4075 = vmatprep.subr.bf16.mxu1 %v6553_v44 }
 0xb2c   :  { %4035 = vmatpush1.bf16.msra.mxu0 %v6558_v36  ;;  %4076 = vmatpush1.bf16.msra.mxu1 %v6563_v37 }
 0xb2d   :  { %4036 = vmatprep.subr.bf16.mxu0 %v6568_v38  ;;  %4077 = vmatprep.subr.bf16.mxu1 %v6573_v49 }
 0xb30   :  { %4037 = vmatpush1.bf16.msra.mxu0 %v6582_v58  ;;  %4078 = vmatpush1.bf16.msra.mxu1 %v6587_v60 }
 0xb31   :  { %4038 = vmatprep.subr.bf16.mxu0 %v6596_v61  ;;  %4079 = vmatprep.subr.bf16.mxu1 %v6601_v63 }
 0xb34   :  { %4039 = vmatpush1.bf16.msra.mxu0 %v6606_v0  ;;  %4080 = vmatpush1.bf16.msra.mxu1 %v6611_v2 }
 0xb35   :  { %4040 = vmatprep.subr.bf16.mxu0 %v6616_v4  ;;  %4081 = vmatprep.subr.bf16.mxu1 %v6623_v5 }
 0xb38   :  { %4041 = vmatpush1.bf16.msra.mxu0 %v6630_v31  ;;  %4082 = vmatpush1.bf16.msra.mxu1 %v6635_v62 }
 0xb39   :  { %4141 = vmatprep.subr.bf16.mxu0 %v6452_v34  ;;  %4182 = vmatprep.subr.bf16.mxu1 %v6457_v20  ;;  %v7295_v20 = vld [vmem:[#allocation7_spill] sm:$0xff] }
 0xb3a   :  { %v3316_v41 = vadd.f32 %v7295_v20, %v6757_v22 }
 0xbdb   :  { %v3945_v16 = vpop.f32.mrf.mxu0  ;;  %v3986_v56 = vpop.f32.mrf.mxu1 }
 0xbdc   :  { %v3993_v57 = vadd.f32 %v3945_v16, %v3241_v53  ;;  %v3995_v10 = vadd.f32 %v3986_v56, %v3314_v46 }
 0xbdd   :  { %v3947_v54 = vpop.f32.mrf.mxu0  ;;  %v3988_v51 = vpop.f32.mrf.mxu1 }
 0xbde   :  { %v4886_v52 = vmul.f32 -1.442695, %v3993_v57  ;;  %v3994_v47 = vadd.f32 %v3947_v54, %v3243_v50  ;;  %v3996_v55 = vadd.f32 %v3988_v51, %v3316_v41 }
 0xbdf   :  { %v3949_v30 = vpop.f32.mrf.mxu0  ;;  %v3990_v3 = vpop.f32.mrf.mxu1 }
 0xbe0   :  { %5326 = vpow2.f32 %v4886_v52  ;;  %v4887_v15 = vmul.f32 -1.442695, %v3994_v47  ;;  %v4888_v42 = vmul.f32 -1.442695, %v3996_v55 }
 0xbe1   :  { %v3950_v34 = vpop.f32.mrf.mxu0  ;;  %v3991_v45 = vpop.f32.mrf.mxu1 }
 0xbe2   :  { %5328 = vpow2.f32 %v4887_v15 }
 0xbe3   :  { %5330 = vtanh.f32 %v3995_v10  ;;  %v6965_v10 = vld [vmem:[%s7215_s5 + $0xe0] ss:$16 sps:$4 sm:$0xff]  }
 0xbe4   :  { %5332 = vpow2.f32 %v4888_v42  ;;  %v6971_v42 = vld [vmem:[%s7215_s5 + $0xe8] ss:$16 sps:$4 sm:$0xff]  }
 0xbed   :  { %v5327_v40 = vpop.eup %5326 }
 0xbee   :  { %v4000_v32 = vadd.f32 1.0, %v5327_v40  ;;  %v6977_v40 = vld [vmem:[%s7215_s5 + $0xc4] ss:$16 sps:$4 sm:$0xff]  }
 0xbef   :  { %v5329_v1 = vpop.eup %5328 }
 0xbf0   :  { %5334 = vrcp.f32 %v4000_v32  ;;  %v4006_v59 = vadd.f32 1.0, %v5329_v1  ;;  %v5331_v43 = vpop.eup %5330  ;;  %v6983_v32 = vld [vmem:[%s7215_s5 + $0xcc] ss:$16 sps:$4 sm:$0xff]   ;;  %v6991_v1 = vld [vmem:[%s7215_s5 + $0xc0] ss:$16 sps:$4 sm:$0xff]  }
 0xbf1   :  { %v5333_v6 = vpop.eup %5332 }
 0xbf2   :  { %5336 = vrcp.f32 %v4006_v59  ;;  %v4013_v50 = vadd.f32 1.0, %v5333_v6  ;;  %v6997_v59 = vld [vmem:[%s7215_s5 + $0xc8] ss:$16 sps:$4 sm:$0xff]   ;;  %v7009_v6 = vld [vmem:[%s7215_s5 + $0xac] ss:$16 sps:$4 sm:$0xff]  }
 0xbf4   :  { %5338 = vrcp.f32 %v4013_v50  ;;  %v7033_v50 = vld [vmem:[%s7215_s5 + $0x8c] ss:$16 sps:$4 sm:$0xff]  }
 0xbfd   :  { %v5335_v53 = vpop.eup %5334 }
 0xbfe   :  { %v4017_v16 = vmul.f32 %v5335_v53, %v5331_v43  ;;  %v7003_v43 = vld [vmem:[%s7215_s5 + $0xa4] ss:$16 sps:$4 sm:$0xff]   ;;  %v7015_v53 = vld [vmem:[%s7215_s5 + $0xa0] ss:$16 sps:$4 sm:$0xff]  }
 0xbff   :  { %v5337_v25 = vpop.eup %5336 }
 0xc00   :  { %v4016_v57 = vmul.f32 %v5337_v25, %v6857_v48  ;;  %v7027_v25 = vld [vmem:[%s7215_s5 + $0x84] ss:$16 sps:$4 sm:$0xff]  }
 0xc01   :  { %v5339_v56 = vpop.eup %5338 }
 0xc02   :  { %v6903_v54 = vadd.f32 %v4017_v16, %v4016_v57  ;;  %v7021_v16 = vld [vmem:[%s7215_s5 + $0xa8] ss:$16 sps:$4 sm:$0xff]   ;;  %v7039_v57 = vld [vmem:[%s7215_s5 + $0x80] ss:$16 sps:$4 sm:$0xff]  }
 0xc04   :  { %5340 = vtanh.f32 %v6903_v54 }
 0xc11   :  { %v5341_v51 = vpop.eup %5340 }
 0xc12   :  { %v4020_v52 = vmul.f32 %v5341_v51, %v5339_v56  ;;  %v7051_v56 = vld [vmem:[%s7215_s5 + $0x64] ss:$16 sps:$4 sm:$0xff]   ;;  %v7057_v51 = vld [vmem:[%s7215_s5 + $0x6c] ss:$16 sps:$4 sm:$0xff]  }
 0xc14   :  { %v4025_v47 = vpack.c.bf16 %v4020_v52, %v4020_v52  ;;  %v7063_v52 = vld [vmem:[%s7215_s5 + $0x60] ss:$16 sps:$4 sm:$0xff]  }
 0xc16   :  { %4059 = vmatmul.mubr.bf16.vlgmr.msra.gmra.mxu0 %v4025_v47  ;;  %4100 = vmatmul.mubr.bf16.vlgmr.msra.gmra.mxu1 %v4025_v47  ;;  %v7069_v47 = vld [vmem:[%s7215_s5 + $0x68] ss:$16 sps:$4 sm:$0xff]  }
 0xc17   :  { %4142 = vmatpush1.bf16.msra.mxu0 %v6463_v29  ;;  %4183 = vmatpush1.bf16.msra.mxu1 %v6468_v8  ;;  %v6941_v29 = vld [vmem:[%s7215_s5 + $0xe4] ss:$16 sps:$4 sm:$0xff]   ;;  %v6947_v8 = vld [vmem:[%s7215_s5 + $0xec] ss:$16 sps:$4 sm:$0xff]  }
 0xc18   :  { %4143 = vmatprep.subr.bf16.mxu0 %v6476_v23  ;;  %4184 = vmatprep.subr.bf16.mxu1 %v6481_v17  ;;  %v7297_v23 = vld [vmem:[#allocation10_spill] sm:$0xff] }
 0xc19   :  { %4173 = vmatprep.mubr.bf16.mxu0 %v7246_v21  ;;  %4214 = vmatprep.mubr.bf16.mxu1 %v7246_v21  ;;  %v3247_v17 = vadd.f32 %v7297_v23, %v6739_v11  ;;  %v7075_v23 = vld [vmem:[%s7215_s5 + $0x44] ss:$16 sps:$4 sm:$0xff]  }
 0xc1b   :  { %4144 = vmatpush1.bf16.msra.mxu0 %v6486_v27  ;;  %4185 = vmatpush1.bf16.msra.mxu1 %v6491_v19 }
 0xc1c   :  { %4145 = vmatprep.subr.bf16.mxu0 %v6500_v7  ;;  %4186 = vmatprep.subr.bf16.mxu1 %v6505_v13  ;;  %v7298_v7 = vld [vmem:[#allocation13_spill] sm:$0xff] }
 0xc1d   :  { %v3249_v13 = vadd.f32 %v7298_v7, %v6747_v9  ;;  %v7099_v7 = vld [vmem:[%s7215_s5 + $0x24] ss:$16 sps:$4 sm:$0xff]  }
 0xc1f   :  { %4146 = vmatpush1.bf16.msra.mxu0 %v6510_v14  ;;  %4187 = vmatpush1.bf16.msra.mxu1 %v6515_v26 }
 0xc20   :  { %4147 = vmatprep.subr.bf16.mxu0 %v6524_v12  ;;  %4188 = vmatprep.subr.bf16.mxu1 %v6529_v28 }
 0xc23   :  { %4148 = vmatpush1.bf16.msra.mxu0 %v6534_v24  ;;  %4189 = vmatpush1.bf16.msra.mxu1 %v6539_v18 }
 0xc24   :  { %4149 = vmatprep.subr.bf16.mxu0 %v6548_v35  ;;  %4190 = vmatprep.subr.bf16.mxu1 %v6553_v44 }
 0xc27   :  { %4150 = vmatpush1.bf16.msra.mxu0 %v6558_v36  ;;  %4191 = vmatpush1.bf16.msra.mxu1 %v6563_v37 }
 0xc28   :  { %4151 = vmatprep.subr.bf16.mxu0 %v6568_v38  ;;  %4192 = vmatprep.subr.bf16.mxu1 %v6573_v49  ;;  %v7299_v38 = vld [vmem:[#allocation11_spill] sm:$0xff] }
 0xc29   :  { %v3322_v49 = vadd.f32 %v7299_v38, %v6757_v22  ;;  %v7302_v38 = vld [vmem:[#allocation17_spill] sm:$0xff] }
 0xc2b   :  { %4152 = vmatpush1.bf16.msra.mxu0 %v6582_v58  ;;  %4193 = vmatpush1.bf16.msra.mxu1 %v6587_v60  ;;  %v7300_v60 = vld [vmem:[#allocation12_spill] sm:$0xff] }
 0xc2c   :  { %4153 = vmatprep.subr.bf16.mxu0 %v6596_v61  ;;  %4194 = vmatprep.subr.bf16.mxu1 %v6601_v63  ;;  %v3320_v61 = vadd.f32 %v7300_v60, %v6762_v33 }
 0xc2f   :  { %4154 = vmatpush1.bf16.msra.mxu0 %v6606_v0  ;;  %4195 = vmatpush1.bf16.msra.mxu1 %v6611_v2 }
 0xc30   :  { %4155 = vmatprep.subr.bf16.mxu0 %v6616_v4  ;;  %4196 = vmatprep.subr.bf16.mxu1 %v6623_v5 }
 0xc33   :  { %4156 = vmatpush1.bf16.msra.mxu0 %v6630_v31  ;;  %4197 = vmatpush1.bf16.msra.mxu1 %v6635_v62 }
 0xc34   :  { %4256 = vmatprep.subr.bf16.mxu0 %v6941_v29  ;;  %4297 = vmatprep.subr.bf16.mxu1 %v6947_v8 }
 0xcd6   :  { %v4060_v27 = vpop.f32.mrf.mxu0  ;;  %v4101_v19 = vpop.f32.mrf.mxu1 }
 0xcd7   :  { %v4108_v14 = vadd.f32 %v4060_v27, %v3247_v17  ;;  %v4110_v63 = vadd.f32 %v4101_v19, %v3320_v61  ;;  %v7081_v17 = vld [vmem:[%s7215_s5 + $0x4c] ss:$16 sps:$4 sm:$0xff]   ;;  %v7087_v27 = vld [vmem:[%s7215_s5 + $0x40] ss:$16 sps:$4 sm:$0xff]   ;;  %v7093_v19 = vld [vmem:[%s7215_s5 + $0x48] ss:$16 sps:$4 sm:$0xff]  }
 0xcd8   :  { %v4062_v26 = vpop.f32.mrf.mxu0  ;;  %v4103_v12 = vpop.f32.mrf.mxu1 }
 0xcd9   :  { %v4889_v28 = vmul.f32 -1.442695, %v4108_v14  ;;  %v4109_v24 = vadd.f32 %v4062_v26, %v3249_v13  ;;  %v4111_v58 = vadd.f32 %v4103_v12, %v3322_v49  ;;  %v7105_v13 = vld [vmem:[%s7215_s5 + $0x2c] ss:$16 sps:$4 sm:$0xff]   ;;  %v7111_v14 = vld [vmem:[%s7215_s5 + $0x20] ss:$16 sps:$4 sm:$0xff]   ;;  %v3253_v49 = vadd.f32 %v7302_v38, %v6747_v9 }
 0xcda   :  { %v4064_v18 = vpop.f32.mrf.mxu0  ;;  %v4105_v35 = vpop.f32.mrf.mxu1  ;;  %v7117_v26 = vld [vmem:[%s7215_s5 + $0x28] ss:$16 sps:$4 sm:$0xff]   ;;  %v7123_v12 = vld [vmem:[%s7215_s5 + $0x4] ss:$16 sps:$4 sm:$0xff]  }
 0xcdb   :  { %5342 = vpow2.f32 %v4889_v28  ;;  %v4890_v44 = vmul.f32 -1.442695, %v4109_v24  ;;  %v4891_v0 = vmul.f32 -1.442695, %v4111_v58  ;;  %v7129_v28 = vld [vmem:[%s7215_s5 + $0xc] ss:$16 sps:$4 sm:$0xff]  }
 0xcdc   :  { %v4065_v36 = vpop.f32.mrf.mxu0  ;;  %v4106_v37 = vpop.f32.mrf.mxu1  ;;  %v7135_v24 = vld [vmem:[%s7215_s5] ss:$16 sps:$4 sm:$0xff]   ;;  %v7141_v18 = vld [vmem:[%s7215_s5 + $0x8] ss:$16 sps:$4 sm:$0xff]  }
 0xcdd   :  { %5344 = vpow2.f32 %v4890_v44  ;;  %v7301_v35 = vld [vmem:[#allocation14_spill] sm:$0xff] }
 0xcde   :  { %5346 = vtanh.f32 %v4110_v63  ;;  %v3251_v44 = vadd.f32 %v7301_v35, %v6739_v11 }
 0xcdf   :  { %5348 = vpow2.f32 %v4891_v0 }
 0xce8   :  { %v5343_v2 = vpop.eup %5342 }
 0xce9   :  { %v4115_v4 = vadd.f32 1.0, %v5343_v2 }
 0xcea   :  { %v5345_v5 = vpop.eup %5344 }
 0xceb   :  { %5350 = vrcp.f32 %v4115_v4  ;;  %v4121_v31 = vadd.f32 1.0, %v5345_v5  ;;  %v5347_v62 = vpop.eup %5346 }
 0xcec   :  { %v5349_v48 = vpop.eup %5348 }
 0xced   :  { %5352 = vrcp.f32 %v4121_v31  ;;  %v4128_v34 = vadd.f32 1.0, %v5349_v48 }
 0xcef   :  { %5354 = vrcp.f32 %v4128_v34 }
 0xcf8   :  { %v5351_v30 = vpop.eup %5350 }
 0xcf9   :  { %v4132_v3 = vmul.f32 %v5351_v30, %v5347_v62  ;;  %v7304_v30 = vld [vmem:[#allocation16_spill] sm:$0xff] }
 0xcfa   :  { %v5353_v15 = vpop.eup %5352 }
 0xcfb   :  { %v4131_v45 = vmul.f32 %v5353_v15, %v6903_v54  ;;  %v7045_v54 = vld [vmem:[%s7215_s5 + $0x88] ss:$16 sps:$4 sm:$0xff]  }
 0xcfc   :  { %v5355_v41 = vpop.eup %5354 }
 0xcfd   :  { %v6959_v20 = vadd.f32 %v4132_v3, %v4131_v45  ;;  %v3324_v3 = vadd.f32 %v7304_v30, %v6762_v33 }
 0xcff   :  { %5356 = vtanh.f32 %v6959_v20 }
 0xd0c   :  { %v5357_v55 = vpop.eup %5356 }
 0xd0d   :  { %v4135_v39 = vmul.f32 %v5357_v55, %v5355_v41 }
 0xd0f   :  { %v4140_v46 = vpack.c.bf16 %v4135_v39, %v4135_v39 }
 0xd11   :  { %4174 = vmatmul.mubr.bf16.vlgmr.msra.gmra.mxu0 %v4140_v46  ;;  %4215 = vmatmul.mubr.bf16.vlgmr.msra.gmra.mxu1 %v4140_v46 }
 0xd12   :  { %4257 = vmatpush1.bf16.msra.mxu0 %v6965_v10  ;;  %4298 = vmatpush1.bf16.msra.mxu1 %v6971_v42 }
 0xd13   :  { %4258 = vmatprep.subr.bf16.mxu0 %v6977_v40  ;;  %4299 = vmatprep.subr.bf16.mxu1 %v6983_v32 }
 0xd14   :  { %4288 = vmatprep.mubr.bf16.mxu0 %v7246_v21  ;;  %4329 = vmatprep.mubr.bf16.mxu1 %v7246_v21 }
 0xd16   :  { %4259 = vmatpush1.bf16.msra.mxu0 %v6991_v1  ;;  %4300 = vmatpush1.bf16.msra.mxu1 %v6997_v59 }
 0xd17   :  { %4260 = vmatprep.subr.bf16.mxu0 %v7003_v43  ;;  %4301 = vmatprep.subr.bf16.mxu1 %v7009_v6 }
 0xd1a   :  { %4261 = vmatpush1.bf16.msra.mxu0 %v7015_v53  ;;  %4302 = vmatpush1.bf16.msra.mxu1 %v7021_v16 }
 0xd1b   :  { %4262 = vmatprep.subr.bf16.mxu0 %v7027_v25  ;;  %4303 = vmatprep.subr.bf16.mxu1 %v7033_v50 }
 0xd1e   :  { %4263 = vmatpush1.bf16.msra.mxu0 %v7039_v57  ;;  %4304 = vmatpush1.bf16.msra.mxu1 %v7045_v54 }
 0xd1f   :  { %4264 = vmatprep.subr.bf16.mxu0 %v7051_v56  ;;  %4305 = vmatprep.subr.bf16.mxu1 %v7057_v51 }
 0xd22   :  { %4265 = vmatpush1.bf16.msra.mxu0 %v7063_v52  ;;  %4306 = vmatpush1.bf16.msra.mxu1 %v7069_v47 }
 0xd23   :  { %4266 = vmatprep.subr.bf16.mxu0 %v7075_v23  ;;  %4307 = vmatprep.subr.bf16.mxu1 %v7081_v17 }
 0xd26   :  { %4267 = vmatpush1.bf16.msra.mxu0 %v7087_v27  ;;  %4308 = vmatpush1.bf16.msra.mxu1 %v7093_v19 }
 0xd27   :  { %4268 = vmatprep.subr.bf16.mxu0 %v7099_v7  ;;  %4309 = vmatprep.subr.bf16.mxu1 %v7105_v13 }
 0xd2a   :  { %4269 = vmatpush1.bf16.msra.mxu0 %v7111_v14  ;;  %4310 = vmatpush1.bf16.msra.mxu1 %v7117_v26 }
 0xd2b   :  { %4270 = vmatprep.subr.bf16.mxu0 %v7123_v12  ;;  %4311 = vmatprep.subr.bf16.mxu1 %v7129_v28 }
 0xd2e   :  { %4271 = vmatpush1.bf16.msra.mxu0 %v7135_v24  ;;  %4312 = vmatpush1.bf16.msra.mxu1 %v7141_v18 }
 0xd2f   :  { %4371 = vmatprep.subr.bf16.mxu0 %v6941_v29  ;;  %4412 = vmatprep.subr.bf16.mxu1 %v6947_v8  ;;  %v7303_v8 = vld [vmem:[#allocation15_spill] sm:$0xff] }
 0xd30   :  { %v3326_v62 = vadd.f32 %v7303_v8, %v6757_v22 }
 0xdd1   :  { %v4175_v36 = vpop.f32.mrf.mxu0  ;;  %v4216_v37 = vpop.f32.mrf.mxu1 }
 0xdd2   :  { %v4223_v58 = vadd.f32 %v4175_v36, %v3251_v44  ;;  %v4225_v15 = vadd.f32 %v4216_v37, %v3324_v3 }
 0xdd3   :  { %v4177_v60 = vpop.f32.mrf.mxu0  ;;  %v4218_v61 = vpop.f32.mrf.mxu1 }
 0xdd4   :  { %v4892_v63 = vmul.f32 -1.442695, %v4223_v58  ;;  %v4224_v0 = vadd.f32 %v4177_v60, %v3253_v49  ;;  %v4226_v48 = vadd.f32 %v4218_v61, %v3326_v62 }
 0xdd5   :  { %v4179_v2 = vpop.f32.mrf.mxu0  ;;  %v4220_v4 = vpop.f32.mrf.mxu1 }
 0xdd6   :  { %5358 = vpow2.f32 %v4892_v63  ;;  %v4893_v5 = vmul.f32 -1.442695, %v4224_v0  ;;  %v4894_v34 = vmul.f32 -1.442695, %v4226_v48  ;;  %v7309_v48 = vld [vmem:[#allocation22_spill] sm:$0xff] }
 0xdd7   :  { %v4180_v29 = vpop.f32.mrf.mxu0  ;;  %v4221_v31 = vpop.f32.mrf.mxu1  ;;  %v3261_v30 = vadd.f32 %v7309_v48, %v6739_v11 }
 0xdd8   :  { %5360 = vpow2.f32 %v4893_v5 }
 0xdd9   :  { %5362 = vtanh.f32 %v4225_v15 }
 0xdda   :  { %5364 = vpow2.f32 %v4894_v34  ;;  %v7310_v34 = vld [vmem:[#allocation4_spill] sm:$0xff] }
 0xde3   :  { %v5359_v45 = vpop.eup %5358 }
 0xde4   :  { %v4230_v41 = vadd.f32 1.0, %v5359_v45  ;;  %v3263_v45 = vadd.f32 %v7310_v34, %v6747_v9 }
 0xde5   :  { %v5361_v55 = vpop.eup %5360 }
 0xde6   :  { %5366 = vrcp.f32 %v4230_v41  ;;  %v4236_v39 = vadd.f32 1.0, %v5361_v55  ;;  %v5363_v46 = vpop.eup %5362 }
 0xde7   :  { %v5365_v35 = vpop.eup %5364 }
 0xde8   :  { %5368 = vrcp.f32 %v4236_v39  ;;  %v4243_v49 = vadd.f32 1.0, %v5365_v35 }
 0xdea   :  { %5370 = vrcp.f32 %v4243_v49 }
 0xdf3   :  { %v5367_v44 = vpop.eup %5366 }
 0xdf4   :  { %v4247_v36 = vmul.f32 %v5367_v44, %v5363_v46 }
 0xdf5   :  { %v5369_v38 = vpop.eup %5368 }
 0xdf6   :  { %v4246_v58 = vmul.f32 %v5369_v38, %v6959_v20 }
 0xdf7   :  { %v5371_v37 = vpop.eup %5370 }
 0xdf8   :  { %v7155_v60 = vadd.f32 %v4247_v36, %v4246_v58 }
 0xdfa   :  { %5372 = vtanh.f32 %v7155_v60 }
 0xe07   :  { %v5373_v61 = vpop.eup %5372 }
 0xe08   :  { %v4250_v63 = vmul.f32 %v5373_v61, %v5371_v37  ;;  %v7312_v61 = vld [vmem:[#allocation23_spill] sm:$0xff] }
 0xe0a   :  { %v4255_v0 = vpack.c.bf16 %v4250_v63, %v4250_v63  ;;  %v3334_v63 = vadd.f32 %v7312_v61, %v6762_v33 }
 0xe0c   :  { %4289 = vmatmul.mubr.bf16.vlgmr.msra.gmra.mxu0 %v4255_v0  ;;  %4330 = vmatmul.mubr.bf16.vlgmr.msra.gmra.mxu1 %v4255_v0 }
 0xe0d   :  { %4372 = vmatpush1.bf16.msra.mxu0 %v6965_v10  ;;  %4413 = vmatpush1.bf16.msra.mxu1 %v6971_v42 }
 0xe0e   :  { %4373 = vmatprep.subr.bf16.mxu0 %v6977_v40  ;;  %4414 = vmatprep.subr.bf16.mxu1 %v6983_v32  ;;  %v7306_v40 = vld [vmem:[#allocation21_spill] sm:$0xff] }
 0xe0f   :  { %4403 = vmatprep.mubr.bf16.mxu0 %v7246_v21  ;;  %4444 = vmatprep.mubr.bf16.mxu1 %v7246_v21  ;;  %v7305_v21 = vld [vmem:[#allocation18_spill] sm:$0xff]  ;;  %v3259_v32 = vadd.f32 %v7306_v40, %v6747_v9 }
 0xe10   :  { %v3257_v20 = vadd.f32 %v7305_v21, %v6739_v11 }
 0xe11   :  { %4374 = vmatpush1.bf16.msra.mxu0 %v6991_v1  ;;  %4415 = vmatpush1.bf16.msra.mxu1 %v6997_v59 }
 0xe12   :  { %4375 = vmatprep.subr.bf16.mxu0 %v7003_v43  ;;  %4416 = vmatprep.subr.bf16.mxu1 %v7009_v6 }
 0xe15   :  { %4376 = vmatpush1.bf16.msra.mxu0 %v7015_v53  ;;  %4417 = vmatpush1.bf16.msra.mxu1 %v7021_v16 }
 0xe16   :  { %4377 = vmatprep.subr.bf16.mxu0 %v7027_v25  ;;  %4418 = vmatprep.subr.bf16.mxu1 %v7033_v50 }
 0xe19   :  { %4378 = vmatpush1.bf16.msra.mxu0 %v7039_v57  ;;  %4419 = vmatpush1.bf16.msra.mxu1 %v7045_v54 }
 0xe1a   :  { %4379 = vmatprep.subr.bf16.mxu0 %v7051_v56  ;;  %4420 = vmatprep.subr.bf16.mxu1 %v7057_v51  ;;  %v7307_v56 = vld [vmem:[#allocation19_spill] sm:$0xff] }
 0xe1b   :  { %v3332_v51 = vadd.f32 %v7307_v56, %v6757_v22 }
 0xe1d   :  { %4380 = vmatpush1.bf16.msra.mxu0 %v7063_v52  ;;  %4421 = vmatpush1.bf16.msra.mxu1 %v7069_v47  ;;  %v7308_v47 = vld [vmem:[#allocation20_spill] sm:$0xff] }
 0xe1e   :  { %4381 = vmatprep.subr.bf16.mxu0 %v7075_v23  ;;  %4422 = vmatprep.subr.bf16.mxu1 %v7081_v17  ;;  %v3330_v23 = vadd.f32 %v7308_v47, %v6762_v33 }
 0xe21   :  { %4382 = vmatpush1.bf16.msra.mxu0 %v7087_v27  ;;  %4423 = vmatpush1.bf16.msra.mxu1 %v7093_v19 }
 0xe22   :  { %4383 = vmatprep.subr.bf16.mxu0 %v7099_v7  ;;  %4424 = vmatprep.subr.bf16.mxu1 %v7105_v13 }
 0xe25   :  { %4384 = vmatpush1.bf16.msra.mxu0 %v7111_v14  ;;  %4425 = vmatpush1.bf16.msra.mxu1 %v7117_v26 }
 0xe26   :  { %4385 = vmatprep.subr.bf16.mxu0 %v7123_v12  ;;  %4426 = vmatprep.subr.bf16.mxu1 %v7129_v28 }
 0xe29   :  { %4386 = vmatpush1.bf16.msra.mxu0 %v7135_v24  ;;  %4427 = vmatpush1.bf16.msra.mxu1 %v7141_v18 }
 0xecc   :  { %v4290_v10 = vpop.f32.mrf.mxu0  ;;  %v4331_v42 = vpop.f32.mrf.mxu1 }
 0xecd   :  { %v4338_v1 = vadd.f32 %v4290_v10, %v3257_v20  ;;  %v4340_v17 = vadd.f32 %v4331_v42, %v3330_v23 }
 0xece   :  { %v4292_v59 = vpop.f32.mrf.mxu0  ;;  %v4333_v43 = vpop.f32.mrf.mxu1 }
 0xecf   :  { %v4895_v6 = vmul.f32 -1.442695, %v4338_v1  ;;  %v4339_v53 = vadd.f32 %v4292_v59, %v3259_v32  ;;  %v4341_v52 = vadd.f32 %v4333_v43, %v3332_v51 }
 0xed0   :  { %v4294_v16 = vpop.f32.mrf.mxu0  ;;  %v4335_v25 = vpop.f32.mrf.mxu1 }
 0xed1   :  { %5374 = vpow2.f32 %v4895_v6  ;;  %v4896_v50 = vmul.f32 -1.442695, %v4339_v53  ;;  %v4897_v27 = vmul.f32 -1.442695, %v4341_v52 }
 0xed2   :  { %v4295_v57 = vpop.f32.mrf.mxu0  ;;  %v4336_v54 = vpop.f32.mrf.mxu1 }
 0xed3   :  { %5376 = vpow2.f32 %v4896_v50 }
 0xed4   :  { %5378 = vtanh.f32 %v4340_v17 }
 0xed5   :  { %5380 = vpow2.f32 %v4897_v27 }
 0xede   :  { %v5375_v19 = vpop.eup %5374 }
 0xedf   :  { %v4345_v7 = vadd.f32 1.0, %v5375_v19 }
 0xee0   :  { %v5377_v13 = vpop.eup %5376 }
 0xee1   :  { %5382 = vrcp.f32 %v4345_v7  ;;  %v4351_v14 = vadd.f32 1.0, %v5377_v13  ;;  %v5379_v26 = vpop.eup %5378 }
 0xee2   :  { %v5381_v12 = vpop.eup %5380 }
 0xee3   :  { %5384 = vrcp.f32 %v4351_v14  ;;  %v4358_v2 = vadd.f32 1.0, %v5381_v12 }
 0xee5   :  { %5386 = vrcp.f32 %v4358_v2 }
 0xeee   :  { %v5383_v28 = vpop.eup %5382 }
 0xeef   :  { %v4362_v24 = vmul.f32 %v5383_v28, %v5379_v26 }
 0xef0   :  { %v5385_v18 = vpop.eup %5384 }
 0xef1   :  { %v4361_v4 = vmul.f32 %v5385_v18, %v7155_v60  ;;  %v7311_v60 = vld [vmem:[#allocation24_spill] sm:$0xff] }
 0xef2   :  { %v5387_v29 = vpop.eup %5386  ;;  %v3336_v11 = vadd.f32 %v7311_v60, %v6757_v22 }
 0xef3   :  { %v4363_v5 = vadd.f32 %v4362_v24, %v4361_v4 }
 0xef5   :  { %5388 = vtanh.f32 %v4363_v5 }
 0xf02   :  { %v5389_v31 = vpop.eup %5388 }
 0xf03   :  { %v4365_v8 = vmul.f32 %v5389_v31, %v5387_v29 }
 0xf05   :  { %v4370_v62 = vpack.c.bf16 %v4365_v8, %v4365_v8 }
 0xf07   :  { %4404 = vmatmul.mubr.bf16.vlgmr.msra.gmra.mxu0 %v4370_v62  ;;  %4445 = vmatmul.mubr.bf16.vlgmr.msra.gmra.mxu1 %v4370_v62 }
 0xfc7   :  { %v4405_v3 = vpop.f32.mrf.mxu0  ;;  %v4446_v15 = vpop.f32.mrf.mxu1 }
 0xfc8   :  { %v4453_v41 = vadd.f32 %v4405_v3, %v3261_v30  ;;  %v4455_v9 = vadd.f32 %v4446_v15, %v3334_v63 }
 0xfc9   :  { %v4407_v55 = vpop.f32.mrf.mxu0  ;;  %v4448_v39 = vpop.f32.mrf.mxu1 }
 0xfca   :  { %v4898_v46 = vmul.f32 -1.442695, %v4453_v41  ;;  %v4454_v35 = vadd.f32 %v4407_v55, %v3263_v45  ;;  %v4456_v37 = vadd.f32 %v4448_v39, %v3336_v11 }
 0xfcb   :  { %v4409_v44 = vpop.f32.mrf.mxu0  ;;  %v4450_v36 = vpop.f32.mrf.mxu1 }
 0xfcc   :  { %5390 = vpow2.f32 %v4898_v46  ;;  %v4899_v38 = vmul.f32 -1.442695, %v4454_v35  ;;  %v4900_v0 = vmul.f32 -1.442695, %v4456_v37 }
 0xfcd   :  { %v4410_v49 = vpop.f32.mrf.mxu0  ;;  %v4451_v58 = vpop.f32.mrf.mxu1 }
 0xfce   :  { %5392 = vpow2.f32 %v4899_v38 }
 0xfcf   :  { %5394 = vtanh.f32 %v4455_v9 }
 0xfd0   :  { %5396 = vpow2.f32 %v4900_v0 }
 0xfd9   :  { %v5391_v21 = vpop.eup %5390 }
 0xfda   :  { %v4460_v20 = vadd.f32 1.0, %v5391_v21 }
 0xfdb   :  { %v5393_v10 = vpop.eup %5392 }
 0xfdc   :  { %5398 = vrcp.f32 %v4460_v20  ;;  %v4466_v42 = vadd.f32 1.0, %v5393_v10  ;;  %v5395_v40 = vpop.eup %5394 }
 0xfdd   :  { %v5397_v32 = vpop.eup %5396 }
 0xfde   :  { %5400 = vrcp.f32 %v4466_v42  ;;  %v4473_v22 = vadd.f32 1.0, %v5397_v32 }
 0xfe0   :  { %5402 = vrcp.f32 %v4473_v22 }
 0xfe9   :  { %v5399_v1 = vpop.eup %5398 }
 0xfea   :  { %v4477_v59 = vmul.f32 %v5399_v1, %v5395_v40 }
 0xfeb   :  { %v5401_v43 = vpop.eup %5400 }
 0xfec   :  { %v4476_v6 = vmul.f32 %v5401_v43, %v4363_v5 }
 0xfed   :  { %v5403_v33 = vpop.eup %5402 }
 0xfee   :  { %v4478_v53 = vadd.f32 %v4477_v59, %v4476_v6 }
 0xff0   :  { %5404 = vtanh.f32 %v4478_v53 }
 0xffd   :  { %v5405_v16 = vpop.eup %5404 }
 0xffe   :  { %v4480_v25 = vmul.f32 %v5405_v16, %v5403_v33 }
0x1000   :  { %4481 = vst [vmem:[%s7217_s7] sm:$0xff] %v4480_v25 }

</bundles_post_ra>
